<compile_context>
chip_gen: v5e
topology: v5e:2x2
jax: 0.10.0
libtpu: 0.0.40
codegen_flags: <defaults>
</compile_context>

<pallas_src>
import functools

import jax
import jax.numpy as jnp
from jax.experimental import pallas as pl
from jax.experimental.pallas import tpu as pltpu

# Matmul operand dtype.  jnp.bfloat16 gives ~2-3x MXU throughput and halves
# weight VMEM / HBM traffic on v5e/v6e/v7x, but perturbs numerics vs the f32
# PyTorch module (would exceed the 1e-4 allclose check below), so we keep f32
# to preserve forward-pass semantics exactly.  Gate nonlinearities and the
# c/h carries are f32 in all cases (v5e's VPU/EUP have no bf16).
MATMUL_DTYPE = jnp.float32


def _round_up(x, m):
    return (x + m - 1) // m * m


def _vmem_limit(nbytes):
    """Scoped-VMEM limit: ~2x the working set, clamped to this chip's capacity
    (128 MiB on v5e/v6e, 64 MiB per TensorCore on v7x) minus headroom."""
    try:
        cap = int(pltpu.get_tpu_info().vmem_capacity_bytes)
    except Exception:                       # no TPU info -> conservative (v7x)
        cap = 64 << 20
    return int(min(max(2 * nbytes + (1 << 20), 16 << 20), cap - (8 << 20)))


# -----------------------------------------------------------------------------
# Generic parallel matmul + bias kernel (used for stage A and stage C).
# -----------------------------------------------------------------------------
def matmul_bias_kernel(x_ref, w_ref, b_ref, o_ref):
    acc = jnp.dot(x_ref[...].astype(MATMUL_DTYPE),
                  w_ref[...].astype(MATMUL_DTYPE),
                  preferred_element_type=jnp.float32)
    o_ref[...] = (acc + b_ref[...]).astype(o_ref.dtype)


def _pick_col_tile(N, K):
    # Largest lane-dense column tile that divides N and keeps the
    # double-buffered (K, TN) weight tile under ~16 MiB.
    for c in (2048, 1024, 512, 256, 128):
        if N % c == 0 and K * c * 8 <= (16 << 20):
            return c
    return 128


def matmul_bias(x, w, b, out_dtype=jnp.float32):
    """out = x @ w + b on a fully parallel (col-tiles, row-tiles) grid.

    x: (M, K) f32;  w: (K, N) with N % 128 == 0;  b: (N,).  Returns (M, N).
    K is kept whole (no reduction grid axis) -- fine for K up to a few 1024s.
    """
    M, K = x.shape
    N = w.shape[1]
    # TM=256 matches v6e/v7x's 256x256 MXU; v5e (128x128 MXUs) just takes
    # two passes per tile.
    TM = 256 if M >= 256 else _round_up(M, 8)
    Mp = _round_up(M, TM)
    if Mp != M:
        x = jnp.pad(x, ((0, Mp - M), (0, 0)))
    TN = _pick_col_tile(N, K)
    b2 = b.reshape(1, N).astype(jnp.float32)

    blk_bytes = 4 * (TM * K + K * TN + TN + TM * TN)
    out = pl.pallas_call(
        matmul_bias_kernel,
        out_shape=jax.ShapeDtypeStruct((Mp, N), out_dtype),
        grid_spec=pltpu.PrefetchScalarGridSpec(
            num_scalar_prefetch=0,
            # Column tiles on the outer axis so each weight tile stays resident
            # across all row tiles; both axes independent -> megacore parallel.
            grid=(N // TN, Mp // TM),
            in_specs=[
                pl.BlockSpec((TM, K), lambda i, j: (j, 0)),    # activation rows
                pl.BlockSpec((K, TN), lambda i, j: (0, i)),    # weight col tile
                pl.BlockSpec((1, TN), lambda i, j: (0, i)),    # bias col tile
            ],
            out_specs=pl.BlockSpec((TM, TN), lambda i, j: (j, i)),
        ),
        compiler_params=pltpu.CompilerParams(
            dimension_semantics=("parallel", "parallel"),
            vmem_limit_bytes=_vmem_limit(3 * blk_bytes)),
        cost_estimate=pl.CostEstimate(
            flops=2 * Mp * K * N + Mp * N,
            transcendentals=0,
            bytes_accessed=4 * (Mp * K * (N // TN) + K * N + N + Mp * N)),
    )(x, w, b2)
    return out[:M] if Mp != M else out


# -----------------------------------------------------------------------------
# Stage B: streamed, batch-parallel LSTM recurrence.
# -----------------------------------------------------------------------------
def lstm_recurrence_kernel(xw_ref, whh_ref, hs_ref, h_sc, c_sc):
    """One grid step = one (batch-tile, time-chunk).  grid = (nb, nt).

    xw_ref : (TT, TB, 4*Hp)  precomputed x @ W_ih + b, time-major chunk
    whh_ref: (Hp, 4*Hp)      hidden-to-hidden weights (same block every step)
    hs_ref : (TT, TB, Hp)    hidden-state outputs for this chunk
    h_sc/c_sc: (TB, Hp)      carries, persist across time-chunk grid steps
    """
    Hp = h_sc.shape[-1]
    TT = xw_ref.shape[0]

    # PyTorch nn.LSTM defaults to zero initial (h, c): reset at time-chunk 0.
    @pl.when(pl.program_id(1) == 0)
    def _():
        h_sc[...] = jnp.zeros_like(h_sc)
        c_sc[...] = jnp.zeros_like(c_sc)

    whh = whh_ref[...].astype(MATMUL_DTYPE)          # hoisted out of the loop

    # Fully unrolled time loop (TT is small & static) -> cross-iteration
    # visibility for the LLO scheduler.
    for tt in range(TT):
        h = h_sc[...]
        c = c_sc[...]
        # Input projection + bias already folded into xw (stage A).
        gates = xw_ref[tt] + jnp.dot(h.astype(MATMUL_DTYPE), whh,
                                     preferred_element_type=jnp.float32)
        # Hp is a multiple of 128 -> every gate slice is lane-aligned (no XLU).
        i = jax.nn.sigmoid(gates[:, 0 * Hp:1 * Hp])
        f = jax.nn.sigmoid(gates[:, 1 * Hp:2 * Hp])
        g = jnp.tanh(gates[:, 2 * Hp:3 * Hp])
        o = jax.nn.sigmoid(gates[:, 3 * Hp:4 * Hp])
        c = f * c + i * g
        h = o * jnp.tanh(c)
        c_sc[...] = c
        h_sc[...] = h
        hs_ref[tt] = h.astype(hs_ref.dtype)


def _pick_time_chunk(T, TB, Hp, budget_bytes=16 << 20):
    """Largest time chunk (<=16) whose streamed xw/hs blocks fit the budget,
    preferring a divisor of T to avoid padded (wasted) timesteps."""
    per_step = TB * 5 * Hp * 4 * 2       # xw(4Hp)+hs(Hp), f32, double-buffered
    cap = max(1, min(T, 16, budget_bytes // per_step))
    for c in range(cap, max(cap // 2, 1) - 1, -1):
        if T % c == 0:
            return c
    return cap


# -----------------------------------------------------------------------------
# Forward pass.
# -----------------------------------------------------------------------------
def decoder_forward(prepared, features, captions):
    """Pallas equivalent of DecoderRNN.forward(features, captions).

    features: (B, E) float32, captions: (B, Tcap) int32.
    Returns logits (B, Tcap, V) float32 (T = 1 + (Tcap - 1), as in PyTorch).
    """
    Hp, V = prepared["Hp"], prepared["V"]

    # ---- glue (plain JAX): embedding lookup + concat image features ---------
    emb = prepared["embed"][captions[:, :-1]]                       # (B, T-1, E)
    embeds = jnp.concatenate(
        [features[:, None, :].astype(jnp.float32), emb], axis=1)    # (B, T, E)
    B, T, E = embeds.shape

    # Batch tiling: TB rows per grid step (multiple of 8 sublanes); when
    # Bp // TB >= 2 the "parallel" batch axis shards the recurrence across
    # v7x's two TensorCores (no effect on v5e/v6e).
    TB = 128 if B >= 128 else _round_up(B, 8)
    Bp = _round_up(B, TB)

    x = jnp.transpose(embeds, (1, 0, 2))                            # (T, B, E)
    if Bp != B:
        x = jnp.pad(x, ((0, 0), (0, Bp - B), (0, 0)))               # (T, Bp, E)

    # ---- stage A: hoisted input projection  xw = x @ W_ih + (b_ih + b_hh) ---
    xw = matmul_bias(x.reshape(T * Bp, E), prepared["w_ih"], prepared["b_lstm"])
    xw = xw.reshape(T, Bp, 4 * Hp)

    # ---- stage B: streamed, batch-parallel LSTM recurrence ------------------
    TT = _pick_time_chunk(T, TB, Hp)
    Tp = _round_up(T, TT)
    if Tp != T:   # padded timesteps compute garbage that is never read back
        xw = jnp.pad(xw, ((0, Tp - T), (0, 0), (0, 0)))
    nb, nt = Bp // TB, Tp // TT

    blk_bytes = 4 * (2 * TT * TB * 4 * Hp + Hp * 4 * Hp
                     + 2 * TT * TB * Hp + 2 * TB * Hp)
    hs = pl.pallas_call(
        lstm_recurrence_kernel,
        out_shape=jax.ShapeDtypeStruct((Tp, Bp, Hp), jnp.float32),
        grid_spec=pltpu.PrefetchScalarGridSpec(
            num_scalar_prefetch=0,
            grid=(nb, nt),
            in_specs=[
                pl.BlockSpec((TT, TB, 4 * Hp), lambda b, t: (t, b, 0)),  # xw
                pl.BlockSpec((Hp, 4 * Hp), lambda b, t: (0, 0)),         # W_hh
            ],
            out_specs=pl.BlockSpec((TT, TB, Hp), lambda b, t: (t, b, 0)),
            scratch_shapes=[
                pltpu.VMEM((TB, Hp), jnp.float32),   # h carry
                pltpu.VMEM((TB, Hp), jnp.float32),   # c carry
            ]),
        compiler_params=pltpu.CompilerParams(
            dimension_semantics=("parallel", "arbitrary"),
            vmem_limit_bytes=_vmem_limit(blk_bytes)),
        cost_estimate=pl.CostEstimate(
            flops=Tp * Bp * (2 * Hp * 4 * Hp + 16 * Hp),
            transcendentals=Tp * Bp * 5 * Hp,
            bytes_accessed=4 * (Tp * Bp * 5 * Hp + nb * Hp * 4 * Hp)),
    )(xw, prepared["w_hh"])

    # ---- stage C: vocab projection on batch-major rows ----------------------
    # Transpose hs (V/H times smaller than the logits) so the final (B, T, V)
    # result is a free reshape -- no full-logits transpose.
    hs_bt = jnp.transpose(hs[:T, :B], (1, 0, 2)).reshape(B * T, Hp)
    logits = matmul_bias(hs_bt, prepared["w_fc"], prepared["b_fc"])  # (B*T, Vp)
    return logits[:, :V].reshape(B, T, V)


# -----------------------------------------------------------------------------
# One-time parameter preparation (padding / bias fusion outside the jit).
# -----------------------------------------------------------------------------
def prepare_params(params):
    """Pads H -> Hp (multiple of 128) per-gate and V -> Vp (multiple of 128),
    and fuses b_ih + b_hh.  Zero-padded gate weights/biases keep the padded
    h/c columns exactly 0 (c = 0.5*0 + 0.5*tanh(0) = 0, h = 0.5*tanh(0) = 0),
    so the math is unchanged."""
    E, H4 = params["w_ih"].shape
    H = H4 // 4
    Hp = _round_up(H, 128)
    V = params["w_fc"].shape[1]
    Vp = _round_up(V, 128)

    def pad_gate_cols(w, pad_rows_to=None):
        gs = [jnp.pad(w[:, k * H:(k + 1) * H], ((0, 0), (0, Hp - H)))
              for k in range(4)]
        w2 = jnp.concatenate(gs, axis=1)                              # (R, 4Hp)
        if pad_rows_to is not None and pad_rows_to != w2.shape[0]:
            w2 = jnp.pad(w2, ((0, pad_rows_to - w2.shape[0]), (0, 0)))
        return w2

    b = params["b_ih"] + params["b_hh"]
    b_g = jnp.concatenate(
        [jnp.pad(b[k * H:(k + 1) * H], (0, Hp - H)) for k in range(4)])

    return {
        "embed": params["embed"].astype(jnp.float32),
        "w_ih": pad_gate_cols(params["w_ih"]).astype(MATMUL_DTYPE),   # (E, 4Hp)
        "w_hh": pad_gate_cols(params["w_hh"],
                              pad_rows_to=Hp).astype(MATMUL_DTYPE),   # (Hp, 4Hp)
        "b_lstm": b_g.astype(jnp.float32),                            # (4Hp,)
        "w_fc": jnp.pad(params["w_fc"],
                        ((0, Hp - H), (0, Vp - V))).astype(MATMUL_DTYPE),  # (Hp, Vp)
        "b_fc": jnp.pad(params["b_fc"], (0, Vp - V)).astype(jnp.float32),  # (Vp,)
        "Hp": Hp, "V": V, "Vp": Vp,
    }


# -----------------------------------------------------------------------------
# Pure-JAX reference (lax.scan LSTM) for correctness checking.
# -----------------------------------------------------------------------------
def decoder_forward_ref(params, features, captions):
    emb = params["embed"][captions[:, :-1]]
    embeds = jnp.concatenate([features[:, None, :], emb], axis=1)    # (B, T, E)
    x = jnp.transpose(embeds, (1, 0, 2)).astype(jnp.float32)         # (T, B, E)
    B = x.shape[1]
    H = params["w_hh"].shape[0]
    b = params["b_ih"] + params["b_hh"]

    def step(carry, x_t):
        h, c = carry
        gates = x_t @ params["w_ih"] + h @ params["w_hh"] + b
        i = jax.nn.sigmoid(gates[:, 0 * H:1 * H])
        f = jax.nn.sigmoid(gates[:, 1 * H:2 * H])
        g = jnp.tanh(gates[:, 2 * H:3 * H])
        o = jax.nn.sigmoid(gates[:, 3 * H:4 * H])
        c = f * c + i * g
        h = o * jnp.tanh(c)
        return (h, c), h

    h0 = jnp.zeros((B, H), jnp.float32)
    _, hs = jax.lax.scan(step, (h0, h0), x)                          # (T, B, H)
    logits = hs @ params["w_fc"] + params["b_fc"]                    # (T, B, V)
    return jnp.transpose(logits, (1, 0, 2))


def init_params(key, embed_size, hidden_size, vocab_size):
    ks = jax.random.split(key, 7)
    s = 0.1
    return {
        # nn.Embedding(vocab, embed)
        "embed": s * jax.random.normal(ks[0], (vocab_size, embed_size), jnp.float32),
        # nn.LSTM weights, stored transposed: (E, 4H), (H, 4H); gate order i,f,g,o
        "w_ih": s * jax.random.normal(ks[1], (embed_size, 4 * hidden_size), jnp.float32),
        "w_hh": s * jax.random.normal(ks[2], (hidden_size, 4 * hidden_size), jnp.float32),
        "b_ih": s * jax.random.normal(ks[3], (4 * hidden_size,), jnp.float32),
        "b_hh": s * jax.random.normal(ks[4], (4 * hidden_size,), jnp.float32),
        # nn.Linear(hidden, vocab), stored transposed: (H, V)
        "w_fc": s * jax.random.normal(ks[5], (hidden_size, vocab_size), jnp.float32),
        "b_fc": s * jax.random.normal(ks[6], (vocab_size,), jnp.float32),
    }


if __name__ == "__main__":
    embed_size, hidden_size, vocab_size = 32, 32, 40
    batch, cap_len = 2, 8                      # => T = 8 LSTM steps

    key = jax.random.PRNGKey(0)
    kp, kf, kc = jax.random.split(key, 3)
    params = init_params(kp, embed_size, hidden_size, vocab_size)
    prepared = prepare_params(params)          # one-time pad/fuse, outside jit

    features = jax.random.normal(kf, (batch, embed_size), jnp.float32)   # (B, E)
    captions = jax.random.randint(kc, (batch, cap_len), 0, vocab_size, jnp.int32)

    fwd = jax.jit(functools.partial(decoder_forward, prepared))
    out = jax.block_until_ready(fwd(features, captions))

    ref = decoder_forward_ref(params, features, captions)
    assert out.shape == (batch, cap_len, vocab_size), out.shape
    assert jnp.allclose(out, ref, atol=1e-4, rtol=1e-4), \
        float(jnp.max(jnp.abs(out - ref)))

    # TODO(synk): sample() (autoregressive greedy decode) is a separate method,
    # not part of forward(); not implemented here.
    print("KERNEL_OK")
</pallas_src>

<mosaic_0001>
module attributes {stable_mosaic.version = 11 : i64} {
  func.func @matmul_bias_kernel(%arg0: i32, %arg1: i32, %arg2: memref<64x32xf32, #tpu.memory_space<vmem>>, %arg3: memref<32x512xf32, #tpu.memory_space<vmem>>, %arg4: memref<1x512xf32, #tpu.memory_space<vmem>>, %arg5: memref<64x512xf32, #tpu.memory_space<vmem>>) attributes {dimension_semantics = [#tpu.dimension_semantics<parallel>, #tpu.dimension_semantics<parallel>], iteration_bounds = array<i64: 1, 1>, scalar_prefetch = 0 : i64, scratch_operands = 0 : i64, tpu.core_type = #tpu.core_type<tc>, window_params = [{transform_indices = @transform_0, window_bounds = array<i64: 64, 32>}, {transform_indices = @transform_1, window_bounds = array<i64: 32, 512>}, {transform_indices = @transform_2, window_bounds = array<i64: 1, 512>}, {transform_indices = @transform_3, window_bounds = array<i64: 64, 512>}]} {
    %c0 = arith.constant 0 : index
    %c0_0 = arith.constant 0 : index
    %0 = vector.load %arg2[%c0, %c0_0] : memref<64x32xf32, #tpu.memory_space<vmem>>, vector<64x32xf32>
    %c0_1 = arith.constant 0 : index
    %c0_2 = arith.constant 0 : index
    %1 = vector.load %arg3[%c0_1, %c0_2] : memref<32x512xf32, #tpu.memory_space<vmem>>, vector<32x512xf32>
    %cst = arith.constant dense<0.000000e+00> : vector<64x512xf32>
    %2 = tpu.matmul %0, %1, %cst {dimension_numbers = #tpu.dot_dimension_numbers<[1], [0], [0], [1], [0, 0, 1, 1], [], []>} : vector<64x32xf32>, vector<32x512xf32>, vector<64x512xf32> -> vector<64x512xf32>
    %c0_3 = arith.constant 0 : index
    %c0_4 = arith.constant 0 : index
    %3 = vector.load %arg4[%c0_3, %c0_4] : memref<1x512xf32, #tpu.memory_space<vmem>>, vector<1x512xf32>
    %4 = vector.broadcast %3 : vector<1x512xf32> to vector<64x512xf32>
    %5 = arith.addf %2, %4 : vector<64x512xf32>
    %c0_5 = arith.constant 0 : index
    %c0_6 = arith.constant 0 : index
    %6 = vector.load %arg5[%c0_5, %c0_6] : memref<64x512xf32, #tpu.memory_space<vmem>>, vector<64x512xf32>
    tpu.vector_store %arg5[%c0_5, %c0_6], %5 {strides = array<i32>} : memref<64x512xf32, #tpu.memory_space<vmem>>, vector<64x512xf32>,
    return
  }
  func.func @transform_0(%arg0: i32, %arg1: i32) -> (i32, i32) {
    %c0_i32 = arith.constant 0 : i32
    %c0_i32_0 = arith.constant 0 : i32
    return %arg1, %c0_i32 : i32, i32
  }
  func.func @transform_1(%arg0: i32, %arg1: i32) -> (i32, i32) {
    %c0_i32 = arith.constant 0 : i32
    %c0_i32_0 = arith.constant 0 : i32
    return %c0_i32, %arg0 : i32, i32
  }
  func.func @transform_2(%arg0: i32, %arg1: i32) -> (i32, i32) {
    %c0_i32 = arith.constant 0 : i32
    %c0_i32_0 = arith.constant 0 : i32
    return %c0_i32, %arg0 : i32, i32
  }
  func.func @transform_3(%arg0: i32, %arg1: i32) -> (i32, i32) {
    %c0_i32 = arith.constant 0 : i32
    return %arg1, %arg0 : i32, i32
  }
}

module attributes {stable_mosaic.version = 11 : i64} {
  func.func @matmul_bias_kernel(%arg0: i32, %arg1: i32, %arg2: memref<16x128xf32, #tpu.memory_space<vmem>>, %arg3: memref<128x128xf32, #tpu.memory_space<vmem>>, %arg4: memref<1x128xf32, #tpu.memory_space<vmem>>, %arg5: memref<16x128xf32, #tpu.memory_space<vmem>>) attributes {dimension_semantics = [#tpu.dimension_semantics<parallel>, #tpu.dimension_semantics<parallel>], iteration_bounds = array<i64: 1, 1>, scalar_prefetch = 0 : i64, scratch_operands = 0 : i64, tpu.core_type = #tpu.core_type<tc>, window_params = [{transform_indices = @transform_0, window_bounds = array<i64: 16, 128>}, {transform_indices = @transform_1, window_bounds = array<i64: 128, 128>}, {transform_indices = @transform_2, window_bounds = array<i64: 1, 128>}, {transform_indices = @transform_3, window_bounds = array<i64: 16, 128>}]} {
    %c0 = arith.constant 0 : index
    %c0_0 = arith.constant 0 : index
    %0 = vector.load %arg2[%c0, %c0_0] : memref<16x128xf32, #tpu.memory_space<vmem>>, vector<16x128xf32>
    %c0_1 = arith.constant 0 : index
    %c0_2 = arith.constant 0 : index
    %1 = vector.load %arg3[%c0_1, %c0_2] : memref<128x128xf32, #tpu.memory_space<vmem>>, vector<128x128xf32>
    %cst = arith.constant dense<0.000000e+00> : vector<16x128xf32>
    %2 = tpu.matmul %0, %1, %cst {dimension_numbers = #tpu.dot_dimension_numbers<[1], [0], [0], [1], [0, 0, 1, 1], [], []>} : vector<16x128xf32>, vector<128x128xf32>, vector<16x128xf32> -> vector<16x128xf32>
    %c0_3 = arith.constant 0 : index
    %c0_4 = arith.constant 0 : index
    %3 = vector.load %arg4[%c0_3, %c0_4] : memref<1x128xf32, #tpu.memory_space<vmem>>, vector<1x128xf32>
    %4 = vector.broadcast %3 : vector<1x128xf32> to vector<16x128xf32>
    %5 = arith.addf %2, %4 : vector<16x128xf32>
    %c0_5 = arith.constant 0 : index
    %c0_6 = arith.constant 0 : index
    %6 = vector.load %arg5[%c0_5, %c0_6] : memref<16x128xf32, #tpu.memory_space<vmem>>, vector<16x128xf32>
    tpu.vector_store %arg5[%c0_5, %c0_6], %5 {strides = array<i32>} : memref<16x128xf32, #tpu.memory_space<vmem>>, vector<16x128xf32>,
    return
  }
  func.func @transform_0(%arg0: i32, %arg1: i32) -> (i32, i32) {
    %c0_i32 = arith.constant 0 : i32
    %c0_i32_0 = arith.constant 0 : i32
    return %arg1, %c0_i32 : i32, i32
  }
  func.func @transform_1(%arg0: i32, %arg1: i32) -> (i32, i32) {
    %c0_i32 = arith.constant 0 : i32
    %c0_i32_0 = arith.constant 0 : i32
    return %c0_i32, %arg0 : i32, i32
  }
  func.func @transform_2(%arg0: i32, %arg1: i32) -> (i32, i32) {
    %c0_i32 = arith.constant 0 : i32
    %c0_i32_0 = arith.constant 0 : i32
    return %c0_i32, %arg0 : i32, i32
  }
  func.func @transform_3(%arg0: i32, %arg1: i32) -> (i32, i32) {
    %c0_i32 = arith.constant 0 : i32
    return %arg1, %arg0 : i32, i32
  }
}

module attributes {stable_mosaic.version = 11 : i64} {
  func.func @lstm_recurrence_kernel(%arg0: i32, %arg1: i32, %arg2: memref<8x8x512xf32, #tpu.memory_space<vmem>>, %arg3: memref<128x512xf32, #tpu.memory_space<vmem>>, %arg4: memref<8x8x128xf32, #tpu.memory_space<vmem>>, %arg5: memref<8x128xf32, #tpu.memory_space<vmem>>, %arg6: memref<8x128xf32, #tpu.memory_space<vmem>>) attributes {dimension_semantics = [#tpu.dimension_semantics<parallel>, #tpu.dimension_semantics<arbitrary>], iteration_bounds = array<i64: 1, 1>, scalar_prefetch = 0 : i64, scratch_operands = 2 : i64, tpu.core_type = #tpu.core_type<tc>, window_params = [{transform_indices = @transform_0, window_bounds = array<i64: 8, 8, 512>}, {pipeline_mode = #tpu.pipeline_mode<synchronous>, transform_indices = @transform_1, window_bounds = array<i64: 128, 512>}, {transform_indices = @transform_2, window_bounds = array<i64: 8, 8, 128>}]} {
    %c0_i32 = arith.constant 0 : i32
    %0 = arith.cmpi eq, %arg1, %c0_i32 : i32
    %1 = arith.extui %0 : i1 to i32
    %c0_i32_0 = arith.constant 0 : i32
    %2 = arith.cmpi ne, %1, %c0_i32_0 : i32
    scf.if %2 {
      %cst_138 = arith.constant 0.000000e+00 : f32
      %292 = vector.broadcast %cst_138 : f32 to vector<8x128xf32>
      %c0_139 = arith.constant 0 : index
      %c0_140 = arith.constant 0 : index
      %293 = vector.load %arg5[%c0_139, %c0_140] : memref<8x128xf32, #tpu.memory_space<vmem>>, vector<8x128xf32>
      tpu.vector_store %arg5[%c0_139, %c0_140], %292 {strides = array<i32>} : memref<8x128xf32, #tpu.memory_space<vmem>>, vector<8x128xf32>,
      %cst_141 = arith.constant 0.000000e+00 : f32
      %294 = vector.broadcast %cst_141 : f32 to vector<8x128xf32>
      %c0_142 = arith.constant 0 : index
      %c0_143 = arith.constant 0 : index
      %295 = vector.load %arg6[%c0_142, %c0_143] : memref<8x128xf32, #tpu.memory_space<vmem>>, vector<8x128xf32>
      tpu.vector_store %arg6[%c0_142, %c0_143], %294 {strides = array<i32>} : memref<8x128xf32, #tpu.memory_space<vmem>>, vector<8x128xf32>,
    } else {
    }
    %c0 = arith.constant 0 : index
    %c0_1 = arith.constant 0 : index
    %3 = vector.load %arg3[%c0, %c0_1] : memref<128x512xf32, #tpu.memory_space<vmem>>, vector<128x512xf32>
    %c0_2 = arith.constant 0 : index
    %c0_3 = arith.constant 0 : index
    %4 = vector.load %arg5[%c0_2, %c0_3] : memref<8x128xf32, #tpu.memory_space<vmem>>, vector<8x128xf32>
    %c0_4 = arith.constant 0 : index
    %c0_5 = arith.constant 0 : index
    %5 = vector.load %arg6[%c0_4, %c0_5] : memref<8x128xf32, #tpu.memory_space<vmem>>, vector<8x128xf32>
    %c0_6 = arith.constant 0 : index
    %c0_7 = arith.constant 0 : index
    %c0_8 = arith.constant 0 : index
    %6 = vector.load %arg2[%c0_6, %c0_7, %c0_8] : memref<8x8x512xf32, #tpu.memory_space<vmem>>, vector<1x8x512xf32>
    %7 = vector.shape_cast %6 : vector<1x8x512xf32> to vector<8x512xf32>
    %cst = arith.constant dense<0.000000e+00> : vector<8x512xf32>
    %8 = tpu.matmul %4, %3, %cst {dimension_numbers = #tpu.dot_dimension_numbers<[1], [0], [0], [1], [0, 0, 1, 1], [], []>} : vector<8x128xf32>, vector<128x512xf32>, vector<8x512xf32> -> vector<8x512xf32>
    %9 = arith.addf %7, %8 : vector<8x512xf32>
    %10 = vector.extract_strided_slice %9 {offsets = [0, 0], sizes = [8, 128], strides = [1, 1]} : vector<8x512xf32> to vector<8x128xf32>
    %11 = arith.negf %10 : vector<8x128xf32>
    %12 = math.exp %11 : vector<8x128xf32>
    %cst_9 = arith.constant 1.000000e+00 : f32
    %13 = vector.broadcast %cst_9 : f32 to vector<8x128xf32>
    %14 = arith.addf %13, %12 : vector<8x128xf32>
    %15 = arith.divf %13, %14 : vector<8x128xf32>
    %16 = vector.extract_strided_slice %9 {offsets = [0, 128], sizes = [8, 128], strides = [1, 1]} : vector<8x512xf32> to vector<8x128xf32>
    %17 = arith.negf %16 : vector<8x128xf32>
    %18 = math.exp %17 : vector<8x128xf32>
    %cst_10 = arith.constant 1.000000e+00 : f32
    %19 = vector.broadcast %cst_10 : f32 to vector<8x128xf32>
    %20 = arith.addf %19, %18 : vector<8x128xf32>
    %21 = arith.divf %19, %20 : vector<8x128xf32>
    %22 = vector.extract_strided_slice %9 {offsets = [0, 256], sizes = [8, 128], strides = [1, 1]} : vector<8x512xf32> to vector<8x128xf32>
    %23 = math.tanh %22 : vector<8x128xf32>
    %24 = vector.extract_strided_slice %9 {offsets = [0, 384], sizes = [8, 128], strides = [1, 1]} : vector<8x512xf32> to vector<8x128xf32>
    %25 = arith.negf %24 : vector<8x128xf32>
    %26 = math.exp %25 : vector<8x128xf32>
    %cst_11 = arith.constant 1.000000e+00 : f32
    %27 = vector.broadcast %cst_11 : f32 to vector<8x128xf32>
    %28 = arith.addf %27, %26 : vector<8x128xf32>
    %29 = arith.divf %27, %28 : vector<8x128xf32>
    %30 = arith.mulf %21, %5 : vector<8x128xf32>
    %31 = arith.mulf %15, %23 : vector<8x128xf32>
    %32 = arith.addf %30, %31 : vector<8x128xf32>
    %33 = math.tanh %32 : vector<8x128xf32>
    %34 = arith.mulf %29, %33 : vector<8x128xf32>
    %c0_12 = arith.constant 0 : index
    %c0_13 = arith.constant 0 : index
    %35 = vector.load %arg6[%c0_12, %c0_13] : memref<8x128xf32, #tpu.memory_space<vmem>>, vector<8x128xf32>
    tpu.vector_store %arg6[%c0_12, %c0_13], %32 {strides = array<i32>} : memref<8x128xf32, #tpu.memory_space<vmem>>, vector<8x128xf32>,
    %c0_14 = arith.constant 0 : index
    %c0_15 = arith.constant 0 : index
    %36 = vector.load %arg5[%c0_14, %c0_15] : memref<8x128xf32, #tpu.memory_space<vmem>>, vector<8x128xf32>
    tpu.vector_store %arg5[%c0_14, %c0_15], %34 {strides = array<i32>} : memref<8x128xf32, #tpu.memory_space<vmem>>, vector<8x128xf32>,
    %c0_16 = arith.constant 0 : index
    %c0_17 = arith.constant 0 : index
    %c0_18 = arith.constant 0 : index
    %37 = vector.load %arg4[%c0_16, %c0_17, %c0_18] : memref<8x8x128xf32, #tpu.memory_space<vmem>>, vector<1x8x128xf32>
    %38 = vector.shape_cast %37 : vector<1x8x128xf32> to vector<8x128xf32>
    %39 = vector.shape_cast %34 : vector<8x128xf32> to vector<1x8x128xf32>
    tpu.vector_store %arg4[%c0_16, %c0_17, %c0_18], %39 {strides = array<i32>} : memref<8x8x128xf32, #tpu.memory_space<vmem>>, vector<1x8x128xf32>,
    %c0_19 = arith.constant 0 : index
    %c0_20 = arith.constant 0 : index
    %40 = vector.load %arg5[%c0_19, %c0_20] : memref<8x128xf32, #tpu.memory_space<vmem>>, vector<8x128xf32>
    %c0_21 = arith.constant 0 : index
    %c0_22 = arith.constant 0 : index
    %41 = vector.load %arg6[%c0_21, %c0_22] : memref<8x128xf32, #tpu.memory_space<vmem>>, vector<8x128xf32>
    %c1 = arith.constant 1 : index
    %c0_23 = arith.constant 0 : index
    %c0_24 = arith.constant 0 : index
    %42 = vector.load %arg2[%c1, %c0_23, %c0_24] : memref<8x8x512xf32, #tpu.memory_space<vmem>>, vector<1x8x512xf32>
    %43 = vector.shape_cast %42 : vector<1x8x512xf32> to vector<8x512xf32>
    %cst_25 = arith.constant dense<0.000000e+00> : vector<8x512xf32>
    %44 = tpu.matmul %40, %3, %cst_25 {dimension_numbers = #tpu.dot_dimension_numbers<[1], [0], [0], [1], [0, 0, 1, 1], [], []>} : vector<8x128xf32>, vector<128x512xf32>, vector<8x512xf32> -> vector<8x512xf32>
    %45 = arith.addf %43, %44 : vector<8x512xf32>
    %46 = vector.extract_strided_slice %45 {offsets = [0, 0], sizes = [8, 128], strides = [1, 1]} : vector<8x512xf32> to vector<8x128xf32>
    %47 = arith.negf %46 : vector<8x128xf32>
    %48 = math.exp %47 : vector<8x128xf32>
    %cst_26 = arith.constant 1.000000e+00 : f32
    %49 = vector.broadcast %cst_26 : f32 to vector<8x128xf32>
    %50 = arith.addf %49, %48 : vector<8x128xf32>
    %51 = arith.divf %49, %50 : vector<8x128xf32>
    %52 = vector.extract_strided_slice %45 {offsets = [0, 128], sizes = [8, 128], strides = [1, 1]} : vector<8x512xf32> to vector<8x128xf32>
    %53 = arith.negf %52 : vector<8x128xf32>
    %54 = math.exp %53 : vector<8x128xf32>
    %cst_27 = arith.constant 1.000000e+00 : f32
    %55 = vector.broadcast %cst_27 : f32 to vector<8x128xf32>
    %56 = arith.addf %55, %54 : vector<8x128xf32>
    %57 = arith.divf %55, %56 : vector<8x128xf32>
    %58 = vector.extract_strided_slice %45 {offsets = [0, 256], sizes = [8, 128], strides = [1, 1]} : vector<8x512xf32> to vector<8x128xf32>
    %59 = math.tanh %58 : vector<8x128xf32>
    %60 = vector.extract_strided_slice %45 {offsets = [0, 384], sizes = [8, 128], strides = [1, 1]} : vector<8x512xf32> to vector<8x128xf32>
    %61 = arith.negf %60 : vector<8x128xf32>
    %62 = math.exp %61 : vector<8x128xf32>
    %cst_28 = arith.constant 1.000000e+00 : f32
    %63 = vector.broadcast %cst_28 : f32 to vector<8x128xf32>
    %64 = arith.addf %63, %62 : vector<8x128xf32>
    %65 = arith.divf %63, %64 : vector<8x128xf32>
    %66 = arith.mulf %57, %41 : vector<8x128xf32>
    %67 = arith.mulf %51, %59 : vector<8x128xf32>
    %68 = arith.addf %66, %67 : vector<8x128xf32>
    %69 = math.tanh %68 : vector<8x128xf32>
    %70 = arith.mulf %65, %69 : vector<8x128xf32>
    %c0_29 = arith.constant 0 : index
    %c0_30 = arith.constant 0 : index
    %71 = vector.load %arg6[%c0_29, %c0_30] : memref<8x128xf32, #tpu.memory_space<vmem>>, vector<8x128xf32>
    tpu.vector_store %arg6[%c0_29, %c0_30], %68 {strides = array<i32>} : memref<8x128xf32, #tpu.memory_space<vmem>>, vector<8x128xf32>,
    %c0_31 = arith.constant 0 : index
    %c0_32 = arith.constant 0 : index
    %72 = vector.load %arg5[%c0_31, %c0_32] : memref<8x128xf32, #tpu.memory_space<vmem>>, vector<8x128xf32>
    tpu.vector_store %arg5[%c0_31, %c0_32], %70 {strides = array<i32>} : memref<8x128xf32, #tpu.memory_space<vmem>>, vector<8x128xf32>,
    %c1_33 = arith.constant 1 : index
    %c0_34 = arith.constant 0 : index
    %c0_35 = arith.constant 0 : index
    %73 = vector.load %arg4[%c1_33, %c0_34, %c0_35] : memref<8x8x128xf32, #tpu.memory_space<vmem>>, vector<1x8x128xf32>
    %74 = vector.shape_cast %73 : vector<1x8x128xf32> to vector<8x128xf32>
    %75 = vector.shape_cast %70 : vector<8x128xf32> to vector<1x8x128xf32>
    tpu.vector_store %arg4[%c1_33, %c0_34, %c0_35], %75 {strides = array<i32>} : memref<8x8x128xf32, #tpu.memory_space<vmem>>, vector<1x8x128xf32>,
    %c0_36 = arith.constant 0 : index
    %c0_37 = arith.constant 0 : index
    %76 = vector.load %arg5[%c0_36, %c0_37] : memref<8x128xf32, #tpu.memory_space<vmem>>, vector<8x128xf32>
    %c0_38 = arith.constant 0 : index
    %c0_39 = arith.constant 0 : index
    %77 = vector.load %arg6[%c0_38, %c0_39] : memref<8x128xf32, #tpu.memory_space<vmem>>, vector<8x128xf32>
    %c2 = arith.constant 2 : index
    %c0_40 = arith.constant 0 : index
    %c0_41 = arith.constant 0 : index
    %78 = vector.load %arg2[%c2, %c0_40, %c0_41] : memref<8x8x512xf32, #tpu.memory_space<vmem>>, vector<1x8x512xf32>
    %79 = vector.shape_cast %78 : vector<1x8x512xf32> to vector<8x512xf32>
    %cst_42 = arith.constant dense<0.000000e+00> : vector<8x512xf32>
    %80 = tpu.matmul %76, %3, %cst_42 {dimension_numbers = #tpu.dot_dimension_numbers<[1], [0], [0], [1], [0, 0, 1, 1], [], []>} : vector<8x128xf32>, vector<128x512xf32>, vector<8x512xf32> -> vector<8x512xf32>
    %81 = arith.addf %79, %80 : vector<8x512xf32>
    %82 = vector.extract_strided_slice %81 {offsets = [0, 0], sizes = [8, 128], strides = [1, 1]} : vector<8x512xf32> to vector<8x128xf32>
    %83 = arith.negf %82 : vector<8x128xf32>
    %84 = math.exp %83 : vector<8x128xf32>
    %cst_43 = arith.constant 1.000000e+00 : f32
    %85 = vector.broadcast %cst_43 : f32 to vector<8x128xf32>
    %86 = arith.addf %85, %84 : vector<8x128xf32>
    %87 = arith.divf %85, %86 : vector<8x128xf32>
    %88 = vector.extract_strided_slice %81 {offsets = [0, 128], sizes = [8, 128], strides = [1, 1]} : vector<8x512xf32> to vector<8x128xf32>
    %89 = arith.negf %88 : vector<8x128xf32>
    %90 = math.exp %89 : vector<8x128xf32>
    %cst_44 = arith.constant 1.000000e+00 : f32
    %91 = vector.broadcast %cst_44 : f32 to vector<8x128xf32>
    %92 = arith.addf %91, %90 : vector<8x128xf32>
    %93 = arith.divf %91, %92 : vector<8x128xf32>
    %94 = vector.extract_strided_slice %81 {offsets = [0, 256], sizes = [8, 128], strides = [1, 1]} : vector<8x512xf32> to vector<8x128xf32>
    %95 = math.tanh %94 : vector<8x128xf32>
    %96 = vector.extract_strided_slice %81 {offsets = [0, 384], sizes = [8, 128], strides = [1, 1]} : vector<8x512xf32> to vector<8x128xf32>
    %97 = arith.negf %96 : vector<8x128xf32>
    %98 = math.exp %97 : vector<8x128xf32>
    %cst_45 = arith.constant 1.000000e+00 : f32
    %99 = vector.broadcast %cst_45 : f32 to vector<8x128xf32>
    %100 = arith.addf %99, %98 : vector<8x128xf32>
    %101 = arith.divf %99, %100 : vector<8x128xf32>
    %102 = arith.mulf %93, %77 : vector<8x128xf32>
    %103 = arith.mulf %87, %95 : vector<8x128xf32>
    %104 = arith.addf %102, %103 : vector<8x128xf32>
    %105 = math.tanh %104 : vector<8x128xf32>
    %106 = arith.mulf %101, %105 : vector<8x128xf32>
    %c0_46 = arith.constant 0 : index
    %c0_47 = arith.constant 0 : index
    %107 = vector.load %arg6[%c0_46, %c0_47] : memref<8x128xf32, #tpu.memory_space<vmem>>, vector<8x128xf32>
    tpu.vector_store %arg6[%c0_46, %c0_47], %104 {strides = array<i32>} : memref<8x128xf32, #tpu.memory_space<vmem>>, vector<8x128xf32>,
    %c0_48 = arith.constant 0 : index
    %c0_49 = arith.constant 0 : index
    %108 = vector.load %arg5[%c0_48, %c0_49] : memref<8x128xf32, #tpu.memory_space<vmem>>, vector<8x128xf32>
    tpu.vector_store %arg5[%c0_48, %c0_49], %106 {strides = array<i32>} : memref<8x128xf32, #tpu.memory_space<vmem>>, vector<8x128xf32>,
    %c2_50 = arith.constant 2 : index
    %c0_51 = arith.constant 0 : index
    %c0_52 = arith.constant 0 : index
    %109 = vector.load %arg4[%c2_50, %c0_51, %c0_52] : memref<8x8x128xf32, #tpu.memory_space<vmem>>, vector<1x8x128xf32>
    %110 = vector.shape_cast %109 : vector<1x8x128xf32> to vector<8x128xf32>
    %111 = vector.shape_cast %106 : vector<8x128xf32> to vector<1x8x128xf32>
    tpu.vector_store %arg4[%c2_50, %c0_51, %c0_52], %111 {strides = array<i32>} : memref<8x8x128xf32, #tpu.memory_space<vmem>>, vector<1x8x128xf32>,
    %c0_53 = arith.constant 0 : index
    %c0_54 = arith.constant 0 : index
    %112 = vector.load %arg5[%c0_53, %c0_54] : memref<8x128xf32, #tpu.memory_space<vmem>>, vector<8x128xf32>
    %c0_55 = arith.constant 0 : index
    %c0_56 = arith.constant 0 : index
    %113 = vector.load %arg6[%c0_55, %c0_56] : memref<8x128xf32, #tpu.memory_space<vmem>>, vector<8x128xf32>
    %c3 = arith.constant 3 : index
    %c0_57 = arith.constant 0 : index
    %c0_58 = arith.constant 0 : index
    %114 = vector.load %arg2[%c3, %c0_57, %c0_58] : memref<8x8x512xf32, #tpu.memory_space<vmem>>, vector<1x8x512xf32>
    %115 = vector.shape_cast %114 : vector<1x8x512xf32> to vector<8x512xf32>
    %cst_59 = arith.constant dense<0.000000e+00> : vector<8x512xf32>
    %116 = tpu.matmul %112, %3, %cst_59 {dimension_numbers = #tpu.dot_dimension_numbers<[1], [0], [0], [1], [0, 0, 1, 1], [], []>} : vector<8x128xf32>, vector<128x512xf32>, vector<8x512xf32> -> vector<8x512xf32>
    %117 = arith.addf %115, %116 : vector<8x512xf32>
    %118 = vector.extract_strided_slice %117 {offsets = [0, 0], sizes = [8, 128], strides = [1, 1]} : vector<8x512xf32> to vector<8x128xf32>
    %119 = arith.negf %118 : vector<8x128xf32>
    %120 = math.exp %119 : vector<8x128xf32>
    %cst_60 = arith.constant 1.000000e+00 : f32
    %121 = vector.broadcast %cst_60 : f32 to vector<8x128xf32>
    %122 = arith.addf %121, %120 : vector<8x128xf32>
    %123 = arith.divf %121, %122 : vector<8x128xf32>
    %124 = vector.extract_strided_slice %117 {offsets = [0, 128], sizes = [8, 128], strides = [1, 1]} : vector<8x512xf32> to vector<8x128xf32>
    %125 = arith.negf %124 : vector<8x128xf32>
    %126 = math.exp %125 : vector<8x128xf32>
    %cst_61 = arith.constant 1.000000e+00 : f32
    %127 = vector.broadcast %cst_61 : f32 to vector<8x128xf32>
    %128 = arith.addf %127, %126 : vector<8x128xf32>
    %129 = arith.divf %127, %128 : vector<8x128xf32>
    %130 = vector.extract_strided_slice %117 {offsets = [0, 256], sizes = [8, 128], strides = [1, 1]} : vector<8x512xf32> to vector<8x128xf32>
    %131 = math.tanh %130 : vector<8x128xf32>
    %132 = vector.extract_strided_slice %117 {offsets = [0, 384], sizes = [8, 128], strides = [1, 1]} : vector<8x512xf32> to vector<8x128xf32>
    %133 = arith.negf %132 : vector<8x128xf32>
    %134 = math.exp %133 : vector<8x128xf32>
    %cst_62 = arith.constant 1.000000e+00 : f32
    %135 = vector.broadcast %cst_62 : f32 to vector<8x128xf32>
    %136 = arith.addf %135, %134 : vector<8x128xf32>
    %137 = arith.divf %135, %136 : vector<8x128xf32>
    %138 = arith.mulf %129, %113 : vector<8x128xf32>
    %139 = arith.mulf %123, %131 : vector<8x128xf32>
    %140 = arith.addf %138, %139 : vector<8x128xf32>
    %141 = math.tanh %140 : vector<8x128xf32>
    %142 = arith.mulf %137, %141 : vector<8x128xf32>
    %c0_63 = arith.constant 0 : index
    %c0_64 = arith.constant 0 : index
    %143 = vector.load %arg6[%c0_63, %c0_64] : memref<8x128xf32, #tpu.memory_space<vmem>>, vector<8x128xf32>
    tpu.vector_store %arg6[%c0_63, %c0_64], %140 {strides = array<i32>} : memref<8x128xf32, #tpu.memory_space<vmem>>, vector<8x128xf32>,
    %c0_65 = arith.constant 0 : index
    %c0_66 = arith.constant 0 : index
    %144 = vector.load %arg5[%c0_65, %c0_66] : memref<8x128xf32, #tpu.memory_space<vmem>>, vector<8x128xf32>
    tpu.vector_store %arg5[%c0_65, %c0_66], %142 {strides = array<i32>} : memref<8x128xf32, #tpu.memory_space<vmem>>, vector<8x128xf32>,
    %c3_67 = arith.constant 3 : index
    %c0_68 = arith.constant 0 : index
    %c0_69 = arith.constant 0 : index
    %145 = vector.load %arg4[%c3_67, %c0_68, %c0_69] : memref<8x8x128xf32, #tpu.memory_space<vmem>>, vector<1x8x128xf32>
    %146 = vector.shape_cast %145 : vector<1x8x128xf32> to vector<8x128xf32>
    %147 = vector.shape_cast %142 : vector<8x128xf32> to vector<1x8x128xf32>
    tpu.vector_store %arg4[%c3_67, %c0_68, %c0_69], %147 {strides = array<i32>} : memref<8x8x128xf32, #tpu.memory_space<vmem>>, vector<1x8x128xf32>,
    %c0_70 = arith.constant 0 : index
    %c0_71 = arith.constant 0 : index
    %148 = vector.load %arg5[%c0_70, %c0_71] : memref<8x128xf32, #tpu.memory_space<vmem>>, vector<8x128xf32>
    %c0_72 = arith.constant 0 : index
    %c0_73 = arith.constant 0 : index
    %149 = vector.load %arg6[%c0_72, %c0_73] : memref<8x128xf32, #tpu.memory_space<vmem>>, vector<8x128xf32>
    %c4 = arith.constant 4 : index
    %c0_74 = arith.constant 0 : index
    %c0_75 = arith.constant 0 : index
    %150 = vector.load %arg2[%c4, %c0_74, %c0_75] : memref<8x8x512xf32, #tpu.memory_space<vmem>>, vector<1x8x512xf32>
    %151 = vector.shape_cast %150 : vector<1x8x512xf32> to vector<8x512xf32>
    %cst_76 = arith.constant dense<0.000000e+00> : vector<8x512xf32>
    %152 = tpu.matmul %148, %3, %cst_76 {dimension_numbers = #tpu.dot_dimension_numbers<[1], [0], [0], [1], [0, 0, 1, 1], [], []>} : vector<8x128xf32>, vector<128x512xf32>, vector<8x512xf32> -> vector<8x512xf32>
    %153 = arith.addf %151, %152 : vector<8x512xf32>
    %154 = vector.extract_strided_slice %153 {offsets = [0, 0], sizes = [8, 128], strides = [1, 1]} : vector<8x512xf32> to vector<8x128xf32>
    %155 = arith.negf %154 : vector<8x128xf32>
    %156 = math.exp %155 : vector<8x128xf32>
    %cst_77 = arith.constant 1.000000e+00 : f32
    %157 = vector.broadcast %cst_77 : f32 to vector<8x128xf32>
    %158 = arith.addf %157, %156 : vector<8x128xf32>
    %159 = arith.divf %157, %158 : vector<8x128xf32>
    %160 = vector.extract_strided_slice %153 {offsets = [0, 128], sizes = [8, 128], strides = [1, 1]} : vector<8x512xf32> to vector<8x128xf32>
    %161 = arith.negf %160 : vector<8x128xf32>
    %162 = math.exp %161 : vector<8x128xf32>
    %cst_78 = arith.constant 1.000000e+00 : f32
    %163 = vector.broadcast %cst_78 : f32 to vector<8x128xf32>
    %164 = arith.addf %163, %162 : vector<8x128xf32>
    %165 = arith.divf %163, %164 : vector<8x128xf32>
    %166 = vector.extract_strided_slice %153 {offsets = [0, 256], sizes = [8, 128], strides = [1, 1]} : vector<8x512xf32> to vector<8x128xf32>
    %167 = math.tanh %166 : vector<8x128xf32>
    %168 = vector.extract_strided_slice %153 {offsets = [0, 384], sizes = [8, 128], strides = [1, 1]} : vector<8x512xf32> to vector<8x128xf32>
    %169 = arith.negf %168 : vector<8x128xf32>
    %170 = math.exp %169 : vector<8x128xf32>
    %cst_79 = arith.constant 1.000000e+00 : f32
    %171 = vector.broadcast %cst_79 : f32 to vector<8x128xf32>
    %172 = arith.addf %171, %170 : vector<8x128xf32>
    %173 = arith.divf %171, %172 : vector<8x128xf32>
    %174 = arith.mulf %165, %149 : vector<8x128xf32>
    %175 = arith.mulf %159, %167 : vector<8x128xf32>
    %176 = arith.addf %174, %175 : vector<8x128xf32>
    %177 = math.tanh %176 : vector<8x128xf32>
    %178 = arith.mulf %173, %177 : vector<8x128xf32>
    %c0_80 = arith.constant 0 : index
    %c0_81 = arith.constant 0 : index
    %179 = vector.load %arg6[%c0_80, %c0_81] : memref<8x128xf32, #tpu.memory_space<vmem>>, vector<8x128xf32>
    tpu.vector_store %arg6[%c0_80, %c0_81], %176 {strides = array<i32>} : memref<8x128xf32, #tpu.memory_space<vmem>>, vector<8x128xf32>,
    %c0_82 = arith.constant 0 : index
    %c0_83 = arith.constant 0 : index
    %180 = vector.load %arg5[%c0_82, %c0_83] : memref<8x128xf32, #tpu.memory_space<vmem>>, vector<8x128xf32>
    tpu.vector_store %arg5[%c0_82, %c0_83], %178 {strides = array<i32>} : memref<8x128xf32, #tpu.memory_space<vmem>>, vector<8x128xf32>,
    %c4_84 = arith.constant 4 : index
    %c0_85 = arith.constant 0 : index
    %c0_86 = arith.constant 0 : index
    %181 = vector.load %arg4[%c4_84, %c0_85, %c0_86] : memref<8x8x128xf32, #tpu.memory_space<vmem>>, vector<1x8x128xf32>
    %182 = vector.shape_cast %181 : vector<1x8x128xf32> to vector<8x128xf32>
    %183 = vector.shape_cast %178 : vector<8x128xf32> to vector<1x8x128xf32>
    tpu.vector_store %arg4[%c4_84, %c0_85, %c0_86], %183 {strides = array<i32>} : memref<8x8x128xf32, #tpu.memory_space<vmem>>, vector<1x8x128xf32>,
    %c0_87 = arith.constant 0 : index
    %c0_88 = arith.constant 0 : index
    %184 = vector.load %arg5[%c0_87, %c0_88] : memref<8x128xf32, #tpu.memory_space<vmem>>, vector<8x128xf32>
    %c0_89 = arith.constant 0 : index
    %c0_90 = arith.constant 0 : index
    %185 = vector.load %arg6[%c0_89, %c0_90] : memref<8x128xf32, #tpu.memory_space<vmem>>, vector<8x128xf32>
    %c5 = arith.constant 5 : index
    %c0_91 = arith.constant 0 : index
    %c0_92 = arith.constant 0 : index
    %186 = vector.load %arg2[%c5, %c0_91, %c0_92] : memref<8x8x512xf32, #tpu.memory_space<vmem>>, vector<1x8x512xf32>
    %187 = vector.shape_cast %186 : vector<1x8x512xf32> to vector<8x512xf32>
    %cst_93 = arith.constant dense<0.000000e+00> : vector<8x512xf32>
    %188 = tpu.matmul %184, %3, %cst_93 {dimension_numbers = #tpu.dot_dimension_numbers<[1], [0], [0], [1], [0, 0, 1, 1], [], []>} : vector<8x128xf32>, vector<128x512xf32>, vector<8x512xf32> -> vector<8x512xf32>
    %189 = arith.addf %187, %188 : vector<8x512xf32>
    %190 = vector.extract_strided_slice %189 {offsets = [0, 0], sizes = [8, 128], strides = [1, 1]} : vector<8x512xf32> to vector<8x128xf32>
    %191 = arith.negf %190 : vector<8x128xf32>
    %192 = math.exp %191 : vector<8x128xf32>
    %cst_94 = arith.constant 1.000000e+00 : f32
    %193 = vector.broadcast %cst_94 : f32 to vector<8x128xf32>
    %194 = arith.addf %193, %192 : vector<8x128xf32>
    %195 = arith.divf %193, %194 : vector<8x128xf32>
    %196 = vector.extract_strided_slice %189 {offsets = [0, 128], sizes = [8, 128], strides = [1, 1]} : vector<8x512xf32> to vector<8x128xf32>
    %197 = arith.negf %196 : vector<8x128xf32>
    %198 = math.exp %197 : vector<8x128xf32>
    %cst_95 = arith.constant 1.000000e+00 : f32
    %199 = vector.broadcast %cst_95 : f32 to vector<8x128xf32>
    %200 = arith.addf %199, %198 : vector<8x128xf32>
    %201 = arith.divf %199, %200 : vector<8x128xf32>
    %202 = vector.extract_strided_slice %189 {offsets = [0, 256], sizes = [8, 128], strides = [1, 1]} : vector<8x512xf32> to vector<8x128xf32>
    %203 = math.tanh %202 : vector<8x128xf32>
    %204 = vector.extract_strided_slice %189 {offsets = [0, 384], sizes = [8, 128], strides = [1, 1]} : vector<8x512xf32> to vector<8x128xf32>
    %205 = arith.negf %204 : vector<8x128xf32>
    %206 = math.exp %205 : vector<8x128xf32>
    %cst_96 = arith.constant 1.000000e+00 : f32
    %207 = vector.broadcast %cst_96 : f32 to vector<8x128xf32>
    %208 = arith.addf %207, %206 : vector<8x128xf32>
    %209 = arith.divf %207, %208 : vector<8x128xf32>
    %210 = arith.mulf %201, %185 : vector<8x128xf32>
    %211 = arith.mulf %195, %203 : vector<8x128xf32>
    %212 = arith.addf %210, %211 : vector<8x128xf32>
    %213 = math.tanh %212 : vector<8x128xf32>
    %214 = arith.mulf %209, %213 : vector<8x128xf32>
    %c0_97 = arith.constant 0 : index
    %c0_98 = arith.constant 0 : index
    %215 = vector.load %arg6[%c0_97, %c0_98] : memref<8x128xf32, #tpu.memory_space<vmem>>, vector<8x128xf32>
    tpu.vector_store %arg6[%c0_97, %c0_98], %212 {strides = array<i32>} : memref<8x128xf32, #tpu.memory_space<vmem>>, vector<8x128xf32>,
    %c0_99 = arith.constant 0 : index
    %c0_100 = arith.constant 0 : index
    %216 = vector.load %arg5[%c0_99, %c0_100] : memref<8x128xf32, #tpu.memory_space<vmem>>, vector<8x128xf32>
    tpu.vector_store %arg5[%c0_99, %c0_100], %214 {strides = array<i32>} : memref<8x128xf32, #tpu.memory_space<vmem>>, vector<8x128xf32>,
    %c5_101 = arith.constant 5 : index
    %c0_102 = arith.constant 0 : index
    %c0_103 = arith.constant 0 : index
    %217 = vector.load %arg4[%c5_101, %c0_102, %c0_103] : memref<8x8x128xf32, #tpu.memory_space<vmem>>, vector<1x8x128xf32>
    %218 = vector.shape_cast %217 : vector<1x8x128xf32> to vector<8x128xf32>
    %219 = vector.shape_cast %214 : vector<8x128xf32> to vector<1x8x128xf32>
    tpu.vector_store %arg4[%c5_101, %c0_102, %c0_103], %219 {strides = array<i32>} : memref<8x8x128xf32, #tpu.memory_space<vmem>>, vector<1x8x128xf32>,
    %c0_104 = arith.constant 0 : index
    %c0_105 = arith.constant 0 : index
    %220 = vector.load %arg5[%c0_104, %c0_105] : memref<8x128xf32, #tpu.memory_space<vmem>>, vector<8x128xf32>
    %c0_106 = arith.constant 0 : index
    %c0_107 = arith.constant 0 : index
    %221 = vector.load %arg6[%c0_106, %c0_107] : memref<8x128xf32, #tpu.memory_space<vmem>>, vector<8x128xf32>
    %c6 = arith.constant 6 : index
    %c0_108 = arith.constant 0 : index
    %c0_109 = arith.constant 0 : index
    %222 = vector.load %arg2[%c6, %c0_108, %c0_109] : memref<8x8x512xf32, #tpu.memory_space<vmem>>, vector<1x8x512xf32>
    %223 = vector.shape_cast %222 : vector<1x8x512xf32> to vector<8x512xf32>
    %cst_110 = arith.constant dense<0.000000e+00> : vector<8x512xf32>
    %224 = tpu.matmul %220, %3, %cst_110 {dimension_numbers = #tpu.dot_dimension_numbers<[1], [0], [0], [1], [0, 0, 1, 1], [], []>} : vector<8x128xf32>, vector<128x512xf32>, vector<8x512xf32> -> vector<8x512xf32>
    %225 = arith.addf %223, %224 : vector<8x512xf32>
    %226 = vector.extract_strided_slice %225 {offsets = [0, 0], sizes = [8, 128], strides = [1, 1]} : vector<8x512xf32> to vector<8x128xf32>
    %227 = arith.negf %226 : vector<8x128xf32>
    %228 = math.exp %227 : vector<8x128xf32>
    %cst_111 = arith.constant 1.000000e+00 : f32
    %229 = vector.broadcast %cst_111 : f32 to vector<8x128xf32>
    %230 = arith.addf %229, %228 : vector<8x128xf32>
    %231 = arith.divf %229, %230 : vector<8x128xf32>
    %232 = vector.extract_strided_slice %225 {offsets = [0, 128], sizes = [8, 128], strides = [1, 1]} : vector<8x512xf32> to vector<8x128xf32>
    %233 = arith.negf %232 : vector<8x128xf32>
    %234 = math.exp %233 : vector<8x128xf32>
    %cst_112 = arith.constant 1.000000e+00 : f32
    %235 = vector.broadcast %cst_112 : f32 to vector<8x128xf32>
    %236 = arith.addf %235, %234 : vector<8x128xf32>
    %237 = arith.divf %235, %236 : vector<8x128xf32>
    %238 = vector.extract_strided_slice %225 {offsets = [0, 256], sizes = [8, 128], strides = [1, 1]} : vector<8x512xf32> to vector<8x128xf32>
    %239 = math.tanh %238 : vector<8x128xf32>
    %240 = vector.extract_strided_slice %225 {offsets = [0, 384], sizes = [8, 128], strides = [1, 1]} : vector<8x512xf32> to vector<8x128xf32>
    %241 = arith.negf %240 : vector<8x128xf32>
    %242 = math.exp %241 : vector<8x128xf32>
    %cst_113 = arith.constant 1.000000e+00 : f32
    %243 = vector.broadcast %cst_113 : f32 to vector<8x128xf32>
    %244 = arith.addf %243, %242 : vector<8x128xf32>
    %245 = arith.divf %243, %244 : vector<8x128xf32>
    %246 = arith.mulf %237, %221 : vector<8x128xf32>
    %247 = arith.mulf %231, %239 : vector<8x128xf32>
    %248 = arith.addf %246, %247 : vector<8x128xf32>
    %249 = math.tanh %248 : vector<8x128xf32>
    %250 = arith.mulf %245, %249 : vector<8x128xf32>
    %c0_114 = arith.constant 0 : index
    %c0_115 = arith.constant 0 : index
    %251 = vector.load %arg6[%c0_114, %c0_115] : memref<8x128xf32, #tpu.memory_space<vmem>>, vector<8x128xf32>
    tpu.vector_store %arg6[%c0_114, %c0_115], %248 {strides = array<i32>} : memref<8x128xf32, #tpu.memory_space<vmem>>, vector<8x128xf32>,
    %c0_116 = arith.constant 0 : index
    %c0_117 = arith.constant 0 : index
    %252 = vector.load %arg5[%c0_116, %c0_117] : memref<8x128xf32, #tpu.memory_space<vmem>>, vector<8x128xf32>
    tpu.vector_store %arg5[%c0_116, %c0_117], %250 {strides = array<i32>} : memref<8x128xf32, #tpu.memory_space<vmem>>, vector<8x128xf32>,
    %c6_118 = arith.constant 6 : index
    %c0_119 = arith.constant 0 : index
    %c0_120 = arith.constant 0 : index
    %253 = vector.load %arg4[%c6_118, %c0_119, %c0_120] : memref<8x8x128xf32, #tpu.memory_space<vmem>>, vector<1x8x128xf32>
    %254 = vector.shape_cast %253 : vector<1x8x128xf32> to vector<8x128xf32>
    %255 = vector.shape_cast %250 : vector<8x128xf32> to vector<1x8x128xf32>
    tpu.vector_store %arg4[%c6_118, %c0_119, %c0_120], %255 {strides = array<i32>} : memref<8x8x128xf32, #tpu.memory_space<vmem>>, vector<1x8x128xf32>,
    %c0_121 = arith.constant 0 : index
    %c0_122 = arith.constant 0 : index
    %256 = vector.load %arg5[%c0_121, %c0_122] : memref<8x128xf32, #tpu.memory_space<vmem>>, vector<8x128xf32>
    %c0_123 = arith.constant 0 : index
    %c0_124 = arith.constant 0 : index
    %257 = vector.load %arg6[%c0_123, %c0_124] : memref<8x128xf32, #tpu.memory_space<vmem>>, vector<8x128xf32>
    %c7 = arith.constant 7 : index
    %c0_125 = arith.constant 0 : index
    %c0_126 = arith.constant 0 : index
    %258 = vector.load %arg2[%c7, %c0_125, %c0_126] : memref<8x8x512xf32, #tpu.memory_space<vmem>>, vector<1x8x512xf32>
    %259 = vector.shape_cast %258 : vector<1x8x512xf32> to vector<8x512xf32>
    %cst_127 = arith.constant dense<0.000000e+00> : vector<8x512xf32>
    %260 = tpu.matmul %256, %3, %cst_127 {dimension_numbers = #tpu.dot_dimension_numbers<[1], [0], [0], [1], [0, 0, 1, 1], [], []>} : vector<8x128xf32>, vector<128x512xf32>, vector<8x512xf32> -> vector<8x512xf32>
    %261 = arith.addf %259, %260 : vector<8x512xf32>
    %262 = vector.extract_strided_slice %261 {offsets = [0, 0], sizes = [8, 128], strides = [1, 1]} : vector<8x512xf32> to vector<8x128xf32>
    %263 = arith.negf %262 : vector<8x128xf32>
    %264 = math.exp %263 : vector<8x128xf32>
    %cst_128 = arith.constant 1.000000e+00 : f32
    %265 = vector.broadcast %cst_128 : f32 to vector<8x128xf32>
    %266 = arith.addf %265, %264 : vector<8x128xf32>
    %267 = arith.divf %265, %266 : vector<8x128xf32>
    %268 = vector.extract_strided_slice %261 {offsets = [0, 128], sizes = [8, 128], strides = [1, 1]} : vector<8x512xf32> to vector<8x128xf32>
    %269 = arith.negf %268 : vector<8x128xf32>
    %270 = math.exp %269 : vector<8x128xf32>
    %cst_129 = arith.constant 1.000000e+00 : f32
    %271 = vector.broadcast %cst_129 : f32 to vector<8x128xf32>
    %272 = arith.addf %271, %270 : vector<8x128xf32>
    %273 = arith.divf %271, %272 : vector<8x128xf32>
    %274 = vector.extract_strided_slice %261 {offsets = [0, 256], sizes = [8, 128], strides = [1, 1]} : vector<8x512xf32> to vector<8x128xf32>
    %275 = math.tanh %274 : vector<8x128xf32>
    %276 = vector.extract_strided_slice %261 {offsets = [0, 384], sizes = [8, 128], strides = [1, 1]} : vector<8x512xf32> to vector<8x128xf32>
    %277 = arith.negf %276 : vector<8x128xf32>
    %278 = math.exp %277 : vector<8x128xf32>
    %cst_130 = arith.constant 1.000000e+00 : f32
    %279 = vector.broadcast %cst_130 : f32 to vector<8x128xf32>
    %280 = arith.addf %279, %278 : vector<8x128xf32>
    %281 = arith.divf %279, %280 : vector<8x128xf32>
    %282 = arith.mulf %273, %257 : vector<8x128xf32>
    %283 = arith.mulf %267, %275 : vector<8x128xf32>
    %284 = arith.addf %282, %283 : vector<8x128xf32>
    %285 = math.tanh %284 : vector<8x128xf32>
    %286 = arith.mulf %281, %285 : vector<8x128xf32>
    %c0_131 = arith.constant 0 : index
    %c0_132 = arith.constant 0 : index
    %287 = vector.load %arg6[%c0_131, %c0_132] : memref<8x128xf32, #tpu.memory_space<vmem>>, vector<8x128xf32>
    tpu.vector_store %arg6[%c0_131, %c0_132], %284 {strides = array<i32>} : memref<8x128xf32, #tpu.memory_space<vmem>>, vector<8x128xf32>,
    %c0_133 = arith.constant 0 : index
    %c0_134 = arith.constant 0 : index
    %288 = vector.load %arg5[%c0_133, %c0_134] : memref<8x128xf32, #tpu.memory_space<vmem>>, vector<8x128xf32>
    tpu.vector_store %arg5[%c0_133, %c0_134], %286 {strides = array<i32>} : memref<8x128xf32, #tpu.memory_space<vmem>>, vector<8x128xf32>,
    %c7_135 = arith.constant 7 : index
    %c0_136 = arith.constant 0 : index
    %c0_137 = arith.constant 0 : index
    %289 = vector.load %arg4[%c7_135, %c0_136, %c0_137] : memref<8x8x128xf32, #tpu.memory_space<vmem>>, vector<1x8x128xf32>
    %290 = vector.shape_cast %289 : vector<1x8x128xf32> to vector<8x128xf32>
    %291 = vector.shape_cast %286 : vector<8x128xf32> to vector<1x8x128xf32>
    tpu.vector_store %arg4[%c7_135, %c0_136, %c0_137], %291 {strides = array<i32>} : memref<8x8x128xf32, #tpu.memory_space<vmem>>, vector<1x8x128xf32>,
    return
  }
  func.func @transform_0(%arg0: i32, %arg1: i32) -> (i32, i32, i32) {
    %c0_i32 = arith.constant 0 : i32
    %c0_i32_0 = arith.constant 0 : i32
    return %arg1, %arg0, %c0_i32 : i32, i32, i32
  }
  func.func @transform_1(%arg0: i32, %arg1: i32) -> (i32, i32) {
    %c0_i32 = arith.constant 0 : i32
    %c0_i32_0 = arith.constant 0 : i32
    %c0_i32_1 = arith.constant 0 : i32
    return %c0_i32, %c0_i32_0 : i32, i32
  }
  func.func @transform_2(%arg0: i32, %arg1: i32) -> (i32, i32, i32) {
    %c0_i32 = arith.constant 0 : i32
    %c0_i32_0 = arith.constant 0 : i32
    return %arg1, %arg0, %c0_i32 : i32, i32, i32
  }
}

</mosaic_0001>

<bundles_post_ra>
// kernel: decoder_forward.5
= control target key start
LH: loop header
LB: loop body
LE: loop exit
PB: predicated region body
PF: predicated region fallthrough
CT: control target
= control target key end

     0   :  { %s165_s1 = inlined_call_operand.vmem [shape: f32[128,128], index: 1, kind: input, shape index: {}]   ;;  %s166_s2 = inlined_call_operand.vmem [shape: f32[1,128], index: 2, kind: input, shape index: {}]   ;;  %s167_s0 = inlined_call_operand.vmem [shape: f32[16,128], index: 0, kind: input, shape index: {}]   ;;  %s168_s3 = inlined_call_operand.vmem [shape: f32[16,128], index: 3, kind: output, shape index: {}]  }
   0x1   :  { %v31_v0 = vld [vmem:[%s165_s1 + $0x78] sm:$0xff]  ;;  %v30_v1 = vld [vmem:[%s165_s1 + $0x70] sm:$0xff]  ;;  %v29_v2 = vld [vmem:[%s165_s1 + $0x68] sm:$0xff] }
   0x2   :  { %36 = vmatpush.msra.mxu0 %v31_v0  ;;  %65 = vmatpush.msra.mxu1 %v31_v0  ;;  %v28_v3 = vld [vmem:[%s165_s1 + $0x60] sm:$0xff]  ;;  %v27_v4 = vld [vmem:[%s165_s1 + $0x58] sm:$0xff]  ;;  %v26_v5 = vld [vmem:[%s165_s1 + $0x50] sm:$0xff] }
   0x3   :  { %v25_v6 = vld [vmem:[%s165_s1 + $0x48] sm:$0xff]  ;;  %v24_v7 = vld [vmem:[%s165_s1 + $0x40] sm:$0xff]  ;;  %v23_v8 = vld [vmem:[%s165_s1 + $0x38] sm:$0xff] }
   0x4   :  { %37 = vmatpush.msra.mxu0 %v30_v1  ;;  %66 = vmatpush.msra.mxu1 %v30_v1  ;;  %v22_v9 = vld [vmem:[%s165_s1 + $0x30] sm:$0xff]  ;;  %v21_v10 = vld [vmem:[%s165_s1 + $0x28] sm:$0xff]  ;;  %v20_v11 = vld [vmem:[%s165_s1 + $0x20] sm:$0xff] }
   0x5   :  { %v19_v12 = vld [vmem:[%s165_s1 + $0x18] sm:$0xff]  ;;  %v18_v13 = vld [vmem:[%s165_s1 + $0x10] sm:$0xff]  ;;  %v17_v14 = vld [vmem:[%s165_s1 + $0x8] sm:$0xff] }
   0x6   :  { %38 = vmatpush.msra.mxu0 %v29_v2  ;;  %67 = vmatpush.msra.mxu1 %v29_v2  ;;  %v16_v15 = vld [vmem:[%s165_s1] sm:$0xff]  ;;  %v15_v17 = vld [vmem:[%s167_s0 + $0x8] sm:$0xff] }
   0x7   :  { %v14_v16 = vld [vmem:[%s167_s0] sm:$0xff] }
   0x8   :  { %39 = vmatpush.msra.mxu0 %v28_v3  ;;  %68 = vmatpush.msra.mxu1 %v28_v3  ;;  %v81_v18 = vld [vmem:[%s166_s2] ss:$0 sm:$0xff] }
   0xa   :  { %40 = vmatpush.msra.mxu0 %v27_v4  ;;  %69 = vmatpush.msra.mxu1 %v27_v4 }
   0xc   :  { %41 = vmatpush.msra.mxu0 %v26_v5  ;;  %70 = vmatpush.msra.mxu1 %v26_v5 }
   0xe   :  { %42 = vmatpush.msra.mxu0 %v25_v6  ;;  %71 = vmatpush.msra.mxu1 %v25_v6 }
  0x10   :  { %43 = vmatpush.msra.mxu0 %v24_v7  ;;  %72 = vmatpush.msra.mxu1 %v24_v7 }
  0x12   :  { %44 = vmatpush.msra.mxu0 %v23_v8  ;;  %73 = vmatpush.msra.mxu1 %v23_v8 }
  0x14   :  { %45 = vmatpush.msra.mxu0 %v22_v9  ;;  %74 = vmatpush.msra.mxu1 %v22_v9 }
  0x16   :  { %46 = vmatpush.msra.mxu0 %v21_v10  ;;  %75 = vmatpush.msra.mxu1 %v21_v10 }
  0x18   :  { %47 = vmatpush.msra.mxu0 %v20_v11  ;;  %76 = vmatpush.msra.mxu1 %v20_v11 }
  0x1a   :  { %48 = vmatpush.msra.mxu0 %v19_v12  ;;  %77 = vmatpush.msra.mxu1 %v19_v12 }
  0x1c   :  { %49 = vmatpush.msra.mxu0 %v18_v13  ;;  %78 = vmatpush.msra.mxu1 %v18_v13 }
  0x1e   :  { %50 = vmatpush.msra.mxu0 %v17_v14  ;;  %79 = vmatpush.msra.mxu1 %v17_v14 }
  0x20   :  { %51 = vmatpush.msra.mxu0 %v16_v15  ;;  %80 = vmatpush.msra.mxu1 %v16_v15 }
  0x21   :  { %52 = vmatmul.f32.vlgmr.msra.gmra.mxu0 %v14_v16  ;;  %55 = vmatmul.f32.vlgmr.msra.gmra.mxu1 %v15_v17 }
  0x9e   :  { %v53_v19 = vpop.f32.mrf.mxu0  ;;  %v56_v20 = vpop.f32.mrf.mxu1 }
  0x9f   :  { %v54_v21 = vadd.f32 %v81_v18, %v53_v19  ;;  %v57_v22 = vadd.f32 %v81_v18, %v56_v20 }
  0xa1   :  { %59 = vst [vmem:[%s168_s3] sm:$0xff] %v54_v21 }
  0xa2   :  { %60 = vst [vmem:[%s168_s3 + $0x8] sm:$0xff] %v57_v22 }

// kernel: decoder_forward.3
= control target key start
LH: loop header
LB: loop body
LE: loop exit
PB: predicated region body
PF: predicated region fallthrough
CT: control target
= control target key end

     0   :  { %8 = vsyncpa [#allocation3], 0  ;;  %s615_s0 = inlined_call_operand.vmem [shape: f32[64,32], index: 0, kind: input, shape index: {}]   ;;  %s616_s1 = inlined_call_operand.hbm [shape: f32[32,512], index: 1, kind: input, shape index: {}]   ;;  %s617_s2 = inlined_call_operand.hbm [shape: f32[1,512], index: 2, kind: input, shape index: {}]   ;;  %s618_s3 = inlined_call_operand.vmem [shape: f32[64,512], index: 3, kind: output, shape index: {}]  }
   0x1   :  { %s16_s14 = sshll.u32 %s616_s1, 4  ;;  %s17_s14 = int_to_ptr.hbm [resolvable:$true] %s16_s14 }
   0x2   :  { %9 = vsyncpa [#allocation5], 0  ;;  %s393_s15 = smov [#allocation2]   ;;  %s30_s19 = sshll.u32 %s617_s2, 4  ;;  %s31_s19 = int_to_ptr.hbm [resolvable:$true] %s30_s19 }
   0x3   :  { %s18_s16 = sshll.u32 %s393_s15, 4  ;;  %s394_s20 = smov 512   ;;  %s19_s16 = int_to_ptr.vmem [resolvable:$true] %s18_s16 }
   0x4   :  { %s395_s21 = smov 32   ;;  %s396_s22 = smov [#allocation4]  }
   0x5   :  { %24 = dma.hbm_to_vmem [thread:$0]  %s17_s14, 2048, %s19_s16, [#allocation3], %s394_s20, %s394_s20, %s395_s21  }
   0x6   :  { %s32_s23 = sshll.u32 %s396_s22, 4  ;;  %s33_s23 = int_to_ptr.vmem [resolvable:$true] %s32_s23 }
   0x7   :  { %35 = dma.hbm_to_vmem [thread:$0]  %s31_s19, 64, %s33_s23, [#allocation5]  }
   0x8   :  { %389 = dma.done.wait [#allocation3], 2048  }
   0x9   :  { %390 = vsyncadd [#allocation3], 4294965248 }
   0xa   :  { %391 = dma.done.wait [#allocation5], 64  }
   0xb   :  { %392 = vsyncadd [#allocation5], 4294967232  ;;  %v66_v0 = vld [vmem:[#allocation2 + $0x70] sm:$0xff]  ;;  %v67_v1 = vld [vmem:[#allocation2 + $0x78] sm:$0xff]  ;;  %vm78_vm0 = vcmask 261120  }
   0xc   :  { %v62_v2 = vld [vmem:[#allocation2 + $0x50] sm:$0xff]  ;;  %197 = vmatpush.msra.mxu2 %v66_v0  ;;  %238 = vmatpush.msra.mxu3 %v67_v1  ;;  %v63_v3 = vld [vmem:[#allocation2 + $0x58] sm:$0xff]  ;;  %v64_v6 = vld [vmem:[#allocation2 + $0x60] sm:$0xff] }
   0xd   :  { %v58_v4 = vld [vmem:[#allocation2 + $0x30] sm:$0xff]  ;;  %v59_v5 = vld [vmem:[#allocation2 + $0x38] sm:$0xff]  ;;  %v65_v7 = vld [vmem:[#allocation2 + $0x68] sm:$0xff]  ;;  %115 = vmatpush.msra.mxu0 %v64_v6 }
   0xe   :  { %198 = vmatpush.msra.mxu2 %v62_v2  ;;  %239 = vmatpush.msra.mxu3 %v63_v3  ;;  %v60_v8 = vld [vmem:[#allocation2 + $0x40] sm:$0xff]  ;;  %v54_v9 = vld [vmem:[#allocation2 + $0x10] sm:$0xff]  ;;  %v55_v10 = vld [vmem:[#allocation2 + $0x18] sm:$0xff] }
   0xf   :  { %156 = vmatpush.msra.mxu1 %v65_v7  ;;  %v61_v11 = vld [vmem:[#allocation2 + $0x48] sm:$0xff]  ;;  %v44_v12 = vld [vmem:[%s615_s0] sm:$0xff]  ;;  %116 = vmatpush.msra.mxu0 %v60_v8  ;;  %v46_v18 = vld [vmem:[%s615_s0 + $0x10] sm:$0xff] }
  0x10   :  { %199 = vmatpush.msra.mxu2 %v58_v4  ;;  %240 = vmatpush.msra.mxu3 %v59_v5  ;;  %v56_v13 = vld [vmem:[#allocation2 + $0x20] sm:$0xff]  ;;  %v57_v14 = vld [vmem:[#allocation2 + $0x28] sm:$0xff]  ;;  %v47_v19 = vld [vmem:[%s615_s0 + $0x18] sm:$0xff] }
  0x11   :  { %157 = vmatpush.msra.mxu1 %v61_v11  ;;  %v52_v15 = vld [vmem:[#allocation2] sm:$0xff]  ;;  %v53_v16 = vld [vmem:[#allocation2 + $0x8] sm:$0xff]  ;;  %117 = vmatpush.msra.mxu0 %v56_v13  ;;  %v50_v22 = vld [vmem:[%s615_s0 + $0x30] sm:$0xff] }
  0x12   :  { %200 = vmatpush.msra.mxu2 %v54_v9  ;;  %241 = vmatpush.msra.mxu3 %v55_v10  ;;  %v45_v17 = vld [vmem:[%s615_s0 + $0x8] sm:$0xff]  ;;  %v48_v20 = vld [vmem:[%s615_s0 + $0x20] sm:$0xff]  ;;  %v51_v23 = vld [vmem:[%s615_s0 + $0x38] sm:$0xff] }
  0x13   :  { %321 = vmatmul.msk.f32.vlgmr.msra.gmra.mxu2 %vm78_vm0, %v44_v12  ;;  %329 = vmatmul.msk.f32.vlgmr.msra.gmra.mxu3 %vm78_vm0, %v44_v12  ;;  %v49_v21 = vld [vmem:[%s615_s0 + $0x28] sm:$0xff]  ;;  %v68_v24 = vld [vmem:[#allocation4] sm:$0xf] }
  0x14   :  { %158 = vmatpush.msra.mxu1 %v57_v14  ;;  %118 = vmatpush.msra.mxu0 %v52_v15  ;;  %v479_v25 = vperm.slane %v68_v24, 0  ;;  %v481_v26 = vperm.slane %v68_v24, 1  ;;  %v483_v27 = vperm.slane %v68_v24, 2  ;;  %v485_v28 = vperm.slane %v68_v24, 3 }
  0x15   :  { %305 = vmatmul.msk.f32.vlgmr.msra.gmra.mxu0 %vm78_vm0, %v44_v12 }
  0x16   :  { %159 = vmatpush.msra.mxu1 %v53_v16 }
  0x17   :  { %313 = vmatmul.msk.f32.vlgmr.msra.gmra.mxu1 %vm78_vm0, %v44_v12 }
  0x1b   :  { %322 = vmatmul.msk.f32.gmra.mxu2 %vm78_vm0, %v45_v17  ;;  %330 = vmatmul.msk.f32.gmra.mxu3 %vm78_vm0, %v45_v17 }
  0x1d   :  { %306 = vmatmul.msk.f32.gmra.mxu0 %vm78_vm0, %v45_v17 }
  0x1f   :  { %314 = vmatmul.msk.f32.gmra.mxu1 %vm78_vm0, %v45_v17 }
  0x23   :  { %323 = vmatmul.msk.f32.gmra.mxu2 %vm78_vm0, %v46_v18  ;;  %331 = vmatmul.msk.f32.gmra.mxu3 %vm78_vm0, %v46_v18 }
  0x25   :  { %307 = vmatmul.msk.f32.gmra.mxu0 %vm78_vm0, %v46_v18 }
  0x27   :  { %315 = vmatmul.msk.f32.gmra.mxu1 %vm78_vm0, %v46_v18 }
  0x2b   :  { %324 = vmatmul.msk.f32.gmra.mxu2 %vm78_vm0, %v47_v19  ;;  %332 = vmatmul.msk.f32.gmra.mxu3 %vm78_vm0, %v47_v19 }
  0x2d   :  { %308 = vmatmul.msk.f32.gmra.mxu0 %vm78_vm0, %v47_v19 }
  0x2f   :  { %316 = vmatmul.msk.f32.gmra.mxu1 %vm78_vm0, %v47_v19 }
  0x33   :  { %325 = vmatmul.msk.f32.gmra.mxu2 %vm78_vm0, %v48_v20  ;;  %333 = vmatmul.msk.f32.gmra.mxu3 %vm78_vm0, %v48_v20 }
  0x35   :  { %309 = vmatmul.msk.f32.gmra.mxu0 %vm78_vm0, %v48_v20 }
  0x37   :  { %317 = vmatmul.msk.f32.gmra.mxu1 %vm78_vm0, %v48_v20 }
  0x3b   :  { %326 = vmatmul.msk.f32.gmra.mxu2 %vm78_vm0, %v49_v21  ;;  %334 = vmatmul.msk.f32.gmra.mxu3 %vm78_vm0, %v49_v21 }
  0x3d   :  { %310 = vmatmul.msk.f32.gmra.mxu0 %vm78_vm0, %v49_v21 }
  0x3f   :  { %318 = vmatmul.msk.f32.gmra.mxu1 %vm78_vm0, %v49_v21 }
  0x43   :  { %327 = vmatmul.msk.f32.gmra.mxu2 %vm78_vm0, %v50_v22  ;;  %335 = vmatmul.msk.f32.gmra.mxu3 %vm78_vm0, %v50_v22 }
  0x45   :  { %311 = vmatmul.msk.f32.gmra.mxu0 %vm78_vm0, %v50_v22 }
  0x47   :  { %319 = vmatmul.msk.f32.gmra.mxu1 %vm78_vm0, %v50_v22 }
  0x4b   :  { %328 = vmatmul.msk.f32.gmra.mxu2 %vm78_vm0, %v51_v23  ;;  %336 = vmatmul.msk.f32.gmra.mxu3 %vm78_vm0, %v51_v23 }
  0x4d   :  { %312 = vmatmul.msk.f32.gmra.mxu0 %vm78_vm0, %v51_v23 }
  0x4f   :  { %320 = vmatmul.msk.f32.gmra.mxu1 %vm78_vm0, %v51_v23 }
  0x92   :  { %v120_v29 = vpop.f32.mrf.mxu0 }
  0x93   :  { %v121_v31 = vadd.f32 %v120_v29, %v479_v25 }
  0x94   :  { %v161_v30 = vpop.f32.mrf.mxu1 }
  0x95   :  { %v162_v32 = vadd.f32 %v161_v30, %v481_v26  ;;  %267 = vst [vmem:[%s618_s3] sm:$0xff] %v121_v31 }
  0x96   :  { %v202_v33 = vpop.f32.mrf.mxu2  ;;  %v243_v34 = vpop.f32.mrf.mxu3 }
  0x97   :  { %v203_v35 = vadd.f32 %v202_v33, %v483_v27  ;;  %v244_v36 = vadd.f32 %v243_v34, %v485_v28  ;;  %268 = vst [vmem:[%s618_s3 + $0x8] sm:$0xff] %v162_v32 }
  0x99   :  { %269 = vst [vmem:[%s618_s3 + $0x10] sm:$0xff] %v203_v35 }
  0x9a   :  { %270 = vst [vmem:[%s618_s3 + $0x18] sm:$0xff] %v244_v36  ;;  %v123_v37 = vpop.f32.mrf.mxu0 }
  0x9b   :  { %v124_v39 = vadd.f32 %v123_v37, %v479_v25 }
  0x9c   :  { %v164_v38 = vpop.f32.mrf.mxu1 }
  0x9d   :  { %v165_v40 = vadd.f32 %v164_v38, %v481_v26  ;;  %271 = vst [vmem:[%s618_s3 + $0x20] sm:$0xff] %v124_v39 }
  0x9e   :  { %v205_v41 = vpop.f32.mrf.mxu2  ;;  %v246_v42 = vpop.f32.mrf.mxu3 }
  0x9f   :  { %v206_v43 = vadd.f32 %v205_v41, %v483_v27  ;;  %v247_v44 = vadd.f32 %v246_v42, %v485_v28  ;;  %272 = vst [vmem:[%s618_s3 + $0x28] sm:$0xff] %v165_v40 }
  0xa1   :  { %273 = vst [vmem:[%s618_s3 + $0x30] sm:$0xff] %v206_v43 }
  0xa2   :  { %274 = vst [vmem:[%s618_s3 + $0x38] sm:$0xff] %v247_v44  ;;  %v126_v45 = vpop.f32.mrf.mxu0 }
  0xa3   :  { %v127_v47 = vadd.f32 %v126_v45, %v479_v25 }
  0xa4   :  { %v167_v46 = vpop.f32.mrf.mxu1 }
  0xa5   :  { %v168_v48 = vadd.f32 %v167_v46, %v481_v26  ;;  %275 = vst [vmem:[%s618_s3 + $0x40] sm:$0xff] %v127_v47 }
  0xa6   :  { %v208_v49 = vpop.f32.mrf.mxu2  ;;  %v249_v50 = vpop.f32.mrf.mxu3 }
  0xa7   :  { %v209_v51 = vadd.f32 %v208_v49, %v483_v27  ;;  %v250_v52 = vadd.f32 %v249_v50, %v485_v28  ;;  %276 = vst [vmem:[%s618_s3 + $0x48] sm:$0xff] %v168_v48 }
  0xa9   :  { %277 = vst [vmem:[%s618_s3 + $0x50] sm:$0xff] %v209_v51 }
  0xaa   :  { %278 = vst [vmem:[%s618_s3 + $0x58] sm:$0xff] %v250_v52  ;;  %v129_v53 = vpop.f32.mrf.mxu0 }
  0xab   :  { %v130_v55 = vadd.f32 %v129_v53, %v479_v25 }
  0xac   :  { %v170_v54 = vpop.f32.mrf.mxu1 }
  0xad   :  { %v171_v56 = vadd.f32 %v170_v54, %v481_v26  ;;  %279 = vst [vmem:[%s618_s3 + $0x60] sm:$0xff] %v130_v55 }
  0xae   :  { %v211_v57 = vpop.f32.mrf.mxu2  ;;  %v252_v58 = vpop.f32.mrf.mxu3 }
  0xaf   :  { %v212_v59 = vadd.f32 %v211_v57, %v483_v27  ;;  %v253_v60 = vadd.f32 %v252_v58, %v485_v28  ;;  %280 = vst [vmem:[%s618_s3 + $0x68] sm:$0xff] %v171_v56 }
  0xb1   :  { %281 = vst [vmem:[%s618_s3 + $0x70] sm:$0xff] %v212_v59 }
  0xb2   :  { %282 = vst [vmem:[%s618_s3 + $0x78] sm:$0xff] %v253_v60  ;;  %v132_v61 = vpop.f32.mrf.mxu0 }
  0xb3   :  { %v133_v63 = vadd.f32 %v132_v61, %v479_v25 }
  0xb4   :  { %v173_v62 = vpop.f32.mrf.mxu1 }
  0xb5   :  { %v174_v0 = vadd.f32 %v173_v62, %v481_v26  ;;  %283 = vst [vmem:[%s618_s3 + $0x80] sm:$0xff] %v133_v63 }
  0xb6   :  { %v214_v1 = vpop.f32.mrf.mxu2  ;;  %v255_v2 = vpop.f32.mrf.mxu3 }
  0xb7   :  { %v215_v3 = vadd.f32 %v214_v1, %v483_v27  ;;  %v256_v4 = vadd.f32 %v255_v2, %v485_v28  ;;  %284 = vst [vmem:[%s618_s3 + $0x88] sm:$0xff] %v174_v0 }
  0xb9   :  { %285 = vst [vmem:[%s618_s3 + $0x90] sm:$0xff] %v215_v3 }
  0xba   :  { %286 = vst [vmem:[%s618_s3 + $0x98] sm:$0xff] %v256_v4  ;;  %v135_v5 = vpop.f32.mrf.mxu0 }
  0xbb   :  { %v136_v7 = vadd.f32 %v135_v5, %v479_v25 }
  0xbc   :  { %v176_v6 = vpop.f32.mrf.mxu1 }
  0xbd   :  { %v177_v8 = vadd.f32 %v176_v6, %v481_v26  ;;  %287 = vst [vmem:[%s618_s3 + $0xa0] sm:$0xff] %v136_v7 }
  0xbe   :  { %v217_v9 = vpop.f32.mrf.mxu2  ;;  %v258_v10 = vpop.f32.mrf.mxu3 }
  0xbf   :  { %v218_v11 = vadd.f32 %v217_v9, %v483_v27  ;;  %v259_v12 = vadd.f32 %v258_v10, %v485_v28  ;;  %288 = vst [vmem:[%s618_s3 + $0xa8] sm:$0xff] %v177_v8 }
  0xc1   :  { %289 = vst [vmem:[%s618_s3 + $0xb0] sm:$0xff] %v218_v11 }
  0xc2   :  { %290 = vst [vmem:[%s618_s3 + $0xb8] sm:$0xff] %v259_v12  ;;  %v138_v13 = vpop.f32.mrf.mxu0 }
  0xc3   :  { %v139_v15 = vadd.f32 %v138_v13, %v479_v25 }
  0xc4   :  { %v179_v14 = vpop.f32.mrf.mxu1 }
  0xc5   :  { %v180_v16 = vadd.f32 %v179_v14, %v481_v26  ;;  %291 = vst [vmem:[%s618_s3 + $0xc0] sm:$0xff] %v139_v15 }
  0xc6   :  { %v220_v17 = vpop.f32.mrf.mxu2  ;;  %v261_v18 = vpop.f32.mrf.mxu3 }
  0xc7   :  { %v221_v19 = vadd.f32 %v220_v17, %v483_v27  ;;  %v262_v20 = vadd.f32 %v261_v18, %v485_v28  ;;  %292 = vst [vmem:[%s618_s3 + $0xc8] sm:$0xff] %v180_v16 }
  0xc9   :  { %293 = vst [vmem:[%s618_s3 + $0xd0] sm:$0xff] %v221_v19 }
  0xca   :  { %294 = vst [vmem:[%s618_s3 + $0xd8] sm:$0xff] %v262_v20  ;;  %v141_v21 = vpop.f32.mrf.mxu0 }
  0xcb   :  { %v142_v23 = vadd.f32 %v141_v21, %v479_v25 }
  0xcc   :  { %v182_v22 = vpop.f32.mrf.mxu1 }
  0xcd   :  { %v183_v24 = vadd.f32 %v182_v22, %v481_v26  ;;  %295 = vst [vmem:[%s618_s3 + $0xe0] sm:$0xff] %v142_v23 }
  0xce   :  { %v223_v29 = vpop.f32.mrf.mxu2  ;;  %v264_v30 = vpop.f32.mrf.mxu3 }
  0xcf   :  { %v224_v31 = vadd.f32 %v223_v29, %v483_v27  ;;  %v265_v32 = vadd.f32 %v264_v30, %v485_v28  ;;  %296 = vst [vmem:[%s618_s3 + $0xe8] sm:$0xff] %v183_v24 }
  0xd1   :  { %297 = vst [vmem:[%s618_s3 + $0xf0] sm:$0xff] %v224_v31 }
  0xd2   :  { %298 = vst [vmem:[%s618_s3 + $0xf8] sm:$0xff] %v265_v32 }
  0xd3   :  { %303 = vsyncpa [#allocation3], 1 }
  0xd4   :  { %304 = vsyncpa [#allocation5], 1 }

// kernel: decoder_forward.4
= control target key start
LH: loop header
LB: loop body
LE: loop exit
PB: predicated region body
PF: predicated region fallthrough
CT: control target
= control target key end

     0   :  { %v1599_v60 = vmov 0.0   ;;  %s2915_s1 = inlined_call_operand.vmem [shape: f32[128,512], index: 1, kind: input, shape index: {}]   ;;  %s2916_s0 = inlined_call_operand.vmem [shape: f32[8,8,512], index: 0, kind: input, shape index: {}]   ;;  %s2917_s2 = inlined_call_operand.vmem [shape: f32[8,8,128], index: 2, kind: output, shape index: {}]  }
   0x1   :  { %v1618_v0 = vld [vmem:[%s2915_s1 + $0x1e0] sm:$0xff]  ;;  %v1623_v1 = vld [vmem:[%s2915_s1 + $0x1e8] sm:$0xff]  ;;  %v1628_v2 = vld [vmem:[%s2915_s1 + $0x1f8] sm:$0xff] }
   0x2   :  { %3024 = vst [vmem:[#allocation4_spill] sm:$0xff] %v1628_v2  ;;  %87 = vmatpush.msra.mxu0 %v1618_v0  ;;  %107 = vmatpush.msra.mxu1 %v1623_v1  ;;  %v1635_v3 = vld [vmem:[%s2915_s1 + $0x1c0] sm:$0xff]  ;;  %v1640_v4 = vld [vmem:[%s2915_s1 + $0x1c8] sm:$0xff]  ;;  %v1645_v5 = vld [vmem:[%s2915_s1 + $0x1d8] sm:$0xff] }
   0x3   :  { %147 = vmatpush.msra.mxu3 %v1628_v2  ;;  %v1651_v6 = vld [vmem:[%s2915_s1 + $0x1a0] sm:$0xff]  ;;  %v1656_v7 = vld [vmem:[%s2915_s1 + $0x1a8] sm:$0xff]  ;;  %v1663_v8 = vld [vmem:[%s2915_s1 + $0x1b8] sm:$0xff] }
   0x4   :  { %88 = vmatpush.msra.mxu0 %v1635_v3  ;;  %108 = vmatpush.msra.mxu1 %v1640_v4  ;;  %v1669_v9 = vld [vmem:[%s2915_s1 + $0x180] sm:$0xff]  ;;  %v1674_v10 = vld [vmem:[%s2915_s1 + $0x188] sm:$0xff]  ;;  %v1681_v11 = vld [vmem:[%s2915_s1 + $0x198] sm:$0xff] }
   0x5   :  { %148 = vmatpush.msra.mxu3 %v1645_v5  ;;  %v1687_v12 = vld [vmem:[%s2915_s1 + $0x160] sm:$0xff]  ;;  %v1692_v13 = vld [vmem:[%s2915_s1 + $0x168] sm:$0xff]  ;;  %v1699_v14 = vld [vmem:[%s2915_s1 + $0x178] sm:$0xff] }
   0x6   :  { %89 = vmatpush.msra.mxu0 %v1651_v6  ;;  %109 = vmatpush.msra.mxu1 %v1656_v7  ;;  %v1705_v15 = vld [vmem:[%s2915_s1 + $0x140] sm:$0xff]  ;;  %v1710_v16 = vld [vmem:[%s2915_s1 + $0x148] sm:$0xff]  ;;  %v1715_v17 = vld [vmem:[%s2915_s1 + $0x1f0] sm:$0xff] }
   0x7   :  { %149 = vmatpush.msra.mxu3 %v1663_v8  ;;  %v1722_v18 = vld [vmem:[%s2915_s1 + $0x158] sm:$0xff]  ;;  %v1727_v19 = vld [vmem:[%s2915_s1 + $0x1d0] sm:$0xff]  ;;  %v1733_v20 = vld [vmem:[%s2915_s1 + $0x120] sm:$0xff]  ;;  %127 = vmatpush.msra.mxu2 %v1715_v17 }
   0x8   :  { %90 = vmatpush.msra.mxu0 %v1669_v9  ;;  %110 = vmatpush.msra.mxu1 %v1674_v10  ;;  %v1738_v21 = vld [vmem:[%s2915_s1 + $0x128] sm:$0xff]  ;;  %v1746_v22 = vld [vmem:[%s2915_s1 + $0x138] sm:$0xff]  ;;  %v1751_v23 = vld [vmem:[%s2915_s1 + $0x1b0] sm:$0xff] }
   0x9   :  { %150 = vmatpush.msra.mxu3 %v1681_v11  ;;  %v1757_v24 = vld [vmem:[%s2915_s1 + $0x100] sm:$0xff]  ;;  %v1762_v25 = vld [vmem:[%s2915_s1 + $0x108] sm:$0xff]  ;;  %128 = vmatpush.msra.mxu2 %v1727_v19  ;;  %v1770_v26 = vld [vmem:[%s2915_s1 + $0x118] sm:$0xff] }
   0xa   :  { %91 = vmatpush.msra.mxu0 %v1687_v12  ;;  %111 = vmatpush.msra.mxu1 %v1692_v13  ;;  %v1775_v27 = vld [vmem:[%s2915_s1 + $0x190] sm:$0xff]  ;;  %v1781_v28 = vld [vmem:[%s2915_s1 + $0xe0] sm:$0xff]  ;;  %v1786_v29 = vld [vmem:[%s2915_s1 + $0xe8] sm:$0xff] }
   0xb   :  { %151 = vmatpush.msra.mxu3 %v1699_v14  ;;  %129 = vmatpush.msra.mxu2 %v1751_v23  ;;  %v1794_v30 = vld [vmem:[%s2915_s1 + $0xf8] sm:$0xff]  ;;  %v1799_v31 = vld [vmem:[%s2915_s1 + $0x170] sm:$0xff]  ;;  %v1805_v32 = vld [vmem:[%s2915_s1 + $0xc0] sm:$0xff] }
   0xc   :  { %92 = vmatpush.msra.mxu0 %v1705_v15  ;;  %112 = vmatpush.msra.mxu1 %v1710_v16  ;;  %v1810_v33 = vld [vmem:[%s2915_s1 + $0xc8] sm:$0xff]  ;;  %v1818_v34 = vld [vmem:[%s2915_s1 + $0xd8] sm:$0xff]  ;;  %v1823_v35 = vld [vmem:[%s2915_s1 + $0x150] sm:$0xff] }
   0xd   :  { %152 = vmatpush.msra.mxu3 %v1722_v18  ;;  %130 = vmatpush.msra.mxu2 %v1775_v27  ;;  %3025 = vst [vmem:[#allocation5_spill] sm:$0xff] %v1818_v34  ;;  %v1829_v36 = vld [vmem:[%s2915_s1 + $0xa0] sm:$0xff]  ;;  %v1834_v37 = vld [vmem:[%s2915_s1 + $0xa8] sm:$0xff]  ;;  %v1842_v38 = vld [vmem:[%s2915_s1 + $0xb8] sm:$0xff] }
   0xe   :  { %93 = vmatpush.msra.mxu0 %v1733_v20  ;;  %113 = vmatpush.msra.mxu1 %v1738_v21  ;;  %3026 = vst [vmem:[#allocation6_spill] sm:$0xff] %v1829_v36  ;;  %v1847_v39 = vld [vmem:[%s2915_s1 + $0x130] sm:$0xff]  ;;  %v1853_v40 = vld [vmem:[%s2915_s1 + $0x80] sm:$0xff]  ;;  %v1858_v41 = vld [vmem:[%s2915_s1 + $0x88] sm:$0xff] }
   0xf   :  { %153 = vmatpush.msra.mxu3 %v1746_v22  ;;  %3027 = vst [vmem:[#allocation7_spill] sm:$0xff] %v1834_v37  ;;  %131 = vmatpush.msra.mxu2 %v1799_v31  ;;  %v1866_v42 = vld [vmem:[%s2915_s1 + $0x98] sm:$0xff]  ;;  %v1871_v43 = vld [vmem:[%s2915_s1 + $0x110] sm:$0xff]  ;;  %v1877_v44 = vld [vmem:[%s2915_s1 + $0x60] sm:$0xff] }
  0x10   :  { %94 = vmatpush.msra.mxu0 %v1757_v24  ;;  %114 = vmatpush.msra.mxu1 %v1762_v25  ;;  %3028 = vst [vmem:[#allocation8_spill] sm:$0xff] %v1842_v38  ;;  %v1882_v45 = vld [vmem:[%s2915_s1 + $0x68] sm:$0xff]  ;;  %v1890_v46 = vld [vmem:[%s2915_s1 + $0x78] sm:$0xff]  ;;  %v1895_v47 = vld [vmem:[%s2915_s1 + $0xf0] sm:$0xff] }
  0x11   :  { %154 = vmatpush.msra.mxu3 %v1770_v26  ;;  %3029 = vst [vmem:[#allocation9_spill] sm:$0xff] %v1853_v40  ;;  %132 = vmatpush.msra.mxu2 %v1823_v35  ;;  %v1901_v48 = vld [vmem:[%s2915_s1 + $0x40] sm:$0xff]  ;;  %v1906_v49 = vld [vmem:[%s2915_s1 + $0x48] sm:$0xff]  ;;  %v1914_v50 = vld [vmem:[%s2915_s1 + $0x58] sm:$0xff] }
  0x12   :  { %95 = vmatpush.msra.mxu0 %v1781_v28  ;;  %115 = vmatpush.msra.mxu1 %v1786_v29  ;;  %3030 = vst [vmem:[#allocation10_spill] sm:$0xff] %v1858_v41  ;;  %v1919_v51 = vld [vmem:[%s2915_s1 + $0xd0] sm:$0xff]  ;;  %v1925_v52 = vld [vmem:[%s2915_s1 + $0x20] sm:$0xff]  ;;  %v1930_v53 = vld [vmem:[%s2915_s1 + $0x28] sm:$0xff] }
  0x13   :  { %155 = vmatpush.msra.mxu3 %v1794_v30  ;;  %3031 = vst [vmem:[#allocation11_spill] sm:$0xff] %v1866_v42  ;;  %133 = vmatpush.msra.mxu2 %v1847_v39  ;;  %v1938_v54 = vld [vmem:[%s2915_s1 + $0x38] sm:$0xff]  ;;  %v1943_v55 = vld [vmem:[%s2915_s1 + $0xb0] sm:$0xff]  ;;  %v1949_v56 = vld [vmem:[%s2915_s1] sm:$0xff] }
  0x14   :  { %96 = vmatpush.msra.mxu0 %v1805_v32  ;;  %116 = vmatpush.msra.mxu1 %v1810_v33  ;;  %3032 = vst [vmem:[#allocation12_spill] sm:$0xff] %v1877_v44  ;;  %v1954_v57 = vld [vmem:[%s2915_s1 + $0x8] sm:$0xff]  ;;  %v1962_v58 = vld [vmem:[%s2915_s1 + $0x18] sm:$0xff]  ;;  %v1971_v59 = vld [vmem:[%s2915_s1 + $0x90] sm:$0xff] }
  0x15   :  { %156 = vmatpush.msra.mxu3 %v1818_v34  ;;  %3033 = vst [vmem:[#allocation13_spill] sm:$0xff] %v1882_v45  ;;  %134 = vmatpush.msra.mxu2 %v1871_v43  ;;  %v1977_v61 = vld [vmem:[%s2915_s1 + $0x70] sm:$0xff] }
  0x16   :  { %97 = vmatpush.msra.mxu0 %v1829_v36  ;;  %117 = vmatpush.msra.mxu1 %v1834_v37  ;;  %3034 = vst [vmem:[#allocation14_spill] sm:$0xff] %v1890_v46  ;;  %v1984_v62 = vld [vmem:[%s2915_s1 + $0x50] sm:$0xff] }
  0x17   :  { %157 = vmatpush.msra.mxu3 %v1842_v38  ;;  %3035 = vst [vmem:[#allocation15_spill] sm:$0xff] %v1901_v48  ;;  %135 = vmatpush.msra.mxu2 %v1895_v47  ;;  %v1993_v63 = vld [vmem:[%s2915_s1 + $0x30] sm:$0xff] }
  0x18   :  { %98 = vmatpush.msra.mxu0 %v1853_v40  ;;  %118 = vmatpush.msra.mxu1 %v1858_v41  ;;  %3036 = vst [vmem:[#allocation16_spill] sm:$0xff] %v1906_v49 }
  0x19   :  { %158 = vmatpush.msra.mxu3 %v1866_v42  ;;  %3037 = vst [vmem:[#allocation17_spill] sm:$0xff] %v1914_v50  ;;  %136 = vmatpush.msra.mxu2 %v1919_v51 }
  0x1a   :  { %99 = vmatpush.msra.mxu0 %v1877_v44  ;;  %119 = vmatpush.msra.mxu1 %v1882_v45  ;;  %3038 = vst [vmem:[#allocation18_spill] sm:$0xff] %v1919_v51 }
  0x1b   :  { %159 = vmatpush.msra.mxu3 %v1890_v46  ;;  %3039 = vst [vmem:[#allocation19_spill] sm:$0xff] %v1925_v52  ;;  %137 = vmatpush.msra.mxu2 %v1943_v55 }
  0x1c   :  { %3040 = vst [vmem:[#allocation20_spill] sm:$0xff] %v1930_v53  ;;  %100 = vmatpush.msra.mxu0 %v1901_v48  ;;  %120 = vmatpush.msra.mxu1 %v1906_v49 }
  0x1d   :  { %3041 = vst [vmem:[#allocation21_spill] sm:$0xff] %v1938_v54  ;;  %160 = vmatpush.msra.mxu3 %v1914_v50  ;;  %138 = vmatpush.msra.mxu2 %v1971_v59 }
  0x1e   :  { %3042 = vst [vmem:[#allocation22_spill] sm:$0xff] %v1943_v55  ;;  %101 = vmatpush.msra.mxu0 %v1925_v52  ;;  %121 = vmatpush.msra.mxu1 %v1930_v53 }
  0x1f   :  { %3043 = vst [vmem:[#allocation23_spill] sm:$0xff] %v1949_v56  ;;  %161 = vmatpush.msra.mxu3 %v1938_v54  ;;  %139 = vmatpush.msra.mxu2 %v1977_v61 }
  0x20   :  { %3044 = vst [vmem:[#allocation24_spill] sm:$0xff] %v1954_v57  ;;  %102 = vmatpush.msra.mxu0 %v1949_v56  ;;  %122 = vmatpush.msra.mxu1 %v1954_v57 }
  0x21   :  { %3045 = vst [vmem:[#allocation25_spill] sm:$0xff] %v1962_v58  ;;  %162 = vmatpush.msra.mxu3 %v1962_v58  ;;  %103 = vmatmul.f32.vlgmr.msra.gmra.mxu0 %v1599_v60 }
  0x22   :  { %3046 = vst [vmem:[#allocation26_spill] sm:$0xff] %v1971_v59  ;;  %123 = vmatmul.f32.vlgmr.msra.gmra.mxu1 %v1599_v60  ;;  %163 = vmatmul.f32.vlgmr.msra.gmra.mxu3 %v1599_v60 }
  0x23   :  { %3047 = vst [vmem:[#allocation27_spill] sm:$0xff] %v1977_v61  ;;  %244 = vmatpush.msrb.mxu0 %v1618_v0  ;;  %264 = vmatpush.msrb.mxu1 %v1623_v1 }
  0x24   :  { %3048 = vst [vmem:[#allocation28_spill] sm:$0xff] %v1984_v62  ;;  %304 = vmatpush.msrb.mxu3 %v1628_v2  ;;  %140 = vmatpush.msra.mxu2 %v1984_v62  ;;  %v2002_v2 = vld [vmem:[%s2915_s1 + $0x10] sm:$0xff] }
  0x25   :  { %245 = vmatpush.msrb.mxu0 %v1635_v3  ;;  %3049 = vst [vmem:[#allocation29_spill] sm:$0xff] %v1993_v63  ;;  %265 = vmatpush.msrb.mxu1 %v1640_v4 }
  0x26   :  { %305 = vmatpush.msrb.mxu3 %v1645_v5  ;;  %3050 = vst [vmem:[#allocation30_spill] sm:$0xff] %v2002_v2  ;;  %141 = vmatpush.msra.mxu2 %v1993_v63 }
  0x27   :  { %246 = vmatpush.msrb.mxu0 %v1651_v6  ;;  %266 = vmatpush.msrb.mxu1 %v1656_v7 }
  0x28   :  { %306 = vmatpush.msrb.mxu3 %v1663_v8  ;;  %142 = vmatpush.msra.mxu2 %v2002_v2 }
  0x29   :  { %247 = vmatpush.msrb.mxu0 %v1669_v9  ;;  %267 = vmatpush.msrb.mxu1 %v1674_v10 }
  0x2a   :  { %307 = vmatpush.msrb.mxu3 %v1681_v11  ;;  %143 = vmatmul.f32.vlgmr.msra.gmra.mxu2 %v1599_v60  ;;  %v3051_v60 = vld [vmem:[#allocation4_spill] sm:$0xff] }
  0x2b   :  { %248 = vmatpush.msrb.mxu0 %v1687_v12  ;;  %268 = vmatpush.msrb.mxu1 %v1692_v13 }
  0x2c   :  { %284 = vmatpush.msrb.mxu2 %v1715_v17  ;;  %308 = vmatpush.msrb.mxu3 %v1699_v14 }
  0x2d   :  { %249 = vmatpush.msrb.mxu0 %v1705_v15  ;;  %269 = vmatpush.msrb.mxu1 %v1710_v16 }
  0x2e   :  { %285 = vmatpush.msrb.mxu2 %v1727_v19  ;;  %309 = vmatpush.msrb.mxu3 %v1722_v18 }
  0x2f   :  { %250 = vmatpush.msrb.mxu0 %v1733_v20  ;;  %270 = vmatpush.msrb.mxu1 %v1738_v21 }
  0x30   :  { %286 = vmatpush.msrb.mxu2 %v1751_v23  ;;  %310 = vmatpush.msrb.mxu3 %v1746_v22 }
  0x31   :  { %251 = vmatpush.msrb.mxu0 %v1757_v24  ;;  %271 = vmatpush.msrb.mxu1 %v1762_v25 }
  0x32   :  { %287 = vmatpush.msrb.mxu2 %v1775_v27  ;;  %311 = vmatpush.msrb.mxu3 %v1770_v26 }
  0x33   :  { %252 = vmatpush.msrb.mxu0 %v1781_v28  ;;  %272 = vmatpush.msrb.mxu1 %v1786_v29 }
  0x34   :  { %288 = vmatpush.msrb.mxu2 %v1799_v31  ;;  %312 = vmatpush.msrb.mxu3 %v1794_v30 }
  0x35   :  { %253 = vmatpush.msrb.mxu0 %v1805_v32  ;;  %273 = vmatpush.msrb.mxu1 %v1810_v33 }
  0x36   :  { %289 = vmatpush.msrb.mxu2 %v1823_v35  ;;  %313 = vmatpush.msrb.mxu3 %v1818_v34 }
  0x37   :  { %254 = vmatpush.msrb.mxu0 %v1829_v36  ;;  %274 = vmatpush.msrb.mxu1 %v1834_v37 }
  0x38   :  { %290 = vmatpush.msrb.mxu2 %v1847_v39  ;;  %314 = vmatpush.msrb.mxu3 %v1842_v38 }
  0x39   :  { %255 = vmatpush.msrb.mxu0 %v1853_v40  ;;  %275 = vmatpush.msrb.mxu1 %v1858_v41 }
  0x3a   :  { %291 = vmatpush.msrb.mxu2 %v1871_v43  ;;  %315 = vmatpush.msrb.mxu3 %v1866_v42 }
  0x3b   :  { %256 = vmatpush.msrb.mxu0 %v1877_v44  ;;  %276 = vmatpush.msrb.mxu1 %v1882_v45 }
  0x3c   :  { %292 = vmatpush.msrb.mxu2 %v1895_v47  ;;  %316 = vmatpush.msrb.mxu3 %v1890_v46 }
  0x3d   :  { %257 = vmatpush.msrb.mxu0 %v1901_v48  ;;  %277 = vmatpush.msrb.mxu1 %v1906_v49 }
  0x3e   :  { %293 = vmatpush.msrb.mxu2 %v1919_v51  ;;  %317 = vmatpush.msrb.mxu3 %v1914_v50 }
  0x3f   :  { %258 = vmatpush.msrb.mxu0 %v1925_v52  ;;  %278 = vmatpush.msrb.mxu1 %v1930_v53 }
  0x40   :  { %294 = vmatpush.msrb.mxu2 %v1943_v55  ;;  %318 = vmatpush.msrb.mxu3 %v1938_v54 }
  0x41   :  { %259 = vmatpush.msrb.mxu0 %v1949_v56  ;;  %279 = vmatpush.msrb.mxu1 %v1954_v57 }
  0x42   :  { %295 = vmatpush.msrb.mxu2 %v1971_v59  ;;  %319 = vmatpush.msrb.mxu3 %v1962_v58 }
  0x43   :  { %402 = vmatpush.msra.mxu0 %v1618_v0  ;;  %422 = vmatpush.msra.mxu1 %v1623_v1 }
  0x44   :  { %296 = vmatpush.msrb.mxu2 %v1977_v61  ;;  %462 = vmatpush.msra.mxu3 %v3051_v60 }
  0x45   :  { %403 = vmatpush.msra.mxu0 %v1635_v3  ;;  %423 = vmatpush.msra.mxu1 %v1640_v4 }
  0x46   :  { %297 = vmatpush.msrb.mxu2 %v1984_v62  ;;  %463 = vmatpush.msra.mxu3 %v1645_v5 }
  0x47   :  { %404 = vmatpush.msra.mxu0 %v1651_v6  ;;  %424 = vmatpush.msra.mxu1 %v1656_v7 }
  0x48   :  { %298 = vmatpush.msrb.mxu2 %v1993_v63  ;;  %464 = vmatpush.msra.mxu3 %v1663_v8 }
  0x49   :  { %405 = vmatpush.msra.mxu0 %v1669_v9  ;;  %425 = vmatpush.msra.mxu1 %v1674_v10 }
  0x4a   :  { %299 = vmatpush.msrb.mxu2 %v2002_v2  ;;  %465 = vmatpush.msra.mxu3 %v1681_v11 }
  0x4b   :  { %406 = vmatpush.msra.mxu0 %v1687_v12  ;;  %426 = vmatpush.msra.mxu1 %v1692_v13 }
  0x4c   :  { %442 = vmatpush.msra.mxu2 %v1715_v17  ;;  %466 = vmatpush.msra.mxu3 %v1699_v14 }
  0x4d   :  { %407 = vmatpush.msra.mxu0 %v1705_v15  ;;  %427 = vmatpush.msra.mxu1 %v1710_v16 }
  0x4e   :  { %443 = vmatpush.msra.mxu2 %v1727_v19  ;;  %467 = vmatpush.msra.mxu3 %v1722_v18 }
  0x4f   :  { %408 = vmatpush.msra.mxu0 %v1733_v20  ;;  %428 = vmatpush.msra.mxu1 %v1738_v21 }
  0x50   :  { %444 = vmatpush.msra.mxu2 %v1751_v23  ;;  %468 = vmatpush.msra.mxu3 %v1746_v22 }
  0x51   :  { %409 = vmatpush.msra.mxu0 %v1757_v24  ;;  %429 = vmatpush.msra.mxu1 %v1762_v25 }
  0x52   :  { %445 = vmatpush.msra.mxu2 %v1775_v27  ;;  %469 = vmatpush.msra.mxu3 %v1770_v26 }
  0x53   :  { %410 = vmatpush.msra.mxu0 %v1781_v28  ;;  %430 = vmatpush.msra.mxu1 %v1786_v29 }
  0x54   :  { %446 = vmatpush.msra.mxu2 %v1799_v31  ;;  %470 = vmatpush.msra.mxu3 %v1794_v30 }
  0x55   :  { %411 = vmatpush.msra.mxu0 %v1805_v32  ;;  %431 = vmatpush.msra.mxu1 %v1810_v33 }
  0x56   :  { %447 = vmatpush.msra.mxu2 %v1823_v35  ;;  %471 = vmatpush.msra.mxu3 %v1818_v34 }
  0x57   :  { %412 = vmatpush.msra.mxu0 %v1829_v36  ;;  %432 = vmatpush.msra.mxu1 %v1834_v37 }
  0x58   :  { %448 = vmatpush.msra.mxu2 %v1847_v39  ;;  %472 = vmatpush.msra.mxu3 %v1842_v38 }
  0x59   :  { %413 = vmatpush.msra.mxu0 %v1853_v40  ;;  %433 = vmatpush.msra.mxu1 %v1858_v41 }
  0x5a   :  { %449 = vmatpush.msra.mxu2 %v1871_v43  ;;  %473 = vmatpush.msra.mxu3 %v1866_v42 }
  0x5b   :  { %414 = vmatpush.msra.mxu0 %v1877_v44  ;;  %434 = vmatpush.msra.mxu1 %v1882_v45 }
  0x5c   :  { %450 = vmatpush.msra.mxu2 %v1895_v47  ;;  %474 = vmatpush.msra.mxu3 %v1890_v46 }
  0x5d   :  { %415 = vmatpush.msra.mxu0 %v1901_v48  ;;  %435 = vmatpush.msra.mxu1 %v1906_v49 }
  0x5e   :  { %451 = vmatpush.msra.mxu2 %v1919_v51  ;;  %475 = vmatpush.msra.mxu3 %v1914_v50 }
  0x5f   :  { %416 = vmatpush.msra.mxu0 %v1925_v52  ;;  %436 = vmatpush.msra.mxu1 %v1930_v53 }
  0x60   :  { %452 = vmatpush.msra.mxu2 %v1943_v55  ;;  %476 = vmatpush.msra.mxu3 %v1938_v54  ;;  %v83_v54 = vld [vmem:[%s2916_s0] sm:$0xff] }
  0x61   :  { %417 = vmatpush.msra.mxu0 %v1949_v56  ;;  %437 = vmatpush.msra.mxu1 %v1954_v57  ;;  %v84_v56 = vld [vmem:[%s2916_s0 + $0x8] sm:$0xff] }
  0x62   :  { %453 = vmatpush.msra.mxu2 %v1971_v59  ;;  %477 = vmatpush.msra.mxu3 %v1962_v58 }
  0x64   :  { %454 = vmatpush.msra.mxu2 %v1977_v61 }
  0x66   :  { %455 = vmatpush.msra.mxu2 %v1984_v62 }
  0x68   :  { %456 = vmatpush.msra.mxu2 %v1993_v63  ;;  %v86_v63 = vld [vmem:[%s2916_s0 + $0x18] sm:$0xff] }
  0x6a   :  { %457 = vmatpush.msra.mxu2 %v2002_v2 }
  0x9e   :  { %v104_v53 = vpop.f32.mrf.mxu0 }
  0x9f   :  { %v167_v57 = vadd.f32 %v104_v53, %v83_v54  ;;  %v124_v52 = vpop.f32.mrf.mxu1 }
  0xa0   :  { %v168_v58 = vadd.f32 %v124_v52, %v84_v56  ;;  %v85_v52 = vld [vmem:[%s2916_s0 + $0x10] sm:$0xff] }
  0xa1   :  { %v1347_v50 = vmul.f32 -1.442695, %v167_v57 }
  0xa2   :  { %v1348_v49 = vmul.f32 -1.442695, %v168_v58 }
  0xa3   :  { %1407 = vpow2.f32 %v1347_v50 }
  0xa4   :  { %1409 = vpow2.f32 %v1348_v49 }
  0xa5   :  { %v164_v2 = vpop.f32.mrf.mxu3 }
  0xa6   :  { %v170_v62 = vadd.f32 %v164_v2, %v86_v63 }
  0xa8   :  { %v1349_v48 = vmul.f32 -1.442695, %v170_v62 }
  0xa9   :  { %v1408_v46 = vpop.eup %1407 }
  0xaa   :  { %v1410_v61 = vpop.eup %1409  ;;  %v174_v45 = vadd.f32 1.0, %v1408_v46  ;;  %1411 = vpow2.f32 %v1349_v48 }
  0xab   :  { %v193_v44 = vadd.f32 1.0, %v1410_v61 }
  0xac   :  { %1413 = vrcp.f32 %v174_v45  ;;  %v186_v48 = vand.u32 2147483648, %v174_v45  ;;  %v184_v42 = vand.u32 2147483647, %v174_v45  ;;  %vm180_vm2 = vweird.f32 %v174_v45 }
  0xad   :  { %1415 = vrcp.f32 %v193_v44  ;;  %v144_v50 = vpop.f32.mrf.mxu2  ;;  %v205_v61 = vand.u32 2147483648, %v193_v44  ;;  %v203_v41 = vand.u32 2147483647, %v193_v44  ;;  %vm199_vm3 = vweird.f32 %v193_v44 }
  0xae   :  { %v169_v54 = vadd.f32 %v144_v50, %v85_v52  ;;  %vm185_vm5 = vcmp.eq.f32.partialorder %v184_v42, 8.507059e+37 }
  0xaf   :  { %vm204_vm7 = vcmp.eq.f32.partialorder %v203_v41, 8.507059e+37 }
  0xb0   :  { %v1412_v53 = vpop.eup %1411 }
  0xb1   :  { %v213_v56 = vadd.f32 1.0, %v1412_v53  ;;  %v187_v53 = vor.u32 1.1754944e-38, %v186_v48  ;;  %v3059_v48 = vld [vmem:[#allocation10_spill] sm:$0xff] }
  0xb2   :  { %v1414_v57 = vpop.eup %1413 }
  0xb3   :  { %v1416_v49 = vpop.eup %1415  ;;  %v176_v58 = vmul.f32 %v1414_v57, %v174_v45  ;;  %1417 = vrcp.f32 %v213_v56  ;;  %vm181_vm0 = vweird.f32 %v1414_v57  ;;  %v225_v45 = vand.u32 2147483648, %v213_v56 }
  0xb4   :  { %v195_v2 = vmul.f32 %v1416_v49, %v193_v44  ;;  %1419 = vtanh.f32 %v169_v54  ;;  %vm200_vm1 = vweird.f32 %v1416_v49  ;;  %vm182_vm4 = vmor %vm180_vm2, %vm181_vm0  ;;  %v206_v54 = vor.u32 1.1754944e-38, %v205_v61  ;;  %v3060_v61 = vld [vmem:[#allocation26_spill] sm:$0xff] }
  0xb5   :  { %v177_v62 = vsub.f32 1.0, %v176_v58  ;;  %vm201_vm6 = vmor %vm199_vm3, %vm200_vm1  ;;  %vm219_vm9 = vweird.f32 %v213_v56  ;;  %v226_v42 = vor.u32 1.1754944e-38, %v225_v45  ;;  %v3070_v45 = vld [vmem:[#allocation19_spill] sm:$0xff] }
  0xb6   :  { %v196_v46 = vsub.f32 1.0, %v195_v2 }
  0xb7   :  { %v178_v63 = vmul.f32 %v1414_v57, %v177_v62 }
  0xb8   :  { %v197_v59 = vmul.f32 %v1416_v49, %v196_v46 }
  0xb9   :  { %v1418_v40 = vpop.eup %1417  ;;  %v179_v38 = vadd.f32 %v1414_v57, %v178_v63 }
  0xba   :  { %v1420_v52 = vpop.eup %1419  ;;  %v215_v50 = vmul.f32 %v1418_v40, %v213_v56  ;;  %v198_v55 = vadd.f32 %v1416_v49, %v197_v59  ;;  %vm220_vm8 = vweird.f32 %v1418_v40  ;;  %v223_v59 = vand.u32 2147483647, %v213_v56  ;;  %v3057_v56 = vld [vmem:[#allocation8_spill] sm:$0xff] }
  0xbb   :  { %v183_v58 = vsel %vm182_vm4, %v1414_v57, %v179_v38  ;;  %vm221_vm10 = vmor %vm219_vm9, %vm220_vm8 }
  0xbc   :  { %v216_v2 = vsub.f32 1.0, %v215_v50  ;;  %v188_v62 = vsel %vm185_vm5, %v187_v53, %v183_v58  ;;  %v202_v37 = vsel %vm201_vm6, %v1416_v49, %v198_v55  ;;  %vm224_vm11 = vcmp.eq.f32.partialorder %v223_v59, 8.507059e+37  ;;  %v3058_v49 = vld [vmem:[#allocation9_spill] sm:$0xff]  ;;  %v3062_v50 = vld [vmem:[#allocation12_spill] sm:$0xff]  ;;  %v3065_v58 = vld [vmem:[#allocation14_spill] sm:$0xff] }
  0xbd   :  { %v207_v46 = vsel %vm204_vm7, %v206_v54, %v202_v37  ;;  %v230_v36 = vmul.f32 %v1420_v52, %v188_v62  ;;  %v3054_v37 = vld [vmem:[#allocation6_spill] sm:$0xff]  ;;  %v3061_v52 = vld [vmem:[#allocation11_spill] sm:$0xff]  ;;  %v3063_v53 = vld [vmem:[#allocation13_spill] sm:$0xff] }
  0xbe   :  { %v217_v34 = vmul.f32 %v1418_v40, %v216_v2  ;;  %v229_v51 = vmul.f32 0.0, %v207_v46  ;;  %v3064_v54 = vld [vmem:[#allocation27_spill] sm:$0xff]  ;;  %v3067_v62 = vld [vmem:[#allocation16_spill] sm:$0xff] }
  0xbf   :  { %v3066_v2 = vld [vmem:[#allocation15_spill] sm:$0xff]  ;;  %v3068_v46 = vld [vmem:[#allocation28_spill] sm:$0xff] }
  0xc0   :  { %v2139_v63 = vadd.f32 %v230_v36, %v229_v51  ;;  %v218_v44 = vadd.f32 %v1418_v40, %v217_v34  ;;  %v3052_v34 = vld [vmem:[#allocation18_spill] sm:$0xff]  ;;  %v3053_v36 = vld [vmem:[#allocation5_spill] sm:$0xff]  ;;  %v3071_v59 = vld [vmem:[#allocation20_spill] sm:$0xff] }
  0xc1   :  { %v3056_v51 = vld [vmem:[#allocation22_spill] sm:$0xff] }
  0xc2   :  { %1421 = vtanh.f32 %v2139_v63  ;;  %v222_v38 = vsel %vm221_vm10, %v1418_v40, %v218_v44  ;;  %v3055_v40 = vld [vmem:[#allocation7_spill] sm:$0xff]  ;;  %v3069_v44 = vld [vmem:[#allocation17_spill] sm:$0xff] }
  0xc3   :  { %v227_v55 = vsel %vm224_vm11, %v226_v42, %v222_v38  ;;  %v3072_v38 = vld [vmem:[#allocation29_spill] sm:$0xff] }
  0xc4   :  { %v3073_v42 = vld [vmem:[#allocation21_spill] sm:$0xff] }
  0xc8   :  { %v1422_v57 = vpop.eup %1421 }
  0xc9   :  { %v233_v41 = vmul.f32 %v1422_v57, %v227_v55  ;;  %v3074_v57 = vld [vmem:[#allocation23_spill] sm:$0xff]  ;;  %v3075_v55 = vld [vmem:[#allocation24_spill] sm:$0xff] }
  0xcb   :  { %236 = vst [vmem:[%s2917_s2] sm:$0xff] %v233_v41  ;;  %260 = vmatmul.f32.vlgmr.msrb.gmra.mxu0 %v233_v41  ;;  %280 = vmatmul.f32.vlgmr.msrb.gmra.mxu1 %v233_v41 }
  0xcc   :  { %300 = vmatmul.f32.vlgmr.msrb.gmra.mxu2 %v233_v41  ;;  %320 = vmatmul.f32.vlgmr.msrb.gmra.mxu3 %v233_v41  ;;  %v3076_v41 = vld [vmem:[#allocation30_spill] sm:$0xff] }
  0xcd   :  { %560 = vmatpush.msrb.mxu0 %v1618_v0  ;;  %580 = vmatpush.msrb.mxu1 %v1623_v1 }
  0xce   :  { %600 = vmatpush.msrb.mxu2 %v1715_v17  ;;  %620 = vmatpush.msrb.mxu3 %v3051_v60 }
  0xcf   :  { %561 = vmatpush.msrb.mxu0 %v1635_v3  ;;  %581 = vmatpush.msrb.mxu1 %v1640_v4 }
  0xd0   :  { %601 = vmatpush.msrb.mxu2 %v1727_v19  ;;  %621 = vmatpush.msrb.mxu3 %v1645_v5 }
  0xd1   :  { %562 = vmatpush.msrb.mxu0 %v1651_v6  ;;  %582 = vmatpush.msrb.mxu1 %v1656_v7 }
  0xd2   :  { %602 = vmatpush.msrb.mxu2 %v1751_v23  ;;  %622 = vmatpush.msrb.mxu3 %v1663_v8 }
  0xd3   :  { %563 = vmatpush.msrb.mxu0 %v1669_v9  ;;  %583 = vmatpush.msrb.mxu1 %v1674_v10 }
  0xd4   :  { %603 = vmatpush.msrb.mxu2 %v1775_v27  ;;  %623 = vmatpush.msrb.mxu3 %v1681_v11 }
  0xd5   :  { %564 = vmatpush.msrb.mxu0 %v1687_v12  ;;  %584 = vmatpush.msrb.mxu1 %v1692_v13 }
  0xd6   :  { %604 = vmatpush.msrb.mxu2 %v1799_v31  ;;  %624 = vmatpush.msrb.mxu3 %v1699_v14 }
  0xd7   :  { %565 = vmatpush.msrb.mxu0 %v1705_v15  ;;  %585 = vmatpush.msrb.mxu1 %v1710_v16 }
  0xd8   :  { %605 = vmatpush.msrb.mxu2 %v1823_v35  ;;  %625 = vmatpush.msrb.mxu3 %v1722_v18 }
  0xd9   :  { %566 = vmatpush.msrb.mxu0 %v1733_v20  ;;  %586 = vmatpush.msrb.mxu1 %v1738_v21 }
  0xda   :  { %606 = vmatpush.msrb.mxu2 %v1847_v39  ;;  %626 = vmatpush.msrb.mxu3 %v1746_v22 }
  0xdb   :  { %567 = vmatpush.msrb.mxu0 %v1757_v24  ;;  %587 = vmatpush.msrb.mxu1 %v1762_v25 }
  0xdc   :  { %607 = vmatpush.msrb.mxu2 %v1871_v43  ;;  %627 = vmatpush.msrb.mxu3 %v1770_v26 }
  0xdd   :  { %568 = vmatpush.msrb.mxu0 %v1781_v28  ;;  %588 = vmatpush.msrb.mxu1 %v1786_v29 }
  0xde   :  { %608 = vmatpush.msrb.mxu2 %v1895_v47  ;;  %628 = vmatpush.msrb.mxu3 %v1794_v30 }
  0xdf   :  { %569 = vmatpush.msrb.mxu0 %v1805_v32  ;;  %589 = vmatpush.msrb.mxu1 %v1810_v33 }
  0xe0   :  { %609 = vmatpush.msrb.mxu2 %v3052_v34  ;;  %629 = vmatpush.msrb.mxu3 %v3053_v36 }
  0xe1   :  { %570 = vmatpush.msrb.mxu0 %v3054_v37  ;;  %590 = vmatpush.msrb.mxu1 %v3055_v40 }
  0xe2   :  { %610 = vmatpush.msrb.mxu2 %v3056_v51  ;;  %630 = vmatpush.msrb.mxu3 %v3057_v56 }
  0xe3   :  { %571 = vmatpush.msrb.mxu0 %v3058_v49  ;;  %591 = vmatpush.msrb.mxu1 %v3059_v48 }
  0xe4   :  { %611 = vmatpush.msrb.mxu2 %v3060_v61  ;;  %631 = vmatpush.msrb.mxu3 %v3061_v52 }
  0xe5   :  { %572 = vmatpush.msrb.mxu0 %v3062_v50  ;;  %592 = vmatpush.msrb.mxu1 %v3063_v53 }
  0xe6   :  { %612 = vmatpush.msrb.mxu2 %v3064_v54  ;;  %632 = vmatpush.msrb.mxu3 %v3065_v58 }
  0xe7   :  { %573 = vmatpush.msrb.mxu0 %v3066_v2  ;;  %593 = vmatpush.msrb.mxu1 %v3067_v62  ;;  %v3077_v2 = vld [vmem:[#allocation25_spill] sm:$0xff] }
  0xe8   :  { %613 = vmatpush.msrb.mxu2 %v3068_v46  ;;  %633 = vmatpush.msrb.mxu3 %v3069_v44  ;;  %v1350_v44 = vld [vmem:[%s2916_s0 + $0x20] sm:$0xff] }
  0xe9   :  { %574 = vmatpush.msrb.mxu0 %v3070_v45  ;;  %594 = vmatpush.msrb.mxu1 %v3071_v59  ;;  %v1351_v59 = vld [vmem:[%s2916_s0 + $0x28] sm:$0xff] }
  0xea   :  { %614 = vmatpush.msrb.mxu2 %v3072_v38  ;;  %634 = vmatpush.msrb.mxu3 %v3073_v42 }
  0xeb   :  { %575 = vmatpush.msrb.mxu0 %v3074_v57  ;;  %595 = vmatpush.msrb.mxu1 %v3075_v55 }
  0xec   :  { %615 = vmatpush.msrb.mxu2 %v3076_v41  ;;  %635 = vmatpush.msrb.mxu3 %v3077_v2  ;;  %v1353_v41 = vld [vmem:[%s2916_s0 + $0x38] sm:$0xff] }
 0x148   :  { %v261_v45 = vpop.f32.mrf.mxu0  ;;  %v281_v38 = vpop.f32.mrf.mxu1 }
 0x149   :  { %v324_v46 = vadd.f32 %v1350_v44, %v261_v45  ;;  %v325_v42 = vadd.f32 %v1351_v59, %v281_v38 }
 0x14b   :  { %v1354_v62 = vmul.f32 -1.442695, %v324_v46  ;;  %v1355_v57 = vmul.f32 -1.442695, %v325_v42  ;;  %v1352_v46 = vld [vmem:[%s2916_s0 + $0x30] sm:$0xff] }
 0x14d   :  { %1423 = vpow2.f32 %v1354_v62 }
 0x14e   :  { %1425 = vpow2.f32 %v1355_v57 }
 0x14f   :  { %v321_v2 = vpop.f32.mrf.mxu3  ;;  %v301_v62 = vpop.f32.mrf.mxu2 }
 0x150   :  { %v327_v55 = vadd.f32 %v1353_v41, %v321_v2  ;;  %v326_v38 = vadd.f32 %v1352_v46, %v301_v62 }
 0x152   :  { %v1356_v58 = vmul.f32 -1.442695, %v327_v55 }
 0x153   :  { %v1424_v54 = vpop.eup %1423 }
 0x154   :  { %v1426_v53 = vpop.eup %1425  ;;  %v331_v50 = vadd.f32 1.0, %v1424_v54  ;;  %1427 = vpow2.f32 %v1356_v58 }
 0x155   :  { %v350_v52 = vadd.f32 1.0, %v1426_v53 }
 0x156   :  { %1429 = vrcp.f32 %v331_v50  ;;  %v343_v54 = vand.u32 2147483648, %v331_v50  ;;  %v341_v61 = vand.u32 2147483647, %v331_v50  ;;  %vm337_vm14 = vweird.f32 %v331_v50 }
 0x157   :  { %1431 = vrcp.f32 %v350_v52  ;;  %v362_v53 = vand.u32 2147483648, %v350_v52  ;;  %v360_v49 = vand.u32 2147483647, %v350_v52  ;;  %vm356_vm15 = vweird.f32 %v350_v52 }
 0x158   :  { %v344_v46 = vor.u32 1.1754944e-38, %v343_v54  ;;  %vm342_vm2 = vcmp.eq.f32.partialorder %v341_v61, 8.507059e+37 }
 0x159   :  { %vm361_vm3 = vcmp.eq.f32.partialorder %v360_v49, 8.507059e+37 }
 0x15a   :  { %v1428_v44 = vpop.eup %1427 }
 0x15b   :  { %v370_v45 = vadd.f32 1.0, %v1428_v44 }
 0x15c   :  { %v1430_v59 = vpop.eup %1429 }
 0x15d   :  { %v1432_v42 = vpop.eup %1431  ;;  %v333_v57 = vmul.f32 %v1430_v59, %v331_v50  ;;  %1433 = vrcp.f32 %v370_v45  ;;  %vm338_vm12 = vweird.f32 %v1430_v59  ;;  %vm376_vm5 = vweird.f32 %v370_v45 }
 0x15e   :  { %v352_v2 = vmul.f32 %v1432_v42, %v350_v52  ;;  %1435 = vtanh.f32 %v326_v38  ;;  %vm357_vm13 = vweird.f32 %v1432_v42  ;;  %vm339_vm0 = vmor %vm337_vm14, %vm338_vm12 }
 0x15f   :  { %v334_v55 = vsub.f32 1.0, %v333_v57  ;;  %vm358_vm1 = vmor %vm356_vm15, %vm357_vm13  ;;  %v363_v57 = vor.u32 1.1754944e-38, %v362_v53 }
 0x160   :  { %v353_v41 = vsub.f32 1.0, %v352_v2 }
 0x161   :  { %v335_v58 = vmul.f32 %v1430_v59, %v334_v55 }
 0x162   :  { %v354_v48 = vmul.f32 %v1432_v42, %v353_v41 }
 0x163   :  { %v1434_v56 = vpop.eup %1433  ;;  %v336_v51 = vadd.f32 %v1430_v59, %v335_v58 }
 0x164   :  { %v355_v62 = vadd.f32 %v1432_v42, %v354_v48  ;;  %v372_v44 = vmul.f32 %v1434_v56, %v370_v45  ;;  %v1436_v38 = vpop.eup %1435  ;;  %vm377_vm4 = vweird.f32 %v1434_v56  ;;  %v382_v48 = vand.u32 2147483648, %v370_v45 }
 0x165   :  { %v340_v2 = vsel %vm339_vm0, %v1430_v59, %v336_v51  ;;  %v380_v51 = vand.u32 2147483647, %v370_v45  ;;  %vm378_vm6 = vmor %vm376_vm5, %vm377_vm4 }
 0x166   :  { %v345_v40 = vsel %vm342_vm2, %v344_v46, %v340_v2  ;;  %v359_v55 = vsel %vm358_vm1, %v1432_v42, %v355_v62  ;;  %v373_v37 = vsub.f32 1.0, %v372_v44  ;;  %v383_v59 = vor.u32 1.1754944e-38, %v382_v48 }
 0x167   :  { %v364_v41 = vsel %vm361_vm3, %v363_v57, %v359_v55  ;;  %v387_v36 = vmul.f32 %v1436_v38, %v345_v40  ;;  %vm381_vm7 = vcmp.eq.f32.partialorder %v380_v51, 8.507059e+37  ;;  %v1360_v40 = vld [vmem:[%s2916_s0 + $0x50] sm:$0xff] }
 0x168   :  { %v386_v34 = vmul.f32 %v364_v41, %v2139_v63  ;;  %v374_v58 = vmul.f32 %v1434_v56, %v373_v37 }
 0x16a   :  { %v2222_v50 = vadd.f32 %v387_v36, %v386_v34  ;;  %v375_v52 = vadd.f32 %v1434_v56, %v374_v58 }
 0x16c   :  { %1437 = vtanh.f32 %v2222_v50  ;;  %v379_v61 = vsel %vm378_vm6, %v1434_v56, %v375_v52 }
 0x16d   :  { %v384_v42 = vsel %vm381_vm7, %v383_v59, %v379_v61 }
 0x172   :  { %v1438_v49 = vpop.eup %1437 }
 0x173   :  { %v390_v54 = vmul.f32 %v1438_v49, %v384_v42 }
 0x175   :  { %1357 = vst [vmem:[%s2917_s2 + $0x8] sm:$0xff] %v390_v54  ;;  %418 = vmatmul.f32.vlgmr.msra.gmra.mxu0 %v390_v54  ;;  %438 = vmatmul.f32.vlgmr.msra.gmra.mxu1 %v390_v54 }
 0x176   :  { %458 = vmatmul.f32.vlgmr.msra.gmra.mxu2 %v390_v54  ;;  %478 = vmatmul.f32.vlgmr.msra.gmra.mxu3 %v390_v54 }
 0x177   :  { %718 = vmatpush.msra.mxu0 %v1618_v0  ;;  %738 = vmatpush.msra.mxu1 %v1623_v1  ;;  %v3078_v0 = vld [vmem:[#allocation18_spill] sm:$0xff]  ;;  %v3079_v1 = vld [vmem:[#allocation5_spill] sm:$0xff] }
 0x178   :  { %758 = vmatpush.msra.mxu2 %v1715_v17  ;;  %778 = vmatpush.msra.mxu3 %v3051_v60  ;;  %v3094_v17 = vld [vmem:[#allocation28_spill] sm:$0xff] }
 0x179   :  { %719 = vmatpush.msra.mxu0 %v1635_v3  ;;  %739 = vmatpush.msra.mxu1 %v1640_v4  ;;  %v3080_v3 = vld [vmem:[#allocation6_spill] sm:$0xff]  ;;  %v3081_v4 = vld [vmem:[#allocation7_spill] sm:$0xff] }
 0x17a   :  { %759 = vmatpush.msra.mxu2 %v1727_v19  ;;  %779 = vmatpush.msra.mxu3 %v1645_v5  ;;  %v3082_v5 = vld [vmem:[#allocation22_spill] sm:$0xff]  ;;  %v3096_v19 = vld [vmem:[#allocation19_spill] sm:$0xff] }
 0x17b   :  { %720 = vmatpush.msra.mxu0 %v1651_v6  ;;  %740 = vmatpush.msra.mxu1 %v1656_v7  ;;  %v3083_v6 = vld [vmem:[#allocation8_spill] sm:$0xff]  ;;  %v3084_v7 = vld [vmem:[#allocation9_spill] sm:$0xff] }
 0x17c   :  { %760 = vmatpush.msra.mxu2 %v1751_v23  ;;  %780 = vmatpush.msra.mxu3 %v1663_v8  ;;  %v3085_v8 = vld [vmem:[#allocation10_spill] sm:$0xff]  ;;  %v3100_v23 = vld [vmem:[#allocation23_spill] sm:$0xff] }
 0x17d   :  { %721 = vmatpush.msra.mxu0 %v1669_v9  ;;  %741 = vmatpush.msra.mxu1 %v1674_v10  ;;  %v3086_v9 = vld [vmem:[#allocation26_spill] sm:$0xff]  ;;  %v3087_v10 = vld [vmem:[#allocation11_spill] sm:$0xff] }
 0x17e   :  { %761 = vmatpush.msra.mxu2 %v1775_v27  ;;  %781 = vmatpush.msra.mxu3 %v1681_v11  ;;  %v3088_v11 = vld [vmem:[#allocation12_spill] sm:$0xff] }
 0x17f   :  { %722 = vmatpush.msra.mxu0 %v1687_v12  ;;  %742 = vmatpush.msra.mxu1 %v1692_v13  ;;  %v3089_v12 = vld [vmem:[#allocation13_spill] sm:$0xff]  ;;  %v3090_v13 = vld [vmem:[#allocation27_spill] sm:$0xff]  ;;  %v1358_v27 = vld [vmem:[%s2916_s0 + $0x40] sm:$0xff] }
 0x180   :  { %762 = vmatpush.msra.mxu2 %v1799_v31  ;;  %782 = vmatpush.msra.mxu3 %v1699_v14  ;;  %v3091_v14 = vld [vmem:[#allocation14_spill] sm:$0xff] }
 0x181   :  { %723 = vmatpush.msra.mxu0 %v1705_v15  ;;  %743 = vmatpush.msra.mxu1 %v1710_v16  ;;  %v3092_v15 = vld [vmem:[#allocation15_spill] sm:$0xff]  ;;  %v3093_v16 = vld [vmem:[#allocation16_spill] sm:$0xff] }
 0x182   :  { %763 = vmatpush.msra.mxu2 %v1823_v35  ;;  %783 = vmatpush.msra.mxu3 %v1722_v18  ;;  %v3095_v18 = vld [vmem:[#allocation17_spill] sm:$0xff] }
 0x183   :  { %724 = vmatpush.msra.mxu0 %v1733_v20  ;;  %744 = vmatpush.msra.mxu1 %v1738_v21  ;;  %v3097_v20 = vld [vmem:[#allocation20_spill] sm:$0xff]  ;;  %v3098_v21 = vld [vmem:[#allocation29_spill] sm:$0xff] }
 0x184   :  { %764 = vmatpush.msra.mxu2 %v1847_v39  ;;  %784 = vmatpush.msra.mxu3 %v1746_v22  ;;  %v3099_v22 = vld [vmem:[#allocation21_spill] sm:$0xff]  ;;  %v1361_v39 = vld [vmem:[%s2916_s0 + $0x58] sm:$0xff] }
 0x185   :  { %725 = vmatpush.msra.mxu0 %v1757_v24  ;;  %745 = vmatpush.msra.mxu1 %v1762_v25  ;;  %v3101_v24 = vld [vmem:[#allocation24_spill] sm:$0xff]  ;;  %v3102_v25 = vld [vmem:[#allocation30_spill] sm:$0xff] }
 0x186   :  { %765 = vmatpush.msra.mxu2 %v1871_v43  ;;  %785 = vmatpush.msra.mxu3 %v1770_v26  ;;  %v3103_v26 = vld [vmem:[#allocation25_spill] sm:$0xff] }
 0x187   :  { %726 = vmatpush.msra.mxu0 %v1781_v28  ;;  %746 = vmatpush.msra.mxu1 %v1786_v29  ;;  %v1359_v28 = vld [vmem:[%s2916_s0 + $0x48] sm:$0xff] }
 0x188   :  { %766 = vmatpush.msra.mxu2 %v1895_v47  ;;  %786 = vmatpush.msra.mxu3 %v1794_v30 }
 0x189   :  { %727 = vmatpush.msra.mxu0 %v1805_v32  ;;  %747 = vmatpush.msra.mxu1 %v1810_v33 }
 0x18a   :  { %767 = vmatpush.msra.mxu2 %v3078_v0  ;;  %787 = vmatpush.msra.mxu3 %v3079_v1 }
 0x18b   :  { %728 = vmatpush.msra.mxu0 %v3080_v3  ;;  %748 = vmatpush.msra.mxu1 %v3081_v4 }
 0x18c   :  { %768 = vmatpush.msra.mxu2 %v3082_v5  ;;  %788 = vmatpush.msra.mxu3 %v3083_v6 }
 0x18d   :  { %729 = vmatpush.msra.mxu0 %v3084_v7  ;;  %749 = vmatpush.msra.mxu1 %v3085_v8 }
 0x18e   :  { %769 = vmatpush.msra.mxu2 %v3086_v9  ;;  %789 = vmatpush.msra.mxu3 %v3087_v10 }
 0x18f   :  { %730 = vmatpush.msra.mxu0 %v3088_v11  ;;  %750 = vmatpush.msra.mxu1 %v3089_v12 }
 0x190   :  { %770 = vmatpush.msra.mxu2 %v3090_v13  ;;  %790 = vmatpush.msra.mxu3 %v3091_v14 }
 0x191   :  { %731 = vmatpush.msra.mxu0 %v3092_v15  ;;  %751 = vmatpush.msra.mxu1 %v3093_v16 }
 0x192   :  { %771 = vmatpush.msra.mxu2 %v3094_v17  ;;  %791 = vmatpush.msra.mxu3 %v3095_v18 }
 0x193   :  { %732 = vmatpush.msra.mxu0 %v3096_v19  ;;  %752 = vmatpush.msra.mxu1 %v3097_v20 }
 0x194   :  { %772 = vmatpush.msra.mxu2 %v3098_v21  ;;  %792 = vmatpush.msra.mxu3 %v3099_v22  ;;  %v2320_v21 = vld [vmem:[%s2915_s1 + $0x1e8] sm:$0xff]  ;;  %v2326_v22 = vld [vmem:[%s2915_s1 + $0x1f0] sm:$0xff] }
 0x195   :  { %733 = vmatpush.msra.mxu0 %v3100_v23  ;;  %753 = vmatpush.msra.mxu1 %v3101_v24  ;;  %v2332_v23 = vld [vmem:[%s2915_s1 + $0x1f8] sm:$0xff]  ;;  %v2338_v24 = vld [vmem:[%s2915_s1 + $0x1c0] sm:$0xff] }
 0x196   :  { %773 = vmatpush.msra.mxu2 %v3102_v25  ;;  %793 = vmatpush.msra.mxu3 %v3103_v26  ;;  %v2344_v25 = vld [vmem:[%s2915_s1 + $0x1c8] sm:$0xff]  ;;  %v2350_v26 = vld [vmem:[%s2915_s1 + $0x1d0] sm:$0xff] }
 0x1f2   :  { %v419_v29 = vpop.f32.mrf.mxu0  ;;  %v439_v30 = vpop.f32.mrf.mxu1 }
 0x1f3   :  { %v482_v31 = vadd.f32 %v1358_v27, %v419_v29  ;;  %v483_v32 = vadd.f32 %v1359_v28, %v439_v30  ;;  %v2356_v27 = vld [vmem:[%s2915_s1 + $0x1d8] sm:$0xff]  ;;  %v2362_v28 = vld [vmem:[%s2915_s1 + $0x1a0] sm:$0xff]  ;;  %v2368_v29 = vld [vmem:[%s2915_s1 + $0x1a8] sm:$0xff] }
 0x1f4   :  { %v2374_v30 = vld [vmem:[%s2915_s1 + $0x1b0] sm:$0xff] }
 0x1f5   :  { %v1362_v33 = vmul.f32 -1.442695, %v482_v31  ;;  %v1363_v35 = vmul.f32 -1.442695, %v483_v32  ;;  %v2380_v31 = vld [vmem:[%s2915_s1 + $0x1b8] sm:$0xff]  ;;  %v2386_v32 = vld [vmem:[%s2915_s1 + $0x180] sm:$0xff] }
 0x1f7   :  { %1439 = vpow2.f32 %v1362_v33  ;;  %v2392_v33 = vld [vmem:[%s2915_s1 + $0x188] sm:$0xff] }
 0x1f8   :  { %1441 = vpow2.f32 %v1363_v35  ;;  %v2398_v35 = vld [vmem:[%s2915_s1 + $0x190] sm:$0xff] }
 0x1f9   :  { %v479_v43 = vpop.f32.mrf.mxu3  ;;  %v459_v56 = vpop.f32.mrf.mxu2 }
 0x1fa   :  { %v485_v47 = vadd.f32 %v1361_v39, %v479_v43  ;;  %v484_v62 = vadd.f32 %v1360_v40, %v459_v56  ;;  %v2404_v39 = vld [vmem:[%s2915_s1 + $0x198] sm:$0xff]  ;;  %v2410_v43 = vld [vmem:[%s2915_s1 + $0x160] sm:$0xff] }
 0x1fb   :  { %v2452_v40 = vld [vmem:[%s2915_s1 + $0x158] sm:$0xff]  ;;  %v2458_v56 = vld [vmem:[%s2915_s1 + $0x120] sm:$0xff] }
 0x1fc   :  { %v1364_v60 = vmul.f32 -1.442695, %v485_v47  ;;  %v2416_v47 = vld [vmem:[%s2915_s1 + $0x168] sm:$0xff] }
 0x1fd   :  { %v1440_v63 = vpop.eup %1439 }
 0x1fe   :  { %v1442_v34 = vpop.eup %1441  ;;  %v489_v36 = vadd.f32 1.0, %v1440_v63  ;;  %1443 = vpow2.f32 %v1364_v60  ;;  %v2422_v60 = vld [vmem:[%s2915_s1 + $0x170] sm:$0xff]  ;;  %v2428_v63 = vld [vmem:[%s2915_s1 + $0x178] sm:$0xff] }
 0x1ff   :  { %v508_v37 = vadd.f32 1.0, %v1442_v34  ;;  %v2434_v34 = vld [vmem:[%s2915_s1 + $0x140] sm:$0xff] }
 0x200   :  { %1445 = vrcp.f32 %v489_v36  ;;  %v501_v41 = vand.u32 2147483648, %v489_v36  ;;  %v499_v48 = vand.u32 2147483647, %v489_v36  ;;  %vm495_vm10 = vweird.f32 %v489_v36 }
 0x201   :  { %1447 = vrcp.f32 %v508_v37  ;;  %v520_v58 = vand.u32 2147483648, %v508_v37  ;;  %v518_v61 = vand.u32 2147483647, %v508_v37  ;;  %vm514_vm11 = vweird.f32 %v508_v37 }
 0x202   :  { %v502_v42 = vor.u32 1.1754944e-38, %v501_v41  ;;  %vm500_vm14 = vcmp.eq.f32.partialorder %v499_v48, 8.507059e+37  ;;  %v2518_v41 = vld [vmem:[%s2915_s1 + $0xf0] sm:$0xff]  ;;  %v2536_v48 = vld [vmem:[%s2915_s1 + $0xc8] sm:$0xff] }
 0x203   :  { %v521_v1 = vor.u32 1.1754944e-38, %v520_v58  ;;  %vm519_vm15 = vcmp.eq.f32.partialorder %v518_v61, 8.507059e+37  ;;  %v2524_v58 = vld [vmem:[%s2915_s1 + $0xf8] sm:$0xff] }
 0x204   :  { %v1444_v45 = vpop.eup %1443  ;;  %v2548_v61 = vld [vmem:[%s2915_s1 + $0xd8] sm:$0xff] }
 0x205   :  { %v528_v53 = vadd.f32 1.0, %v1444_v45  ;;  %v2464_v45 = vld [vmem:[%s2915_s1 + $0x128] sm:$0xff]  ;;  %3105 = vst [vmem:[#allocation18_spill] sm:$0xff] %v2548_v61 }
 0x206   :  { %v1446_v46 = vpop.eup %1445 }
 0x207   :  { %v1448_v44 = vpop.eup %1447  ;;  %v491_v57 = vmul.f32 %v1446_v46, %v489_v36  ;;  %1449 = vrcp.f32 %v528_v53  ;;  %vm496_vm8 = vweird.f32 %v1446_v46  ;;  %v540_v14 = vand.u32 2147483648, %v528_v53  ;;  %v2440_v36 = vld [vmem:[%s2915_s1 + $0x148] sm:$0xff] }
 0x208   :  { %v510_v2 = vmul.f32 %v1448_v44, %v508_v37  ;;  %1451 = vtanh.f32 %v484_v62  ;;  %vm515_vm9 = vweird.f32 %v1448_v44  ;;  %vm497_vm12 = vmor %vm495_vm10, %vm496_vm8  ;;  %vm534_vm1 = vweird.f32 %v528_v53  ;;  %v2446_v37 = vld [vmem:[%s2915_s1 + $0x150] sm:$0xff]  ;;  %v2482_v62 = vld [vmem:[%s2915_s1 + $0x100] sm:$0xff] }
 0x209   :  { %v492_v38 = vsub.f32 1.0, %v491_v57  ;;  %vm516_vm13 = vmor %vm514_vm11, %vm515_vm9  ;;  %v538_v15 = vand.u32 2147483647, %v528_v53  ;;  %v541_v17 = vor.u32 1.1754944e-38, %v540_v14  ;;  %v2494_v57 = vld [vmem:[%s2915_s1 + $0x110] sm:$0xff]  ;;  %v2650_v14 = vld [vmem:[%s2915_s1 + $0x20] sm:$0xff] }
 0x20a   :  { %v511_v55 = vsub.f32 1.0, %v510_v2  ;;  %v2500_v2 = vld [vmem:[%s2915_s1 + $0x118] sm:$0xff]  ;;  %3122 = vst [vmem:[#allocation17_spill] sm:$0xff] %v2650_v14 }
 0x20b   :  { %v493_v52 = vmul.f32 %v1446_v46, %v492_v38  ;;  %vm539_vm3 = vcmp.eq.f32.partialorder %v538_v15, 8.507059e+37  ;;  %v2506_v38 = vld [vmem:[%s2915_s1 + $0xe0] sm:$0xff]  ;;  %v2656_v15 = vld [vmem:[%s2915_s1 + $0x28] sm:$0xff] }
 0x20c   :  { %v512_v51 = vmul.f32 %v1448_v44, %v511_v55  ;;  %v2512_v55 = vld [vmem:[%s2915_s1 + $0xe8] sm:$0xff]  ;;  %3123 = vst [vmem:[#allocation19_spill] sm:$0xff] %v2656_v15 }
 0x20d   :  { %v1450_v59 = vpop.eup %1449  ;;  %v494_v49 = vadd.f32 %v1446_v46, %v493_v52  ;;  %v2530_v52 = vld [vmem:[%s2915_s1 + $0xc0] sm:$0xff] }
 0x20e   :  { %v513_v54 = vadd.f32 %v1448_v44, %v512_v51  ;;  %v530_v0 = vmul.f32 %v1450_v59, %v528_v53  ;;  %v1452_v4 = vpop.eup %1451  ;;  %vm535_vm0 = vweird.f32 %v1450_v59  ;;  %v2470_v53 = vld [vmem:[%s2915_s1 + $0x130] sm:$0xff] }
 0x20f   :  { %v498_v3 = vsel %vm497_vm12, %v1446_v46, %v494_v49  ;;  %vm536_vm2 = vmor %vm534_vm1, %vm535_vm0  ;;  %v2476_v46 = vld [vmem:[%s2915_s1 + $0x138] sm:$0xff]  ;;  %v2542_v51 = vld [vmem:[%s2915_s1 + $0xd0] sm:$0xff] }
 0x210   :  { %v503_v5 = vsel %vm500_vm14, %v502_v42, %v498_v3  ;;  %v517_v6 = vsel %vm516_vm13, %v1448_v44, %v513_v54  ;;  %v531_v7 = vsub.f32 1.0, %v530_v0  ;;  %v2488_v44 = vld [vmem:[%s2915_s1 + $0x108] sm:$0xff]  ;;  %3104 = vst [vmem:[#allocation4_spill] sm:$0xff] %v2542_v51  ;;  %v2566_v42 = vld [vmem:[%s2915_s1 + $0xb0] sm:$0xff]  ;;  %v2572_v54 = vld [vmem:[%s2915_s1 + $0xb8] sm:$0xff] }
 0x211   :  { %v522_v8 = vsel %vm519_vm15, %v521_v1, %v517_v6  ;;  %v545_v9 = vmul.f32 %v1452_v4, %v503_v5  ;;  %v2560_v49 = vld [vmem:[%s2915_s1 + $0xa8] sm:$0xff]  ;;  %3108 = vst [vmem:[#allocation7_spill] sm:$0xff] %v2566_v42  ;;  %v2578_v0 = vld [vmem:[%s2915_s1 + $0x80] sm:$0xff]  ;;  %v2590_v3 = vld [vmem:[%s2915_s1 + $0x90] sm:$0xff] }
 0x212   :  { %v544_v10 = vmul.f32 %v522_v8, %v2222_v50  ;;  %v532_v11 = vmul.f32 %v1450_v59, %v531_v7  ;;  %v2314_v50 = vld [vmem:[%s2915_s1 + $0x1e0] sm:$0xff]  ;;  %3107 = vst [vmem:[#allocation6_spill] sm:$0xff] %v2560_v49  ;;  %v2584_v1 = vld [vmem:[%s2915_s1 + $0x88] sm:$0xff]  ;;  %v2596_v4 = vld [vmem:[%s2915_s1 + $0x98] sm:$0xff] }
 0x213   :  { %3109 = vst [vmem:[#allocation22_spill] sm:$0xff] %v2572_v54  ;;  %v2602_v5 = vld [vmem:[%s2915_s1 + $0x60] sm:$0xff]  ;;  %v2608_v6 = vld [vmem:[%s2915_s1 + $0x68] sm:$0xff]  ;;  %v2614_v7 = vld [vmem:[%s2915_s1 + $0x70] sm:$0xff] }
 0x214   :  { %v2305_v12 = vadd.f32 %v545_v9, %v544_v10  ;;  %v533_v13 = vadd.f32 %v1450_v59, %v532_v11  ;;  %3110 = vst [vmem:[#allocation8_spill] sm:$0xff] %v2578_v0  ;;  %v2620_v8 = vld [vmem:[%s2915_s1 + $0x78] sm:$0xff]  ;;  %v2626_v9 = vld [vmem:[%s2915_s1 + $0x40] sm:$0xff]  ;;  %v2632_v10 = vld [vmem:[%s2915_s1 + $0x48] sm:$0xff] }
 0x215   :  { %3111 = vst [vmem:[#allocation9_spill] sm:$0xff] %v2584_v1  ;;  %v2638_v11 = vld [vmem:[%s2915_s1 + $0x50] sm:$0xff] }
 0x216   :  { %1453 = vtanh.f32 %v2305_v12  ;;  %v537_v16 = vsel %vm536_vm2, %v1450_v59, %v533_v13  ;;  %v2554_v59 = vld [vmem:[%s2915_s1 + $0xa0] sm:$0xff]  ;;  %3112 = vst [vmem:[#allocation10_spill] sm:$0xff] %v2590_v3  ;;  %v2644_v13 = vld [vmem:[%s2915_s1 + $0x58] sm:$0xff] }
 0x217   :  { %v542_v19 = vsel %vm539_vm3, %v541_v17, %v537_v16  ;;  %3106 = vst [vmem:[#allocation5_spill] sm:$0xff] %v2554_v59  ;;  %v2662_v16 = vld [vmem:[%s2915_s1 + $0x30] sm:$0xff]  ;;  %v2668_v17 = vld [vmem:[%s2915_s1 + $0x38] sm:$0xff] }
 0x218   :  { %3113 = vst [vmem:[#allocation26_spill] sm:$0xff] %v2596_v4 }
 0x219   :  { %3114 = vst [vmem:[#allocation11_spill] sm:$0xff] %v2602_v5 }
 0x21a   :  { %3115 = vst [vmem:[#allocation12_spill] sm:$0xff] %v2608_v6 }
 0x21b   :  { %3116 = vst [vmem:[#allocation13_spill] sm:$0xff] %v2614_v7 }
 0x21c   :  { %v1454_v18 = vpop.eup %1453  ;;  %3117 = vst [vmem:[#allocation27_spill] sm:$0xff] %v2620_v8 }
 0x21d   :  { %v548_v20 = vmul.f32 %v1454_v18, %v542_v19  ;;  %3118 = vst [vmem:[#allocation14_spill] sm:$0xff] %v2626_v9  ;;  %v2674_v18 = vld [vmem:[%s2915_s1] sm:$0xff]  ;;  %v2680_v19 = vld [vmem:[%s2915_s1 + $0x8] sm:$0xff] }
 0x21e   :  { %3119 = vst [vmem:[#allocation15_spill] sm:$0xff] %v2632_v10 }
 0x21f   :  { %1365 = vst [vmem:[%s2917_s2 + $0x10] sm:$0xff] %v548_v20  ;;  %576 = vmatmul.f32.vlgmr.msrb.gmra.mxu0 %v548_v20  ;;  %596 = vmatmul.f32.vlgmr.msrb.gmra.mxu1 %v548_v20 }
 0x220   :  { %616 = vmatmul.f32.vlgmr.msrb.gmra.mxu2 %v548_v20  ;;  %636 = vmatmul.f32.vlgmr.msrb.gmra.mxu3 %v548_v20  ;;  %3120 = vst [vmem:[#allocation16_spill] sm:$0xff] %v2638_v11  ;;  %v2686_v20 = vld [vmem:[%s2915_s1 + $0x10] sm:$0xff] }
 0x221   :  { %876 = vmatpush.msrb.mxu0 %v2314_v50  ;;  %896 = vmatpush.msrb.mxu1 %v2320_v21  ;;  %3121 = vst [vmem:[#allocation28_spill] sm:$0xff] %v2644_v13 }
 0x222   :  { %916 = vmatpush.msrb.mxu2 %v2326_v22  ;;  %936 = vmatpush.msrb.mxu3 %v2332_v23  ;;  %3124 = vst [vmem:[#allocation20_spill] sm:$0xff] %v2662_v16 }
 0x223   :  { %877 = vmatpush.msrb.mxu0 %v2338_v24  ;;  %897 = vmatpush.msrb.mxu1 %v2344_v25  ;;  %3125 = vst [vmem:[#allocation29_spill] sm:$0xff] %v2668_v17 }
 0x224   :  { %917 = vmatpush.msrb.mxu2 %v2350_v26  ;;  %937 = vmatpush.msrb.mxu3 %v2356_v27  ;;  %3126 = vst [vmem:[#allocation21_spill] sm:$0xff] %v2674_v18 }
 0x225   :  { %878 = vmatpush.msrb.mxu0 %v2362_v28  ;;  %898 = vmatpush.msrb.mxu1 %v2368_v29  ;;  %3127 = vst [vmem:[#allocation23_spill] sm:$0xff] %v2680_v19 }
 0x226   :  { %918 = vmatpush.msrb.mxu2 %v2374_v30  ;;  %938 = vmatpush.msrb.mxu3 %v2380_v31  ;;  %3128 = vst [vmem:[#allocation24_spill] sm:$0xff] %v2686_v20 }
 0x227   :  { %879 = vmatpush.msrb.mxu0 %v2386_v32  ;;  %899 = vmatpush.msrb.mxu1 %v2392_v33 }
 0x228   :  { %919 = vmatpush.msrb.mxu2 %v2398_v35  ;;  %939 = vmatpush.msrb.mxu3 %v2404_v39 }
 0x229   :  { %880 = vmatpush.msrb.mxu0 %v2410_v43  ;;  %900 = vmatpush.msrb.mxu1 %v2416_v47 }
 0x22a   :  { %920 = vmatpush.msrb.mxu2 %v2422_v60  ;;  %940 = vmatpush.msrb.mxu3 %v2428_v63 }
 0x22b   :  { %881 = vmatpush.msrb.mxu0 %v2434_v34  ;;  %901 = vmatpush.msrb.mxu1 %v2440_v36 }
 0x22c   :  { %921 = vmatpush.msrb.mxu2 %v2446_v37  ;;  %941 = vmatpush.msrb.mxu3 %v2452_v40 }
 0x22d   :  { %882 = vmatpush.msrb.mxu0 %v2458_v56  ;;  %902 = vmatpush.msrb.mxu1 %v2464_v45 }
 0x22e   :  { %922 = vmatpush.msrb.mxu2 %v2470_v53  ;;  %942 = vmatpush.msrb.mxu3 %v2476_v46 }
 0x22f   :  { %883 = vmatpush.msrb.mxu0 %v2482_v62  ;;  %903 = vmatpush.msrb.mxu1 %v2488_v44 }
 0x230   :  { %923 = vmatpush.msrb.mxu2 %v2494_v57  ;;  %943 = vmatpush.msrb.mxu3 %v2500_v2 }
 0x231   :  { %884 = vmatpush.msrb.mxu0 %v2506_v38  ;;  %904 = vmatpush.msrb.mxu1 %v2512_v55 }
 0x232   :  { %924 = vmatpush.msrb.mxu2 %v2518_v41  ;;  %944 = vmatpush.msrb.mxu3 %v2524_v58 }
 0x233   :  { %885 = vmatpush.msrb.mxu0 %v2530_v52  ;;  %905 = vmatpush.msrb.mxu1 %v2536_v48 }
 0x234   :  { %925 = vmatpush.msrb.mxu2 %v2542_v51  ;;  %945 = vmatpush.msrb.mxu3 %v2548_v61 }
 0x235   :  { %886 = vmatpush.msrb.mxu0 %v2554_v59  ;;  %906 = vmatpush.msrb.mxu1 %v2560_v49 }
 0x236   :  { %926 = vmatpush.msrb.mxu2 %v2566_v42  ;;  %946 = vmatpush.msrb.mxu3 %v2572_v54 }
 0x237   :  { %887 = vmatpush.msrb.mxu0 %v2578_v0  ;;  %907 = vmatpush.msrb.mxu1 %v2584_v1 }
 0x238   :  { %927 = vmatpush.msrb.mxu2 %v2590_v3  ;;  %947 = vmatpush.msrb.mxu3 %v2596_v4 }
 0x239   :  { %888 = vmatpush.msrb.mxu0 %v2602_v5  ;;  %908 = vmatpush.msrb.mxu1 %v2608_v6 }
 0x23a   :  { %928 = vmatpush.msrb.mxu2 %v2614_v7  ;;  %948 = vmatpush.msrb.mxu3 %v2620_v8 }
 0x23b   :  { %889 = vmatpush.msrb.mxu0 %v2626_v9  ;;  %909 = vmatpush.msrb.mxu1 %v2632_v10  ;;  %v1369_v10 = vld [vmem:[%s2916_s0 + $0x78] sm:$0xff] }
 0x23c   :  { %929 = vmatpush.msrb.mxu2 %v2638_v11  ;;  %949 = vmatpush.msrb.mxu3 %v2644_v13 }
 0x23d   :  { %890 = vmatpush.msrb.mxu0 %v2650_v14  ;;  %910 = vmatpush.msrb.mxu1 %v2656_v15 }
 0x23e   :  { %930 = vmatpush.msrb.mxu2 %v2662_v16  ;;  %950 = vmatpush.msrb.mxu3 %v2668_v17  ;;  %v2692_v17 = vld [vmem:[%s2915_s1 + $0x18] sm:$0xff] }
 0x23f   :  { %891 = vmatpush.msrb.mxu0 %v2674_v18  ;;  %911 = vmatpush.msrb.mxu1 %v2680_v19  ;;  %3129 = vst [vmem:[#allocation30_spill] sm:$0xff] %v2692_v17  ;;  %v1366_v18 = vld [vmem:[%s2916_s0 + $0x60] sm:$0xff]  ;;  %v1367_v19 = vld [vmem:[%s2916_s0 + $0x68] sm:$0xff] }
 0x240   :  { %931 = vmatpush.msrb.mxu2 %v2686_v20  ;;  %951 = vmatpush.msrb.mxu3 %v2692_v17 }
 0x29c   :  { %v577_v16 = vpop.f32.mrf.mxu0  ;;  %v597_v15 = vpop.f32.mrf.mxu1 }
 0x29d   :  { %v640_v14 = vadd.f32 %v1366_v18, %v577_v16  ;;  %v641_v13 = vadd.f32 %v1367_v19, %v597_v15 }
 0x29f   :  { %v1370_v20 = vmul.f32 -1.442695, %v640_v14  ;;  %v1371_v11 = vmul.f32 -1.442695, %v641_v13  ;;  %v1368_v13 = vld [vmem:[%s2916_s0 + $0x70] sm:$0xff] }
 0x2a1   :  { %1455 = vpow2.f32 %v1370_v20 }
 0x2a2   :  { %1457 = vpow2.f32 %v1371_v11 }
 0x2a3   :  { %v637_v17 = vpop.f32.mrf.mxu3  ;;  %v617_v14 = vpop.f32.mrf.mxu2 }
 0x2a4   :  { %v643_v9 = vadd.f32 %v1369_v10, %v637_v17  ;;  %v642_v19 = vadd.f32 %v1368_v13, %v617_v14 }
 0x2a6   :  { %v1372_v8 = vmul.f32 -1.442695, %v643_v9 }
 0x2a7   :  { %v1456_v7 = vpop.eup %1455 }
 0x2a8   :  { %v1458_v6 = vpop.eup %1457  ;;  %v647_v5 = vadd.f32 1.0, %v1456_v7  ;;  %1459 = vpow2.f32 %v1372_v8 }
 0x2a9   :  { %v666_v4 = vadd.f32 1.0, %v1458_v6 }
 0x2aa   :  { %1461 = vrcp.f32 %v647_v5  ;;  %v659_v7 = vand.u32 2147483648, %v647_v5  ;;  %v657_v3 = vand.u32 2147483647, %v647_v5  ;;  %vm653_vm6 = vweird.f32 %v647_v5 }
 0x2ab   :  { %1463 = vrcp.f32 %v666_v4  ;;  %v678_v6 = vand.u32 2147483648, %v666_v4  ;;  %v676_v0 = vand.u32 2147483647, %v666_v4  ;;  %vm672_vm7 = vweird.f32 %v666_v4 }
 0x2ac   :  { %v660_v13 = vor.u32 1.1754944e-38, %v659_v7  ;;  %vm658_vm10 = vcmp.eq.f32.partialorder %v657_v3, 8.507059e+37 }
 0x2ad   :  { %vm677_vm11 = vcmp.eq.f32.partialorder %v676_v0, 8.507059e+37 }
 0x2ae   :  { %v1460_v15 = vpop.eup %1459 }
 0x2af   :  { %v686_v16 = vadd.f32 1.0, %v1460_v15 }
 0x2b0   :  { %v1462_v18 = vpop.eup %1461 }
 0x2b1   :  { %v1464_v11 = vpop.eup %1463  ;;  %v649_v20 = vmul.f32 %v1462_v18, %v647_v5  ;;  %1465 = vrcp.f32 %v686_v16  ;;  %vm654_vm4 = vweird.f32 %v1462_v18  ;;  %vm692_vm13 = vweird.f32 %v686_v16 }
 0x2b2   :  { %v668_v9 = vmul.f32 %v1464_v11, %v666_v4  ;;  %1467 = vtanh.f32 %v642_v19  ;;  %vm673_vm5 = vweird.f32 %v1464_v11  ;;  %vm655_vm8 = vmor %vm653_vm6, %vm654_vm4 }
 0x2b3   :  { %v650_v10 = vsub.f32 1.0, %v649_v20  ;;  %vm674_vm9 = vmor %vm672_vm7, %vm673_vm5  ;;  %v679_v20 = vor.u32 1.1754944e-38, %v678_v6  ;;  %v3137_v6 = vld [vmem:[#allocation9_spill] sm:$0xff] }
 0x2b4   :  { %v669_v17 = vsub.f32 1.0, %v668_v9 }
 0x2b5   :  { %v651_v8 = vmul.f32 %v1462_v18, %v650_v10 }
 0x2b6   :  { %v670_v1 = vmul.f32 %v1464_v11, %v669_v17 }
 0x2b7   :  { %v1466_v54 = vpop.eup %1465  ;;  %v652_v42 = vadd.f32 %v1462_v18, %v651_v8 }
 0x2b8   :  { %v671_v14 = vadd.f32 %v1464_v11, %v670_v1  ;;  %v688_v15 = vmul.f32 %v1466_v54, %v686_v16  ;;  %v1468_v19 = vpop.eup %1467  ;;  %vm693_vm12 = vweird.f32 %v1466_v54  ;;  %v698_v1 = vand.u32 2147483648, %v686_v16 }
 0x2b9   :  { %v656_v9 = vsel %vm655_vm8, %v1462_v18, %v652_v42  ;;  %v696_v42 = vand.u32 2147483647, %v686_v16  ;;  %vm694_vm14 = vmor %vm692_vm13, %vm693_vm12  ;;  %v3136_v16 = vld [vmem:[#allocation8_spill] sm:$0xff] }
 0x2ba   :  { %v661_v49 = vsel %vm658_vm10, %v660_v13, %v656_v9  ;;  %v675_v10 = vsel %vm674_vm9, %v1464_v11, %v671_v14  ;;  %v689_v59 = vsub.f32 1.0, %v688_v15  ;;  %v699_v18 = vor.u32 1.1754944e-38, %v698_v1  ;;  %v3138_v13 = vld [vmem:[#allocation10_spill] sm:$0xff]  ;;  %v3140_v15 = vld [vmem:[#allocation11_spill] sm:$0xff]  ;;  %v3142_v9 = vld [vmem:[#allocation13_spill] sm:$0xff] }
 0x2bb   :  { %v680_v17 = vsel %vm677_vm11, %v679_v20, %v675_v10  ;;  %v703_v61 = vmul.f32 %v1468_v19, %v661_v49  ;;  %vm697_vm15 = vcmp.eq.f32.partialorder %v696_v42, 8.507059e+37  ;;  %v3134_v49 = vld [vmem:[#allocation7_spill] sm:$0xff]  ;;  %v3139_v14 = vld [vmem:[#allocation26_spill] sm:$0xff]  ;;  %v3141_v20 = vld [vmem:[#allocation12_spill] sm:$0xff] }
 0x2bc   :  { %v702_v51 = vmul.f32 %v680_v17, %v2305_v12  ;;  %v690_v8 = vmul.f32 %v1466_v54, %v689_v59  ;;  %v3130_v12 = vld [vmem:[#allocation4_spill] sm:$0xff]  ;;  %v3133_v59 = vld [vmem:[#allocation6_spill] sm:$0xff]  ;;  %v3143_v19 = vld [vmem:[#allocation27_spill] sm:$0xff] }
 0x2bd   :  { %v3144_v10 = vld [vmem:[#allocation14_spill] sm:$0xff]  ;;  %v3145_v17 = vld [vmem:[#allocation15_spill] sm:$0xff]  ;;  %v3148_v1 = vld [vmem:[#allocation17_spill] sm:$0xff] }
 0x2be   :  { %v2708_v5 = vadd.f32 %v703_v61, %v702_v51  ;;  %v691_v4 = vadd.f32 %v1466_v54, %v690_v8  ;;  %v3131_v51 = vld [vmem:[#allocation18_spill] sm:$0xff]  ;;  %v3132_v61 = vld [vmem:[#allocation5_spill] sm:$0xff]  ;;  %v3146_v8 = vld [vmem:[#allocation16_spill] sm:$0xff] }
 0x2bf   :  { %v3149_v42 = vld [vmem:[#allocation19_spill] sm:$0xff] }
 0x2c0   :  { %1469 = vtanh.f32 %v2708_v5  ;;  %v695_v3 = vsel %vm694_vm14, %v1466_v54, %v691_v4  ;;  %v3135_v54 = vld [vmem:[#allocation22_spill] sm:$0xff]  ;;  %v3147_v4 = vld [vmem:[#allocation28_spill] sm:$0xff] }
 0x2c1   :  { %v700_v11 = vsel %vm697_vm15, %v699_v18, %v695_v3  ;;  %v3150_v3 = vld [vmem:[#allocation20_spill] sm:$0xff]  ;;  %v3151_v18 = vld [vmem:[#allocation29_spill] sm:$0xff] }
 0x2c6   :  { %v1470_v0 = vpop.eup %1469 }
 0x2c7   :  { %v706_v7 = vmul.f32 %v1470_v0, %v700_v11  ;;  %v3152_v0 = vld [vmem:[#allocation21_spill] sm:$0xff]  ;;  %v3153_v11 = vld [vmem:[#allocation23_spill] sm:$0xff] }
 0x2c9   :  { %1373 = vst [vmem:[%s2917_s2 + $0x18] sm:$0xff] %v706_v7  ;;  %734 = vmatmul.f32.vlgmr.msra.gmra.mxu0 %v706_v7  ;;  %754 = vmatmul.f32.vlgmr.msra.gmra.mxu1 %v706_v7 }
 0x2ca   :  { %774 = vmatmul.f32.vlgmr.msra.gmra.mxu2 %v706_v7  ;;  %794 = vmatmul.f32.vlgmr.msra.gmra.mxu3 %v706_v7  ;;  %v3154_v7 = vld [vmem:[#allocation24_spill] sm:$0xff] }
 0x2cb   :  { %1034 = vmatpush.msra.mxu0 %v2314_v50  ;;  %1054 = vmatpush.msra.mxu1 %v2320_v21 }
 0x2cc   :  { %1074 = vmatpush.msra.mxu2 %v2326_v22  ;;  %1094 = vmatpush.msra.mxu3 %v2332_v23 }
 0x2cd   :  { %1035 = vmatpush.msra.mxu0 %v2338_v24  ;;  %1055 = vmatpush.msra.mxu1 %v2344_v25 }
 0x2ce   :  { %1075 = vmatpush.msra.mxu2 %v2350_v26  ;;  %1095 = vmatpush.msra.mxu3 %v2356_v27 }
 0x2cf   :  { %1036 = vmatpush.msra.mxu0 %v2362_v28  ;;  %1056 = vmatpush.msra.mxu1 %v2368_v29 }
 0x2d0   :  { %1076 = vmatpush.msra.mxu2 %v2374_v30  ;;  %1096 = vmatpush.msra.mxu3 %v2380_v31 }
 0x2d1   :  { %1037 = vmatpush.msra.mxu0 %v2386_v32  ;;  %1057 = vmatpush.msra.mxu1 %v2392_v33 }
 0x2d2   :  { %1077 = vmatpush.msra.mxu2 %v2398_v35  ;;  %1097 = vmatpush.msra.mxu3 %v2404_v39 }
 0x2d3   :  { %1038 = vmatpush.msra.mxu0 %v2410_v43  ;;  %1058 = vmatpush.msra.mxu1 %v2416_v47 }
 0x2d4   :  { %1078 = vmatpush.msra.mxu2 %v2422_v60  ;;  %1098 = vmatpush.msra.mxu3 %v2428_v63 }
 0x2d5   :  { %1039 = vmatpush.msra.mxu0 %v2434_v34  ;;  %1059 = vmatpush.msra.mxu1 %v2440_v36 }
 0x2d6   :  { %1079 = vmatpush.msra.mxu2 %v2446_v37  ;;  %1099 = vmatpush.msra.mxu3 %v2452_v40 }
 0x2d7   :  { %1040 = vmatpush.msra.mxu0 %v2458_v56  ;;  %1060 = vmatpush.msra.mxu1 %v2464_v45 }
 0x2d8   :  { %1080 = vmatpush.msra.mxu2 %v2470_v53  ;;  %1100 = vmatpush.msra.mxu3 %v2476_v46 }
 0x2d9   :  { %1041 = vmatpush.msra.mxu0 %v2482_v62  ;;  %1061 = vmatpush.msra.mxu1 %v2488_v44 }
 0x2da   :  { %1081 = vmatpush.msra.mxu2 %v2494_v57  ;;  %1101 = vmatpush.msra.mxu3 %v2500_v2 }
 0x2db   :  { %1042 = vmatpush.msra.mxu0 %v2506_v38  ;;  %1062 = vmatpush.msra.mxu1 %v2512_v55 }
 0x2dc   :  { %1082 = vmatpush.msra.mxu2 %v2518_v41  ;;  %1102 = vmatpush.msra.mxu3 %v2524_v58 }
 0x2dd   :  { %1043 = vmatpush.msra.mxu0 %v2530_v52  ;;  %1063 = vmatpush.msra.mxu1 %v2536_v48 }
 0x2de   :  { %1083 = vmatpush.msra.mxu2 %v3130_v12  ;;  %1103 = vmatpush.msra.mxu3 %v3131_v51 }
 0x2df   :  { %1044 = vmatpush.msra.mxu0 %v3132_v61  ;;  %1064 = vmatpush.msra.mxu1 %v3133_v59 }
 0x2e0   :  { %1084 = vmatpush.msra.mxu2 %v3134_v49  ;;  %1104 = vmatpush.msra.mxu3 %v3135_v54 }
 0x2e1   :  { %1045 = vmatpush.msra.mxu0 %v3136_v16  ;;  %1065 = vmatpush.msra.mxu1 %v3137_v6 }
 0x2e2   :  { %1085 = vmatpush.msra.mxu2 %v3138_v13  ;;  %1105 = vmatpush.msra.mxu3 %v3139_v14 }
 0x2e3   :  { %1046 = vmatpush.msra.mxu0 %v3140_v15  ;;  %1066 = vmatpush.msra.mxu1 %v3141_v20 }
 0x2e4   :  { %1086 = vmatpush.msra.mxu2 %v3142_v9  ;;  %1106 = vmatpush.msra.mxu3 %v3143_v19 }
 0x2e5   :  { %1047 = vmatpush.msra.mxu0 %v3144_v10  ;;  %1067 = vmatpush.msra.mxu1 %v3145_v17  ;;  %v3155_v10 = vld [vmem:[#allocation30_spill] sm:$0xff] }
 0x2e6   :  { %1087 = vmatpush.msra.mxu2 %v3146_v8  ;;  %1107 = vmatpush.msra.mxu3 %v3147_v4  ;;  %v1374_v4 = vld [vmem:[%s2916_s0 + $0x80] sm:$0xff] }
 0x2e7   :  { %1048 = vmatpush.msra.mxu0 %v3148_v1  ;;  %1068 = vmatpush.msra.mxu1 %v3149_v42  ;;  %v1375_v42 = vld [vmem:[%s2916_s0 + $0x88] sm:$0xff] }
 0x2e8   :  { %1088 = vmatpush.msra.mxu2 %v3150_v3  ;;  %1108 = vmatpush.msra.mxu3 %v3151_v18 }
 0x2e9   :  { %1049 = vmatpush.msra.mxu0 %v3152_v0  ;;  %1069 = vmatpush.msra.mxu1 %v3153_v11 }
 0x2ea   :  { %1089 = vmatpush.msra.mxu2 %v3154_v7  ;;  %1109 = vmatpush.msra.mxu3 %v3155_v10  ;;  %v1377_v7 = vld [vmem:[%s2916_s0 + $0x98] sm:$0xff] }
 0x346   :  { %v735_v1 = vpop.f32.mrf.mxu0  ;;  %v755_v3 = vpop.f32.mrf.mxu1 }
 0x347   :  { %v798_v8 = vadd.f32 %v1374_v4, %v735_v1  ;;  %v799_v18 = vadd.f32 %v1375_v42, %v755_v3 }
 0x349   :  { %v1378_v17 = vmul.f32 -1.442695, %v798_v8  ;;  %v1379_v0 = vmul.f32 -1.442695, %v799_v18  ;;  %v1376_v8 = vld [vmem:[%s2916_s0 + $0x90] sm:$0xff] }
 0x34b   :  { %1471 = vpow2.f32 %v1378_v17 }
 0x34c   :  { %1473 = vpow2.f32 %v1379_v0 }
 0x34d   :  { %v795_v10 = vpop.f32.mrf.mxu3  ;;  %v775_v17 = vpop.f32.mrf.mxu2 }
 0x34e   :  { %v801_v11 = vadd.f32 %v1377_v7, %v795_v10  ;;  %v800_v3 = vadd.f32 %v1376_v8, %v775_v17 }
 0x350   :  { %v1380_v19 = vmul.f32 -1.442695, %v801_v11 }
 0x351   :  { %v1472_v9 = vpop.eup %1471 }
 0x352   :  { %v1474_v20 = vpop.eup %1473  ;;  %v805_v15 = vadd.f32 1.0, %v1472_v9  ;;  %1475 = vpow2.f32 %v1380_v19 }
 0x353   :  { %v824_v14 = vadd.f32 1.0, %v1474_v20 }
 0x354   :  { %1477 = vrcp.f32 %v805_v15  ;;  %v817_v9 = vand.u32 2147483648, %v805_v15  ;;  %v815_v13 = vand.u32 2147483647, %v805_v15  ;;  %vm811_vm2 = vweird.f32 %v805_v15 }
 0x355   :  { %1479 = vrcp.f32 %v824_v14  ;;  %v836_v20 = vand.u32 2147483648, %v824_v14  ;;  %v834_v16 = vand.u32 2147483647, %v824_v14  ;;  %vm830_vm3 = vweird.f32 %v824_v14 }
 0x356   :  { %v818_v8 = vor.u32 1.1754944e-38, %v817_v9  ;;  %vm816_vm6 = vcmp.eq.f32.partialorder %v815_v13, 8.507059e+37 }
 0x357   :  { %vm835_vm7 = vcmp.eq.f32.partialorder %v834_v16, 8.507059e+37 }
 0x358   :  { %v1476_v4 = vpop.eup %1475 }
 0x359   :  { %v844_v1 = vadd.f32 1.0, %v1476_v4 }
 0x35a   :  { %v1478_v42 = vpop.eup %1477 }
 0x35b   :  { %v1480_v18 = vpop.eup %1479  ;;  %v807_v0 = vmul.f32 %v1478_v42, %v805_v15  ;;  %1481 = vrcp.f32 %v844_v1  ;;  %vm812_vm0 = vweird.f32 %v1478_v42  ;;  %vm850_vm9 = vweird.f32 %v844_v1 }
 0x35c   :  { %v826_v10 = vmul.f32 %v1480_v18, %v824_v14  ;;  %1483 = vtanh.f32 %v800_v3  ;;  %vm831_vm1 = vweird.f32 %v1480_v18  ;;  %vm813_vm4 = vmor %vm811_vm2, %vm812_vm0 }
 0x35d   :  { %v808_v11 = vsub.f32 1.0, %v807_v0  ;;  %vm832_vm5 = vmor %vm830_vm3, %vm831_vm1  ;;  %v837_v0 = vor.u32 1.1754944e-38, %v836_v20 }
 0x35e   :  { %v827_v7 = vsub.f32 1.0, %v826_v10 }
 0x35f   :  { %v809_v19 = vmul.f32 %v1478_v42, %v808_v11 }
 0x360   :  { %v828_v6 = vmul.f32 %v1480_v18, %v827_v7 }
 0x361   :  { %v1482_v54 = vpop.eup %1481  ;;  %v810_v49 = vadd.f32 %v1478_v42, %v809_v19 }
 0x362   :  { %v829_v17 = vadd.f32 %v1480_v18, %v828_v6  ;;  %v846_v4 = vmul.f32 %v1482_v54, %v844_v1  ;;  %v1484_v3 = vpop.eup %1483  ;;  %vm851_vm8 = vweird.f32 %v1482_v54  ;;  %v856_v6 = vand.u32 2147483648, %v844_v1 }
 0x363   :  { %v814_v10 = vsel %vm813_vm4, %v1478_v42, %v810_v49  ;;  %v854_v49 = vand.u32 2147483647, %v844_v1  ;;  %vm852_vm10 = vmor %vm850_vm9, %vm851_vm8 }
 0x364   :  { %v819_v59 = vsel %vm816_vm6, %v818_v8, %v814_v10  ;;  %v833_v11 = vsel %vm832_vm5, %v1480_v18, %v829_v17  ;;  %v847_v61 = vsub.f32 1.0, %v846_v4  ;;  %v857_v42 = vor.u32 1.1754944e-38, %v856_v6 }
 0x365   :  { %v838_v7 = vsel %vm835_vm7, %v837_v0, %v833_v11  ;;  %v861_v51 = vmul.f32 %v1484_v3, %v819_v59  ;;  %vm855_vm11 = vcmp.eq.f32.partialorder %v854_v49, 8.507059e+37  ;;  %v1384_v59 = vld [vmem:[%s2916_s0 + $0xb0] sm:$0xff] }
 0x366   :  { %v860_v12 = vmul.f32 %v838_v7, %v2708_v5  ;;  %v848_v19 = vmul.f32 %v1482_v54, %v847_v61 }
 0x368   :  { %v2791_v15 = vadd.f32 %v861_v51, %v860_v12  ;;  %v849_v14 = vadd.f32 %v1482_v54, %v848_v19 }
 0x36a   :  { %1485 = vtanh.f32 %v2791_v15  ;;  %v853_v13 = vsel %vm852_vm10, %v1482_v54, %v849_v14 }
 0x36b   :  { %v858_v18 = vsel %vm855_vm11, %v857_v42, %v853_v13 }
 0x370   :  { %v1486_v16 = vpop.eup %1485 }
 0x371   :  { %v864_v9 = vmul.f32 %v1486_v16, %v858_v18 }
 0x373   :  { %1381 = vst [vmem:[%s2917_s2 + $0x20] sm:$0xff] %v864_v9  ;;  %892 = vmatmul.f32.vlgmr.msrb.gmra.mxu0 %v864_v9  ;;  %912 = vmatmul.f32.vlgmr.msrb.gmra.mxu1 %v864_v9 }
 0x374   :  { %932 = vmatmul.f32.vlgmr.msrb.gmra.mxu2 %v864_v9  ;;  %952 = vmatmul.f32.vlgmr.msrb.gmra.mxu3 %v864_v9 }
 0x375   :  { %1192 = vmatpush.msrb.mxu0 %v2314_v50  ;;  %1212 = vmatpush.msrb.mxu1 %v2320_v21  ;;  %v3156_v50 = vld [vmem:[#allocation4_spill] sm:$0xff]  ;;  %v3157_v21 = vld [vmem:[#allocation18_spill] sm:$0xff] }
 0x376   :  { %1232 = vmatpush.msrb.mxu2 %v2326_v22  ;;  %1252 = vmatpush.msrb.mxu3 %v2332_v23  ;;  %v3158_v22 = vld [vmem:[#allocation5_spill] sm:$0xff]  ;;  %v3159_v23 = vld [vmem:[#allocation6_spill] sm:$0xff] }
 0x377   :  { %1193 = vmatpush.msrb.mxu0 %v2338_v24  ;;  %1213 = vmatpush.msrb.mxu1 %v2344_v25  ;;  %v3160_v24 = vld [vmem:[#allocation7_spill] sm:$0xff]  ;;  %v3161_v25 = vld [vmem:[#allocation22_spill] sm:$0xff] }
 0x378   :  { %1233 = vmatpush.msrb.mxu2 %v2350_v26  ;;  %1253 = vmatpush.msrb.mxu3 %v2356_v27  ;;  %v3162_v26 = vld [vmem:[#allocation8_spill] sm:$0xff]  ;;  %v3163_v27 = vld [vmem:[#allocation9_spill] sm:$0xff] }
 0x379   :  { %1194 = vmatpush.msrb.mxu0 %v2362_v28  ;;  %1214 = vmatpush.msrb.mxu1 %v2368_v29  ;;  %v3164_v28 = vld [vmem:[#allocation10_spill] sm:$0xff] }
 0x37a   :  { %1234 = vmatpush.msrb.mxu2 %v2374_v30  ;;  %1254 = vmatpush.msrb.mxu3 %v2380_v31  ;;  %v3165_v29 = vld [vmem:[#allocation26_spill] sm:$0xff]  ;;  %v3166_v30 = vld [vmem:[#allocation11_spill] sm:$0xff]  ;;  %v3167_v31 = vld [vmem:[#allocation12_spill] sm:$0xff] }
 0x37b   :  { %1195 = vmatpush.msrb.mxu0 %v2386_v32  ;;  %1215 = vmatpush.msrb.mxu1 %v2392_v33  ;;  %v3168_v32 = vld [vmem:[#allocation13_spill] sm:$0xff]  ;;  %v3169_v33 = vld [vmem:[#allocation27_spill] sm:$0xff] }
 0x37c   :  { %1235 = vmatpush.msrb.mxu2 %v2398_v35  ;;  %1255 = vmatpush.msrb.mxu3 %v2404_v39  ;;  %v3170_v35 = vld [vmem:[#allocation14_spill] sm:$0xff]  ;;  %v3171_v39 = vld [vmem:[#allocation15_spill] sm:$0xff] }
 0x37d   :  { %1196 = vmatpush.msrb.mxu0 %v2410_v43  ;;  %1216 = vmatpush.msrb.mxu1 %v2416_v47  ;;  %v3172_v43 = vld [vmem:[#allocation16_spill] sm:$0xff] }
 0x37e   :  { %1236 = vmatpush.msrb.mxu2 %v2422_v60  ;;  %1256 = vmatpush.msrb.mxu3 %v2428_v63  ;;  %v3173_v47 = vld [vmem:[#allocation28_spill] sm:$0xff]  ;;  %v3174_v60 = vld [vmem:[#allocation17_spill] sm:$0xff]  ;;  %v3175_v63 = vld [vmem:[#allocation19_spill] sm:$0xff] }
 0x37f   :  { %1197 = vmatpush.msrb.mxu0 %v2434_v34  ;;  %1217 = vmatpush.msrb.mxu1 %v2440_v36  ;;  %v3176_v34 = vld [vmem:[#allocation20_spill] sm:$0xff]  ;;  %v3177_v36 = vld [vmem:[#allocation29_spill] sm:$0xff] }
 0x380   :  { %1237 = vmatpush.msrb.mxu2 %v2446_v37  ;;  %1257 = vmatpush.msrb.mxu3 %v2452_v40  ;;  %v3178_v37 = vld [vmem:[#allocation21_spill] sm:$0xff]  ;;  %v3179_v40 = vld [vmem:[#allocation23_spill] sm:$0xff] }
 0x381   :  { %1198 = vmatpush.msrb.mxu0 %v2458_v56  ;;  %1218 = vmatpush.msrb.mxu1 %v2464_v45  ;;  %v3180_v56 = vld [vmem:[#allocation24_spill] sm:$0xff]  ;;  %v3181_v45 = vld [vmem:[#allocation30_spill] sm:$0xff] }
 0x382   :  { %1238 = vmatpush.msrb.mxu2 %v2470_v53  ;;  %1258 = vmatpush.msrb.mxu3 %v2476_v46  ;;  %v1382_v53 = vld [vmem:[%s2916_s0 + $0xa0] sm:$0xff]  ;;  %v1383_v46 = vld [vmem:[%s2916_s0 + $0xa8] sm:$0xff] }
 0x383   :  { %1199 = vmatpush.msrb.mxu0 %v2482_v62  ;;  %1219 = vmatpush.msrb.mxu1 %v2488_v44 }
 0x384   :  { %1239 = vmatpush.msrb.mxu2 %v2494_v57  ;;  %1259 = vmatpush.msrb.mxu3 %v2500_v2 }
 0x385   :  { %1200 = vmatpush.msrb.mxu0 %v2506_v38  ;;  %1220 = vmatpush.msrb.mxu1 %v2512_v55 }
 0x386   :  { %1240 = vmatpush.msrb.mxu2 %v2518_v41  ;;  %1260 = vmatpush.msrb.mxu3 %v2524_v58  ;;  %v1385_v41 = vld [vmem:[%s2916_s0 + $0xb8] sm:$0xff] }
 0x387   :  { %1201 = vmatpush.msrb.mxu0 %v2530_v52  ;;  %1221 = vmatpush.msrb.mxu1 %v2536_v48 }
 0x388   :  { %1241 = vmatpush.msrb.mxu2 %v3156_v50  ;;  %1261 = vmatpush.msrb.mxu3 %v3157_v21 }
 0x389   :  { %1202 = vmatpush.msrb.mxu0 %v3158_v22  ;;  %1222 = vmatpush.msrb.mxu1 %v3159_v23 }
 0x38a   :  { %1242 = vmatpush.msrb.mxu2 %v3160_v24  ;;  %1262 = vmatpush.msrb.mxu3 %v3161_v25 }
 0x38b   :  { %1203 = vmatpush.msrb.mxu0 %v3162_v26  ;;  %1223 = vmatpush.msrb.mxu1 %v3163_v27 }
 0x38c   :  { %1243 = vmatpush.msrb.mxu2 %v3164_v28  ;;  %1263 = vmatpush.msrb.mxu3 %v3165_v29 }
 0x38d   :  { %1204 = vmatpush.msrb.mxu0 %v3166_v30  ;;  %1224 = vmatpush.msrb.mxu1 %v3167_v31 }
 0x38e   :  { %1244 = vmatpush.msrb.mxu2 %v3168_v32  ;;  %1264 = vmatpush.msrb.mxu3 %v3169_v33 }
 0x38f   :  { %1205 = vmatpush.msrb.mxu0 %v3170_v35  ;;  %1225 = vmatpush.msrb.mxu1 %v3171_v39 }
 0x390   :  { %1245 = vmatpush.msrb.mxu2 %v3172_v43  ;;  %1265 = vmatpush.msrb.mxu3 %v3173_v47 }
 0x391   :  { %1206 = vmatpush.msrb.mxu0 %v3174_v60  ;;  %1226 = vmatpush.msrb.mxu1 %v3175_v63 }
 0x392   :  { %1246 = vmatpush.msrb.mxu2 %v3176_v34  ;;  %1266 = vmatpush.msrb.mxu3 %v3177_v36  ;;  %v1391_v34 = vld [vmem:[%s2916_s0 + $0xc8] sm:$0xff] }
 0x393   :  { %1207 = vmatpush.msrb.mxu0 %v3178_v37  ;;  %1227 = vmatpush.msrb.mxu1 %v3179_v40 }
 0x394   :  { %1247 = vmatpush.msrb.mxu2 %v3180_v56  ;;  %1267 = vmatpush.msrb.mxu3 %v3181_v45 }
 0x3f0   :  { %v893_v62 = vpop.f32.mrf.mxu0  ;;  %v913_v44 = vpop.f32.mrf.mxu1 }
 0x3f1   :  { %v956_v57 = vadd.f32 %v1382_v53, %v893_v62  ;;  %v957_v2 = vadd.f32 %v1383_v46, %v913_v44  ;;  %v1393_v46 = vld [vmem:[%s2916_s0 + $0xd8] sm:$0xff] }
 0x3f3   :  { %v1386_v38 = vmul.f32 -1.442695, %v956_v57  ;;  %v1387_v55 = vmul.f32 -1.442695, %v957_v2 }
 0x3f5   :  { %1487 = vpow2.f32 %v1386_v38 }
 0x3f6   :  { %1489 = vpow2.f32 %v1387_v55 }
 0x3f7   :  { %v953_v58 = vpop.f32.mrf.mxu3  ;;  %v933_v54 = vpop.f32.mrf.mxu2 }
 0x3f8   :  { %v959_v52 = vadd.f32 %v1385_v41, %v953_v58  ;;  %v958_v17 = vadd.f32 %v1384_v59, %v933_v54  ;;  %v1392_v58 = vld [vmem:[%s2916_s0 + $0xd0] sm:$0xff] }
 0x3fa   :  { %v1388_v48 = vmul.f32 -1.442695, %v959_v52 }
 0x3fb   :  { %v1488_v5 = vpop.eup %1487 }
 0x3fc   :  { %v1490_v12 = vpop.eup %1489  ;;  %v963_v51 = vadd.f32 1.0, %v1488_v5  ;;  %1491 = vpow2.f32 %v1388_v48 }
 0x3fd   :  { %v982_v61 = vadd.f32 1.0, %v1490_v12 }
 0x3fe   :  { %1493 = vrcp.f32 %v963_v51  ;;  %v975_v7 = vand.u32 2147483648, %v963_v51  ;;  %v973_v6 = vand.u32 2147483647, %v963_v51  ;;  %vm969_vm14 = vweird.f32 %v963_v51 }
 0x3ff   :  { %1495 = vrcp.f32 %v982_v61  ;;  %v994_v19 = vand.u32 2147483648, %v982_v61  ;;  %v992_v13 = vand.u32 2147483647, %v982_v61  ;;  %vm988_vm15 = vweird.f32 %v982_v61 }
 0x400   :  { %v976_v18 = vor.u32 1.1754944e-38, %v975_v7  ;;  %vm974_vm2 = vcmp.eq.f32.partialorder %v973_v6, 8.507059e+37 }
 0x401   :  { %v995_v21 = vor.u32 1.1754944e-38, %v994_v19  ;;  %vm993_vm3 = vcmp.eq.f32.partialorder %v992_v13, 8.507059e+37 }
 0x402   :  { %v1492_v1 = vpop.eup %1491 }
 0x403   :  { %v1002_v20 = vadd.f32 1.0, %v1492_v1 }
 0x404   :  { %v1494_v8 = vpop.eup %1493 }
 0x405   :  { %v1496_v4 = vpop.eup %1495  ;;  %v965_v0 = vmul.f32 %v1494_v8, %v963_v51  ;;  %1497 = vrcp.f32 %v1002_v20  ;;  %vm970_vm12 = vweird.f32 %v1494_v8  ;;  %v1014_v33 = vand.u32 2147483648, %v1002_v20 }
 0x406   :  { %v984_v10 = vmul.f32 %v1496_v4, %v982_v61  ;;  %1499 = vtanh.f32 %v958_v17  ;;  %vm989_vm13 = vweird.f32 %v1496_v4  ;;  %vm971_vm0 = vmor %vm969_vm14, %vm970_vm12  ;;  %vm1008_vm5 = vweird.f32 %v1002_v20 }
 0x407   :  { %v966_v3 = vsub.f32 1.0, %v965_v0  ;;  %vm990_vm1 = vmor %vm988_vm15, %vm989_vm13  ;;  %v1012_v35 = vand.u32 2147483647, %v1002_v20  ;;  %v1015_v43 = vor.u32 1.1754944e-38, %v1014_v33 }
 0x408   :  { %v985_v11 = vsub.f32 1.0, %v984_v10 }
 0x409   :  { %v967_v14 = vmul.f32 %v1494_v8, %v966_v3  ;;  %vm1013_vm7 = vcmp.eq.f32.partialorder %v1012_v35, 8.507059e+37  ;;  %v1399_v35 = vld [vmem:[%s2916_s0 + $0xe8] sm:$0xff] }
 0x40a   :  { %v986_v49 = vmul.f32 %v1496_v4, %v985_v11 }
 0x40b   :  { %v1498_v42 = vpop.eup %1497  ;;  %v968_v16 = vadd.f32 %v1494_v8, %v967_v14 }
 0x40c   :  { %v987_v9 = vadd.f32 %v1496_v4, %v986_v49  ;;  %v1004_v50 = vmul.f32 %v1498_v42, %v1002_v20  ;;  %v1500_v23 = vpop.eup %1499  ;;  %vm1009_vm4 = vweird.f32 %v1498_v42 }
 0x40d   :  { %v972_v22 = vsel %vm971_vm0, %v1494_v8, %v968_v16  ;;  %vm1010_vm6 = vmor %vm1008_vm5, %vm1009_vm4 }
 0x40e   :  { %v977_v24 = vsel %vm974_vm2, %v976_v18, %v972_v22  ;;  %v991_v25 = vsel %vm990_vm1, %v1496_v4, %v987_v9  ;;  %v1005_v26 = vsub.f32 1.0, %v1004_v50 }
 0x40f   :  { %v996_v27 = vsel %vm993_vm3, %v995_v21, %v991_v25  ;;  %v1019_v28 = vmul.f32 %v1500_v23, %v977_v24 }
 0x410   :  { %v1018_v29 = vmul.f32 %v996_v27, %v2791_v15  ;;  %v1006_v30 = vmul.f32 %v1498_v42, %v1005_v26  ;;  %v1390_v15 = vld [vmem:[%s2916_s0 + $0xc0] sm:$0xff] }
 0x412   :  { %v2874_v31 = vadd.f32 %v1019_v28, %v1018_v29  ;;  %v1007_v32 = vadd.f32 %v1498_v42, %v1006_v30 }
 0x414   :  { %1501 = vtanh.f32 %v2874_v31  ;;  %v1011_v39 = vsel %vm1010_vm6, %v1498_v42, %v1007_v32 }
 0x415   :  { %v1016_v60 = vsel %vm1013_vm7, %v1015_v43, %v1011_v39 }
 0x41a   :  { %v1502_v47 = vpop.eup %1501 }
 0x41b   :  { %v1022_v63 = vmul.f32 %v1502_v47, %v1016_v60 }
 0x41d   :  { %1389 = vst [vmem:[%s2917_s2 + $0x28] sm:$0xff] %v1022_v63  ;;  %1050 = vmatmul.f32.vlgmr.msra.gmra.mxu0 %v1022_v63  ;;  %1070 = vmatmul.f32.vlgmr.msra.gmra.mxu1 %v1022_v63 }
 0x41e   :  { %1090 = vmatmul.f32.vlgmr.msra.gmra.mxu2 %v1022_v63  ;;  %1110 = vmatmul.f32.vlgmr.msra.gmra.mxu3 %v1022_v63 }
 0x49a   :  { %v1051_v36 = vpop.f32.mrf.mxu0  ;;  %v1071_v37 = vpop.f32.mrf.mxu1 }
 0x49b   :  { %v1114_v40 = vadd.f32 %v1390_v15, %v1051_v36  ;;  %v1115_v56 = vadd.f32 %v1391_v34, %v1071_v37  ;;  %v1401_v34 = vld [vmem:[%s2916_s0 + $0xf8] sm:$0xff] }
 0x49d   :  { %v1394_v45 = vmul.f32 -1.442695, %v1114_v40  ;;  %v1395_v53 = vmul.f32 -1.442695, %v1115_v56 }
 0x49f   :  { %1503 = vpow2.f32 %v1394_v45 }
 0x4a0   :  { %1505 = vpow2.f32 %v1395_v53 }
 0x4a1   :  { %v1111_v62 = vpop.f32.mrf.mxu3  ;;  %v1091_v52 = vpop.f32.mrf.mxu2 }
 0x4a2   :  { %v1117_v44 = vadd.f32 %v1393_v46, %v1111_v62  ;;  %v1116_v51 = vadd.f32 %v1392_v58, %v1091_v52  ;;  %v1400_v62 = vld [vmem:[%s2916_s0 + $0xf0] sm:$0xff] }
 0x4a4   :  { %v1396_v57 = vmul.f32 -1.442695, %v1117_v44 }
 0x4a5   :  { %v1504_v2 = vpop.eup %1503 }
 0x4a6   :  { %v1506_v38 = vpop.eup %1505  ;;  %v1121_v55 = vadd.f32 1.0, %v1504_v2  ;;  %1507 = vpow2.f32 %v1396_v57 }
 0x4a7   :  { %v1140_v41 = vadd.f32 1.0, %v1506_v38 }
 0x4a8   :  { %1509 = vrcp.f32 %v1121_v55  ;;  %v1133_v8 = vand.u32 2147483648, %v1121_v55  ;;  %v1131_v0 = vand.u32 2147483647, %v1121_v55  ;;  %vm1127_vm10 = vweird.f32 %v1121_v55 }
 0x4a9   :  { %1511 = vrcp.f32 %v1140_v41  ;;  %v1152_v17 = vand.u32 2147483648, %v1140_v41  ;;  %v1150_v3 = vand.u32 2147483647, %v1140_v41  ;;  %vm1146_vm11 = vweird.f32 %v1140_v41 }
 0x4aa   :  { %v1134_v19 = vor.u32 1.1754944e-38, %v1133_v8  ;;  %vm1132_vm14 = vcmp.eq.f32.partialorder %v1131_v0, 8.507059e+37 }
 0x4ab   :  { %v1153_v49 = vor.u32 1.1754944e-38, %v1152_v17  ;;  %vm1151_vm15 = vcmp.eq.f32.partialorder %v1150_v3, 8.507059e+37 }
 0x4ac   :  { %v1508_v48 = vpop.eup %1507 }
 0x4ad   :  { %v1160_v5 = vadd.f32 1.0, %v1508_v48 }
 0x4ae   :  { %v1510_v12 = vpop.eup %1509 }
 0x4af   :  { %v1512_v61 = vpop.eup %1511  ;;  %v1123_v59 = vmul.f32 %v1510_v12, %v1121_v55  ;;  %1513 = vrcp.f32 %v1160_v5  ;;  %vm1128_vm8 = vweird.f32 %v1510_v12  ;;  %v1172_v26 = vand.u32 2147483648, %v1160_v5 }
 0x4b0   :  { %v1142_v54 = vmul.f32 %v1512_v61, %v1140_v41  ;;  %1515 = vtanh.f32 %v1116_v51  ;;  %vm1147_vm9 = vweird.f32 %v1512_v61  ;;  %vm1129_vm12 = vmor %vm1127_vm10, %vm1128_vm8  ;;  %vm1166_vm1 = vweird.f32 %v1160_v5 }
 0x4b1   :  { %v1124_v1 = vsub.f32 1.0, %v1123_v59  ;;  %vm1148_vm13 = vmor %vm1146_vm11, %vm1147_vm9  ;;  %v1170_v27 = vand.u32 2147483647, %v1160_v5  ;;  %v1173_v29 = vor.u32 1.1754944e-38, %v1172_v26 }
 0x4b2   :  { %v1143_v20 = vsub.f32 1.0, %v1142_v54 }
 0x4b3   :  { %v1125_v4 = vmul.f32 %v1510_v12, %v1124_v1  ;;  %vm1171_vm3 = vcmp.eq.f32.partialorder %v1170_v27, 8.507059e+37 }
 0x4b4   :  { %v1144_v10 = vmul.f32 %v1512_v61, %v1143_v20 }
 0x4b5   :  { %v1514_v11 = vpop.eup %1513  ;;  %v1126_v7 = vadd.f32 %v1510_v12, %v1125_v4 }
 0x4b6   :  { %v1145_v14 = vadd.f32 %v1512_v61, %v1144_v10  ;;  %v1162_v6 = vmul.f32 %v1514_v11, %v1160_v5  ;;  %v1516_v42 = vpop.eup %1515  ;;  %vm1167_vm0 = vweird.f32 %v1514_v11 }
 0x4b7   :  { %v1130_v13 = vsel %vm1129_vm12, %v1510_v12, %v1126_v7  ;;  %vm1168_vm2 = vmor %vm1166_vm1, %vm1167_vm0 }
 0x4b8   :  { %v1135_v16 = vsel %vm1132_vm14, %v1134_v19, %v1130_v13  ;;  %v1149_v18 = vsel %vm1148_vm13, %v1512_v61, %v1145_v14  ;;  %v1163_v9 = vsub.f32 1.0, %v1162_v6 }
 0x4b9   :  { %v1154_v50 = vsel %vm1151_vm15, %v1153_v49, %v1149_v18  ;;  %v1177_v21 = vmul.f32 %v1516_v42, %v1135_v16 }
 0x4ba   :  { %v1176_v22 = vmul.f32 %v1154_v50, %v2874_v31  ;;  %v1164_v23 = vmul.f32 %v1514_v11, %v1163_v9  ;;  %v1398_v31 = vld [vmem:[%s2916_s0 + $0xe0] sm:$0xff] }
 0x4bc   :  { %v2893_v24 = vadd.f32 %v1177_v21, %v1176_v22  ;;  %v1165_v25 = vadd.f32 %v1514_v11, %v1164_v23 }
 0x4be   :  { %1517 = vtanh.f32 %v2893_v24  ;;  %v1169_v28 = vsel %vm1168_vm2, %v1514_v11, %v1165_v25 }
 0x4bf   :  { %v1174_v32 = vsel %vm1171_vm3, %v1173_v29, %v1169_v28 }
 0x4c4   :  { %v1518_v30 = vpop.eup %1517 }
 0x4c5   :  { %v1180_v33 = vmul.f32 %v1518_v30, %v1174_v32 }
 0x4c7   :  { %1397 = vst [vmem:[%s2917_s2 + $0x30] sm:$0xff] %v1180_v33  ;;  %1208 = vmatmul.f32.vlgmr.msrb.gmra.mxu0 %v1180_v33  ;;  %1228 = vmatmul.f32.vlgmr.msrb.gmra.mxu1 %v1180_v33 }
 0x4c8   :  { %1248 = vmatmul.f32.vlgmr.msrb.gmra.mxu2 %v1180_v33  ;;  %1268 = vmatmul.f32.vlgmr.msrb.gmra.mxu3 %v1180_v33 }
 0x544   :  { %v1209_v39 = vpop.f32.mrf.mxu0  ;;  %v1229_v43 = vpop.f32.mrf.mxu1 }
 0x545   :  { %v1272_v47 = vadd.f32 %v1398_v31, %v1209_v39  ;;  %v1273_v60 = vadd.f32 %v1399_v35, %v1229_v43 }
 0x547   :  { %v1402_v63 = vmul.f32 -1.442695, %v1272_v47  ;;  %v1403_v15 = vmul.f32 -1.442695, %v1273_v60 }
 0x549   :  { %1519 = vpow2.f32 %v1402_v63 }
 0x54a   :  { %1521 = vpow2.f32 %v1403_v15 }
 0x54b   :  { %v1269_v36 = vpop.f32.mrf.mxu3  ;;  %v1249_v44 = vpop.f32.mrf.mxu2 }
 0x54c   :  { %v1275_v37 = vadd.f32 %v1401_v34, %v1269_v36  ;;  %v1274_v55 = vadd.f32 %v1400_v62, %v1249_v44 }
 0x54e   :  { %v1404_v40 = vmul.f32 -1.442695, %v1275_v37 }
 0x54f   :  { %v1520_v56 = vpop.eup %1519 }
 0x550   :  { %v1522_v45 = vpop.eup %1521  ;;  %v1279_v53 = vadd.f32 1.0, %v1520_v56  ;;  %1523 = vpow2.f32 %v1404_v40 }
 0x551   :  { %v1298_v46 = vadd.f32 1.0, %v1522_v45 }
 0x552   :  { %1525 = vrcp.f32 %v1279_v53  ;;  %v1291_v12 = vand.u32 2147483648, %v1279_v53  ;;  %v1289_v59 = vand.u32 2147483647, %v1279_v53  ;;  %vm1285_vm6 = vweird.f32 %v1279_v53 }
 0x553   :  { %1527 = vrcp.f32 %v1298_v46  ;;  %v1310_v51 = vand.u32 2147483648, %v1298_v46  ;;  %v1308_v1 = vand.u32 2147483647, %v1298_v46  ;;  %vm1304_vm7 = vweird.f32 %v1298_v46 }
 0x554   :  { %v1292_v17 = vor.u32 1.1754944e-38, %v1291_v12  ;;  %vm1290_vm10 = vcmp.eq.f32.partialorder %v1289_v59, 8.507059e+37 }
 0x555   :  { %v1311_v10 = vor.u32 1.1754944e-38, %v1310_v51  ;;  %vm1309_vm11 = vcmp.eq.f32.partialorder %v1308_v1, 8.507059e+37 }
 0x556   :  { %v1524_v57 = vpop.eup %1523 }
 0x557   :  { %v1318_v2 = vadd.f32 1.0, %v1524_v57 }
 0x558   :  { %v1526_v38 = vpop.eup %1525 }
 0x559   :  { %v1528_v41 = vpop.eup %1527  ;;  %v1281_v58 = vmul.f32 %v1526_v38, %v1279_v53  ;;  %1529 = vrcp.f32 %v1318_v2  ;;  %vm1286_vm4 = vweird.f32 %v1526_v38  ;;  %v1330_v9 = vand.u32 2147483648, %v1318_v2 }
 0x55a   :  { %v1300_v52 = vmul.f32 %v1528_v41, %v1298_v46  ;;  %1531 = vtanh.f32 %v1274_v55  ;;  %vm1305_vm5 = vweird.f32 %v1528_v41  ;;  %vm1287_vm8 = vmor %vm1285_vm6, %vm1286_vm4  ;;  %vm1324_vm13 = vweird.f32 %v1318_v2 }
 0x55b   :  { %v1282_v48 = vsub.f32 1.0, %v1281_v58  ;;  %vm1306_vm9 = vmor %vm1304_vm7, %vm1305_vm5  ;;  %v1328_v50 = vand.u32 2147483647, %v1318_v2  ;;  %v1331_v22 = vor.u32 1.1754944e-38, %v1330_v9 }
 0x55c   :  { %v1301_v5 = vsub.f32 1.0, %v1300_v52 }
 0x55d   :  { %v1283_v61 = vmul.f32 %v1526_v38, %v1282_v48  ;;  %vm1329_vm15 = vcmp.eq.f32.partialorder %v1328_v50, 8.507059e+37 }
 0x55e   :  { %v1302_v54 = vmul.f32 %v1528_v41, %v1301_v5 }
 0x55f   :  { %v1530_v20 = vpop.eup %1529  ;;  %v1284_v8 = vadd.f32 %v1526_v38, %v1283_v61 }
 0x560   :  { %v1303_v4 = vadd.f32 %v1528_v41, %v1302_v54  ;;  %v1320_v0 = vmul.f32 %v1530_v20, %v1318_v2  ;;  %v1532_v11 = vpop.eup %1531  ;;  %vm1325_vm12 = vweird.f32 %v1530_v20 }
 0x561   :  { %v1288_v3 = vsel %vm1287_vm8, %v1526_v38, %v1284_v8  ;;  %vm1326_vm14 = vmor %vm1324_vm13, %vm1325_vm12 }
 0x562   :  { %v1293_v7 = vsel %vm1290_vm10, %v1292_v17, %v1288_v3  ;;  %v1307_v19 = vsel %vm1306_vm9, %v1528_v41, %v1303_v4  ;;  %v1321_v14 = vsub.f32 1.0, %v1320_v0 }
 0x563   :  { %v1312_v6 = vsel %vm1309_vm11, %v1311_v10, %v1307_v19  ;;  %v1335_v49 = vmul.f32 %v1532_v11, %v1293_v7 }
 0x564   :  { %v1334_v13 = vmul.f32 %v1312_v6, %v2893_v24  ;;  %v1322_v42 = vmul.f32 %v1530_v20, %v1321_v14 }
 0x566   :  { %v1336_v16 = vadd.f32 %v1335_v49, %v1334_v13  ;;  %v1323_v18 = vadd.f32 %v1530_v20, %v1322_v42 }
 0x568   :  { %1533 = vtanh.f32 %v1336_v16  ;;  %v1327_v21 = vsel %vm1326_vm14, %v1530_v20, %v1323_v18 }
 0x569   :  { %v1332_v25 = vsel %vm1329_vm15, %v1331_v22, %v1327_v21 }
 0x56e   :  { %v1534_v23 = vpop.eup %1533 }
 0x56f   :  { %v1338_v26 = vmul.f32 %v1534_v23, %v1332_v25 }
 0x571   :  { %1405 = vst [vmem:[%s2917_s2 + $0x38] sm:$0xff] %v1338_v26 }

</bundles_post_ra>
